<compile_context>
chip_gen: v6e
topology: v6e:2x2x1
jax: 0.10.0
libtpu: 0.0.40
codegen_flags: <defaults>
</compile_context>

<pallas_src>
import jax
import jax.numpy as jnp
from jax import lax
from jax.experimental import pallas as pl
from jax.experimental.pallas import tpu as pltpu


def _dense_attention_kernel(x_ref, w1_ref, w2_ref, o_ref, pad_ref, col_ref):
    """One block of images per grid step.

    x_ref  : (B, H, W, C)   input tile (NHWC)
    w1_ref : (9*C, C)       conv1 weight, im2col-packed (tap-major, cin inner)
    w2_ref : (9*C, C)       conv2 weight, same packing
    o_ref  : (B, H, W, C)
    pad_ref: (H+2, W+2, C)  zero-halo scratch, reused for both convs
    col_ref: (H, W, 9*C)    im2col scratch
    """
    B, H, W, C = x_ref.shape

    # Zero only the 1-pixel halo border; the interior is fully overwritten
    # below (per-step so it is correct under megacore grid sharding).
    zrow = jnp.zeros((1, W + 2, C), jnp.float32)
    zcol = jnp.zeros((H + 2, 1, C), jnp.float32)
    pad_ref[0:1, :, :] = zrow
    pad_ref[H + 1:H + 2, :, :] = zrow
    pad_ref[:, 0:1, :] = zcol
    pad_ref[:, W + 1:W + 2, :] = zcol

    def conv3x3(w_ref):
        # im2col: 3 sublane-shifted reads (dx) + cheap dy slices of those
        # values, 9 static lane-offset writes, then ONE MXU matmul with K=9*C.
        for dx in range(3):
            shifted = pad_ref[:, dx:dx + W, :]            # (H+2, W, C)
            for dy in range(3):
                t = dy * 3 + dx
                col_ref[:, :, t * C:(t + 1) * C] = shifted[dy:dy + H]
        col = col_ref[...].reshape(H * W, 9 * C)
        return jnp.dot(col, w_ref[...], preferred_element_type=jnp.float32)

    for b in range(B):  # static unroll over images packed into this block
        # ---- conv1 (3x3) + LeakyReLU(0.01) --------------------------------
        pad_ref[1:H + 1, 1:W + 1, :] = x_ref[b].astype(jnp.float32)
        h = conv3x3(w1_ref)
        h = jnp.where(h >= 0.0, h, 0.01 * h)
        # ---- conv2 (3x3) + sigmoid ----------------------------------------
        pad_ref[1:H + 1, 1:W + 1, :] = h.reshape(H, W, C)
        h = conv3x3(w2_ref)
        h = 1.0 / (1.0 + jnp.exp(-h))
        o_ref[b] = h.reshape(H, W, C).astype(o_ref.dtype)


def dense_attention_forward(x_nchw, w1_oihw, w2_oihw, *, b_tile=1):
    """x_nchw: (N, C, H, W) float32; weights in PyTorch OIHW layout."""
    N, C, H, W = x_nchw.shape
    assert N % b_tile == 0, "b_tile must divide the batch size"

    # NCHW -> NHWC (channels on the lane axis).
    x = jnp.transpose(x_nchw, (0, 2, 3, 1))

    # OIHW -> im2col-packed (9*C, C): tap-major (t = dy*3 + dx), cin inner.
    def pack(w):
        return jnp.transpose(w, (2, 3, 1, 0)).reshape(9 * C, C)

    w1p = pack(w1_oihw)
    w2p = pack(w2_oihw)

    full2d = lambda a: pl.BlockSpec(a.shape, lambda n: (0, 0))

    out_nhwc = pl.pallas_call(
        _dense_attention_kernel,
        out_shape=jax.ShapeDtypeStruct((N, H, W, C), x.dtype),
        grid_spec=pltpu.PrefetchScalarGridSpec(
            num_scalar_prefetch=0,
            grid=(N // b_tile,),
            in_specs=[
                pl.BlockSpec((b_tile, H, W, C), lambda n: (n, 0, 0, 0)),
                full2d(w1p),
                full2d(w2p),
            ],
            out_specs=pl.BlockSpec((b_tile, H, W, C), lambda n: (n, 0, 0, 0)),
            scratch_shapes=[
                pltpu.VMEM((H + 2, W + 2, C), jnp.float32),   # zero-halo pad
                pltpu.VMEM((H, W, 9 * C), jnp.float32),       # im2col buffer
            ],
        ),
        compiler_params=pltpu.CompilerParams(
            dimension_semantics=("parallel",)),
    )(x, w1p, w2p)

    return jnp.transpose(out_nhwc, (0, 3, 1, 2))   # back to NCHW


# ---------------------------------------------------------------------------
# Pure-JAX reference (lax conv, mirrors the PyTorch module exactly).
# ---------------------------------------------------------------------------
def dense_attention_reference(x_nchw, w1_oihw, w2_oihw):
    dn = ("NCHW", "OIHW", "NCHW")
    h = lax.conv_general_dilated(x_nchw, w1_oihw, (1, 1), "SAME",
                                 dimension_numbers=dn)
    h = jnp.where(h >= 0.0, h, 0.01 * h)                 # LeakyReLU(0.01)
    h = lax.conv_general_dilated(h, w2_oihw, (1, 1), "SAME",
                                 dimension_numbers=dn)
    return jax.nn.sigmoid(h)


if __name__ == "__main__":
    # Small shapes consistent with DenseAttention(planes): N=2, planes=16,
    # spatial 16x16 (W multiple of 8 keeps the im2col reshape sublane-aligned).
    N, planes, H, W = 2, 16, 16, 16

    key = jax.random.PRNGKey(0)
    kx, k1, k2 = jax.random.split(key, 3)
    x = jax.random.normal(kx, (N, planes, H, W), jnp.float32)
    w1 = jax.random.normal(k1, (planes, planes, 3, 3), jnp.float32) * 0.1
    w2 = jax.random.normal(k2, (planes, planes, 3, 3), jnp.float32) * 0.1

    out = jax.block_until_ready(dense_attention_forward(x, w1, w2, b_tile=1))
    ref = jax.block_until_ready(dense_attention_reference(x, w1, w2))

    assert out.shape == (N, planes, H, W)
    assert jnp.max(jnp.abs(out - ref)) < 1e-4, "mismatch vs reference"
    print("KERNEL_OK")
</pallas_src>

<mosaic_0001>
module attributes {stable_mosaic.version = 11 : i64} {
  func.func @_dense_attention_kernel(%arg0: i32, %arg1: memref<1x16x16x16xf32, #tpu.memory_space<vmem>>, %arg2: memref<144x16xf32, #tpu.memory_space<vmem>>, %arg3: memref<144x16xf32, #tpu.memory_space<vmem>>, %arg4: memref<1x16x16x16xf32, #tpu.memory_space<vmem>>, %arg5: memref<18x18x16xf32, #tpu.memory_space<vmem>>, %arg6: memref<16x16x144xf32, #tpu.memory_space<vmem>>) attributes {dimension_semantics = [#tpu.dimension_semantics<parallel>], iteration_bounds = array<i64: 2>, scalar_prefetch = 0 : i64, scratch_operands = 2 : i64, tpu.core_type = #tpu.core_type<tc>, window_params = [{transform_indices = @transform_0, window_bounds = array<i64: 1, 16, 16, 16>}, {pipeline_mode = #tpu.pipeline_mode<synchronous>, transform_indices = @transform_1, window_bounds = array<i64: 144, 16>}, {pipeline_mode = #tpu.pipeline_mode<synchronous>, transform_indices = @transform_2, window_bounds = array<i64: 144, 16>}, {transform_indices = @transform_3, window_bounds = array<i64: 1, 16, 16, 16>}]} {
    %cst = arith.constant 0.000000e+00 : f32
    %0 = vector.broadcast %cst : f32 to vector<1x18x16xf32>
    %cst_0 = arith.constant 0.000000e+00 : f32
    %1 = vector.broadcast %cst_0 : f32 to vector<18x1x16xf32>
    %c0 = arith.constant 0 : index
    %c0_1 = arith.constant 0 : index
    %c0_2 = arith.constant 0 : index
    %2 = vector.load %arg5[%c0, %c0_1, %c0_2] : memref<18x18x16xf32, #tpu.memory_space<vmem>>, vector<1x18x16xf32>
    tpu.vector_store %arg5[%c0, %c0_1, %c0_2], %0 {strides = array<i32>} : memref<18x18x16xf32, #tpu.memory_space<vmem>>, vector<1x18x16xf32>,
    %c17 = arith.constant 17 : index
    %c0_3 = arith.constant 0 : index
    %c0_4 = arith.constant 0 : index
    %3 = vector.load %arg5[%c17, %c0_3, %c0_4] : memref<18x18x16xf32, #tpu.memory_space<vmem>>, vector<1x18x16xf32>
    tpu.vector_store %arg5[%c17, %c0_3, %c0_4], %0 {strides = array<i32>} : memref<18x18x16xf32, #tpu.memory_space<vmem>>, vector<1x18x16xf32>,
    %c0_5 = arith.constant 0 : index
    %c0_6 = arith.constant 0 : index
    %c0_7 = arith.constant 0 : index
    %4 = vector.load %arg5[%c0_5, %c0_6, %c0_7] : memref<18x18x16xf32, #tpu.memory_space<vmem>>, vector<18x1x16xf32>
    tpu.vector_store %arg5[%c0_5, %c0_6, %c0_7], %1 {strides = array<i32>} : memref<18x18x16xf32, #tpu.memory_space<vmem>>, vector<18x1x16xf32>,
    %c0_8 = arith.constant 0 : index
    %c17_9 = arith.constant 17 : index
    %c0_10 = arith.constant 0 : index
    %5 = vector.load %arg5[%c0_8, %c17_9, %c0_10] : memref<18x18x16xf32, #tpu.memory_space<vmem>>, vector<18x1x16xf32>
    tpu.vector_store %arg5[%c0_8, %c17_9, %c0_10], %1 {strides = array<i32>} : memref<18x18x16xf32, #tpu.memory_space<vmem>>, vector<18x1x16xf32>,
    %c0_11 = arith.constant 0 : index
    %c0_12 = arith.constant 0 : index
    %c0_13 = arith.constant 0 : index
    %c0_14 = arith.constant 0 : index
    %6 = vector.load %arg1[%c0_11, %c0_12, %c0_13, %c0_14] : memref<1x16x16x16xf32, #tpu.memory_space<vmem>>, vector<1x16x16x16xf32>
    %7 = vector.shape_cast %6 : vector<1x16x16x16xf32> to vector<16x16x16xf32>
    %c1 = arith.constant 1 : index
    %c1_15 = arith.constant 1 : index
    %c0_16 = arith.constant 0 : index
    %8 = vector.load %arg5[%c1, %c1_15, %c0_16] : memref<18x18x16xf32, #tpu.memory_space<vmem>>, vector<16x16x16xf32>
    tpu.vector_store %arg5[%c1, %c1_15, %c0_16], %7 {strides = array<i32>} : memref<18x18x16xf32, #tpu.memory_space<vmem>>, vector<16x16x16xf32>,
    %c0_17 = arith.constant 0 : index
    %c0_18 = arith.constant 0 : index
    %c0_19 = arith.constant 0 : index
    %9 = vector.load %arg5[%c0_17, %c0_18, %c0_19] : memref<18x18x16xf32, #tpu.memory_space<vmem>>, vector<18x16x16xf32>
    %10 = vector.extract_strided_slice %9 {offsets = [0, 0, 0], sizes = [16, 16, 16], strides = [1, 1, 1]} : vector<18x16x16xf32> to vector<16x16x16xf32>
    %c0_20 = arith.constant 0 : index
    %c0_21 = arith.constant 0 : index
    %c0_22 = arith.constant 0 : index
    %11 = vector.load %arg6[%c0_20, %c0_21, %c0_22] : memref<16x16x144xf32, #tpu.memory_space<vmem>>, vector<16x16x16xf32>
    tpu.vector_store %arg6[%c0_20, %c0_21, %c0_22], %10 {strides = array<i32>} : memref<16x16x144xf32, #tpu.memory_space<vmem>>, vector<16x16x16xf32>,
    %12 = vector.extract_strided_slice %9 {offsets = [1, 0, 0], sizes = [16, 16, 16], strides = [1, 1, 1]} : vector<18x16x16xf32> to vector<16x16x16xf32>
    %c0_23 = arith.constant 0 : index
    %c0_24 = arith.constant 0 : index
    %c48 = arith.constant 48 : index
    %13 = vector.load %arg6[%c0_23, %c0_24, %c48] : memref<16x16x144xf32, #tpu.memory_space<vmem>>, vector<16x16x16xf32>
    tpu.vector_store %arg6[%c0_23, %c0_24, %c48], %12 {strides = array<i32>} : memref<16x16x144xf32, #tpu.memory_space<vmem>>, vector<16x16x16xf32>,
    %14 = vector.extract_strided_slice %9 {offsets = [2, 0, 0], sizes = [16, 16, 16], strides = [1, 1, 1]} : vector<18x16x16xf32> to vector<16x16x16xf32>
    %c0_25 = arith.constant 0 : index
    %c0_26 = arith.constant 0 : index
    %c96 = arith.constant 96 : index
    %15 = vector.load %arg6[%c0_25, %c0_26, %c96] : memref<16x16x144xf32, #tpu.memory_space<vmem>>, vector<16x16x16xf32>
    tpu.vector_store %arg6[%c0_25, %c0_26, %c96], %14 {strides = array<i32>} : memref<16x16x144xf32, #tpu.memory_space<vmem>>, vector<16x16x16xf32>,
    %c0_27 = arith.constant 0 : index
    %c1_28 = arith.constant 1 : index
    %c0_29 = arith.constant 0 : index
    %16 = vector.load %arg5[%c0_27, %c1_28, %c0_29] : memref<18x18x16xf32, #tpu.memory_space<vmem>>, vector<18x16x16xf32>
    %17 = vector.extract_strided_slice %16 {offsets = [0, 0, 0], sizes = [16, 16, 16], strides = [1, 1, 1]} : vector<18x16x16xf32> to vector<16x16x16xf32>
    %c0_30 = arith.constant 0 : index
    %c0_31 = arith.constant 0 : index
    %c16 = arith.constant 16 : index
    %18 = vector.load %arg6[%c0_30, %c0_31, %c16] : memref<16x16x144xf32, #tpu.memory_space<vmem>>, vector<16x16x16xf32>
    tpu.vector_store %arg6[%c0_30, %c0_31, %c16], %17 {strides = array<i32>} : memref<16x16x144xf32, #tpu.memory_space<vmem>>, vector<16x16x16xf32>,
    %19 = vector.extract_strided_slice %16 {offsets = [1, 0, 0], sizes = [16, 16, 16], strides = [1, 1, 1]} : vector<18x16x16xf32> to vector<16x16x16xf32>
    %c0_32 = arith.constant 0 : index
    %c0_33 = arith.constant 0 : index
    %c64 = arith.constant 64 : index
    %20 = vector.load %arg6[%c0_32, %c0_33, %c64] : memref<16x16x144xf32, #tpu.memory_space<vmem>>, vector<16x16x16xf32>
    tpu.vector_store %arg6[%c0_32, %c0_33, %c64], %19 {strides = array<i32>} : memref<16x16x144xf32, #tpu.memory_space<vmem>>, vector<16x16x16xf32>,
    %21 = vector.extract_strided_slice %16 {offsets = [2, 0, 0], sizes = [16, 16, 16], strides = [1, 1, 1]} : vector<18x16x16xf32> to vector<16x16x16xf32>
    %c0_34 = arith.constant 0 : index
    %c0_35 = arith.constant 0 : index
    %c112 = arith.constant 112 : index
    %22 = vector.load %arg6[%c0_34, %c0_35, %c112] : memref<16x16x144xf32, #tpu.memory_space<vmem>>, vector<16x16x16xf32>
    tpu.vector_store %arg6[%c0_34, %c0_35, %c112], %21 {strides = array<i32>} : memref<16x16x144xf32, #tpu.memory_space<vmem>>, vector<16x16x16xf32>,
    %c0_36 = arith.constant 0 : index
    %c2 = arith.constant 2 : index
    %c0_37 = arith.constant 0 : index
    %23 = vector.load %arg5[%c0_36, %c2, %c0_37] : memref<18x18x16xf32, #tpu.memory_space<vmem>>, vector<18x16x16xf32>
    %24 = vector.extract_strided_slice %23 {offsets = [0, 0, 0], sizes = [16, 16, 16], strides = [1, 1, 1]} : vector<18x16x16xf32> to vector<16x16x16xf32>
    %c0_38 = arith.constant 0 : index
    %c0_39 = arith.constant 0 : index
    %c32 = arith.constant 32 : index
    %25 = vector.load %arg6[%c0_38, %c0_39, %c32] : memref<16x16x144xf32, #tpu.memory_space<vmem>>, vector<16x16x16xf32>
    tpu.vector_store %arg6[%c0_38, %c0_39, %c32], %24 {strides = array<i32>} : memref<16x16x144xf32, #tpu.memory_space<vmem>>, vector<16x16x16xf32>,
    %26 = vector.extract_strided_slice %23 {offsets = [1, 0, 0], sizes = [16, 16, 16], strides = [1, 1, 1]} : vector<18x16x16xf32> to vector<16x16x16xf32>
    %c0_40 = arith.constant 0 : index
    %c0_41 = arith.constant 0 : index
    %c80 = arith.constant 80 : index
    %27 = vector.load %arg6[%c0_40, %c0_41, %c80] : memref<16x16x144xf32, #tpu.memory_space<vmem>>, vector<16x16x16xf32>
    tpu.vector_store %arg6[%c0_40, %c0_41, %c80], %26 {strides = array<i32>} : memref<16x16x144xf32, #tpu.memory_space<vmem>>, vector<16x16x16xf32>,
    %28 = vector.extract_strided_slice %23 {offsets = [2, 0, 0], sizes = [16, 16, 16], strides = [1, 1, 1]} : vector<18x16x16xf32> to vector<16x16x16xf32>
    %c0_42 = arith.constant 0 : index
    %c0_43 = arith.constant 0 : index
    %c128 = arith.constant 128 : index
    %29 = vector.load %arg6[%c0_42, %c0_43, %c128] : memref<16x16x144xf32, #tpu.memory_space<vmem>>, vector<16x16x16xf32>
    tpu.vector_store %arg6[%c0_42, %c0_43, %c128], %28 {strides = array<i32>} : memref<16x16x144xf32, #tpu.memory_space<vmem>>, vector<16x16x16xf32>,
    %c0_44 = arith.constant 0 : index
    %c0_45 = arith.constant 0 : index
    %c0_46 = arith.constant 0 : index
    %30 = vector.load %arg6[%c0_44, %c0_45, %c0_46] : memref<16x16x144xf32, #tpu.memory_space<vmem>>, vector<16x16x144xf32>
    %31 = vector.shape_cast %30 : vector<16x16x144xf32> to vector<256x144xf32>
    %c0_47 = arith.constant 0 : index
    %c0_48 = arith.constant 0 : index
    %32 = vector.load %arg2[%c0_47, %c0_48] : memref<144x16xf32, #tpu.memory_space<vmem>>, vector<144x16xf32>
    %cst_49 = arith.constant dense<0.000000e+00> : vector<256x16xf32>
    %33 = tpu.matmul %31, %32, %cst_49 {dimension_numbers = #tpu.dot_dimension_numbers<[1], [0], [0], [1], [0, 0, 1, 1], [], []>} : vector<256x144xf32>, vector<144x16xf32>, vector<256x16xf32> -> vector<256x16xf32>
    %cst_50 = arith.constant 0.000000e+00 : f32
    %34 = vector.broadcast %cst_50 : f32 to vector<256x16xf32>
    %35 = arith.cmpf oge, %33, %34 : vector<256x16xf32>
    %cst_51 = arith.constant 0.00999999977 : f32
    %36 = vector.broadcast %cst_51 : f32 to vector<256x16xf32>
    %37 = arith.mulf %36, %33 : vector<256x16xf32>
    %38 = arith.select %35, %33, %37 : vector<256x16xi1>, vector<256x16xf32>
    %39 = vector.shape_cast %38 : vector<256x16xf32> to vector<16x16x16xf32>
    %c1_52 = arith.constant 1 : index
    %c1_53 = arith.constant 1 : index
    %c0_54 = arith.constant 0 : index
    %40 = vector.load %arg5[%c1_52, %c1_53, %c0_54] : memref<18x18x16xf32, #tpu.memory_space<vmem>>, vector<16x16x16xf32>
    tpu.vector_store %arg5[%c1_52, %c1_53, %c0_54], %39 {strides = array<i32>} : memref<18x18x16xf32, #tpu.memory_space<vmem>>, vector<16x16x16xf32>,
    %c0_55 = arith.constant 0 : index
    %c0_56 = arith.constant 0 : index
    %c0_57 = arith.constant 0 : index
    %41 = vector.load %arg5[%c0_55, %c0_56, %c0_57] : memref<18x18x16xf32, #tpu.memory_space<vmem>>, vector<18x16x16xf32>
    %42 = vector.extract_strided_slice %41 {offsets = [0, 0, 0], sizes = [16, 16, 16], strides = [1, 1, 1]} : vector<18x16x16xf32> to vector<16x16x16xf32>
    %c0_58 = arith.constant 0 : index
    %c0_59 = arith.constant 0 : index
    %c0_60 = arith.constant 0 : index
    %43 = vector.load %arg6[%c0_58, %c0_59, %c0_60] : memref<16x16x144xf32, #tpu.memory_space<vmem>>, vector<16x16x16xf32>
    tpu.vector_store %arg6[%c0_58, %c0_59, %c0_60], %42 {strides = array<i32>} : memref<16x16x144xf32, #tpu.memory_space<vmem>>, vector<16x16x16xf32>,
    %44 = vector.extract_strided_slice %41 {offsets = [1, 0, 0], sizes = [16, 16, 16], strides = [1, 1, 1]} : vector<18x16x16xf32> to vector<16x16x16xf32>
    %c0_61 = arith.constant 0 : index
    %c0_62 = arith.constant 0 : index
    %c48_63 = arith.constant 48 : index
    %45 = vector.load %arg6[%c0_61, %c0_62, %c48_63] : memref<16x16x144xf32, #tpu.memory_space<vmem>>, vector<16x16x16xf32>
    tpu.vector_store %arg6[%c0_61, %c0_62, %c48_63], %44 {strides = array<i32>} : memref<16x16x144xf32, #tpu.memory_space<vmem>>, vector<16x16x16xf32>,
    %46 = vector.extract_strided_slice %41 {offsets = [2, 0, 0], sizes = [16, 16, 16], strides = [1, 1, 1]} : vector<18x16x16xf32> to vector<16x16x16xf32>
    %c0_64 = arith.constant 0 : index
    %c0_65 = arith.constant 0 : index
    %c96_66 = arith.constant 96 : index
    %47 = vector.load %arg6[%c0_64, %c0_65, %c96_66] : memref<16x16x144xf32, #tpu.memory_space<vmem>>, vector<16x16x16xf32>
    tpu.vector_store %arg6[%c0_64, %c0_65, %c96_66], %46 {strides = array<i32>} : memref<16x16x144xf32, #tpu.memory_space<vmem>>, vector<16x16x16xf32>,
    %c0_67 = arith.constant 0 : index
    %c1_68 = arith.constant 1 : index
    %c0_69 = arith.constant 0 : index
    %48 = vector.load %arg5[%c0_67, %c1_68, %c0_69] : memref<18x18x16xf32, #tpu.memory_space<vmem>>, vector<18x16x16xf32>
    %49 = vector.extract_strided_slice %48 {offsets = [0, 0, 0], sizes = [16, 16, 16], strides = [1, 1, 1]} : vector<18x16x16xf32> to vector<16x16x16xf32>
    %c0_70 = arith.constant 0 : index
    %c0_71 = arith.constant 0 : index
    %c16_72 = arith.constant 16 : index
    %50 = vector.load %arg6[%c0_70, %c0_71, %c16_72] : memref<16x16x144xf32, #tpu.memory_space<vmem>>, vector<16x16x16xf32>
    tpu.vector_store %arg6[%c0_70, %c0_71, %c16_72], %49 {strides = array<i32>} : memref<16x16x144xf32, #tpu.memory_space<vmem>>, vector<16x16x16xf32>,
    %51 = vector.extract_strided_slice %48 {offsets = [1, 0, 0], sizes = [16, 16, 16], strides = [1, 1, 1]} : vector<18x16x16xf32> to vector<16x16x16xf32>
    %c0_73 = arith.constant 0 : index
    %c0_74 = arith.constant 0 : index
    %c64_75 = arith.constant 64 : index
    %52 = vector.load %arg6[%c0_73, %c0_74, %c64_75] : memref<16x16x144xf32, #tpu.memory_space<vmem>>, vector<16x16x16xf32>
    tpu.vector_store %arg6[%c0_73, %c0_74, %c64_75], %51 {strides = array<i32>} : memref<16x16x144xf32, #tpu.memory_space<vmem>>, vector<16x16x16xf32>,
    %53 = vector.extract_strided_slice %48 {offsets = [2, 0, 0], sizes = [16, 16, 16], strides = [1, 1, 1]} : vector<18x16x16xf32> to vector<16x16x16xf32>
    %c0_76 = arith.constant 0 : index
    %c0_77 = arith.constant 0 : index
    %c112_78 = arith.constant 112 : index
    %54 = vector.load %arg6[%c0_76, %c0_77, %c112_78] : memref<16x16x144xf32, #tpu.memory_space<vmem>>, vector<16x16x16xf32>
    tpu.vector_store %arg6[%c0_76, %c0_77, %c112_78], %53 {strides = array<i32>} : memref<16x16x144xf32, #tpu.memory_space<vmem>>, vector<16x16x16xf32>,
    %c0_79 = arith.constant 0 : index
    %c2_80 = arith.constant 2 : index
    %c0_81 = arith.constant 0 : index
    %55 = vector.load %arg5[%c0_79, %c2_80, %c0_81] : memref<18x18x16xf32, #tpu.memory_space<vmem>>, vector<18x16x16xf32>
    %56 = vector.extract_strided_slice %55 {offsets = [0, 0, 0], sizes = [16, 16, 16], strides = [1, 1, 1]} : vector<18x16x16xf32> to vector<16x16x16xf32>
    %c0_82 = arith.constant 0 : index
    %c0_83 = arith.constant 0 : index
    %c32_84 = arith.constant 32 : index
    %57 = vector.load %arg6[%c0_82, %c0_83, %c32_84] : memref<16x16x144xf32, #tpu.memory_space<vmem>>, vector<16x16x16xf32>
    tpu.vector_store %arg6[%c0_82, %c0_83, %c32_84], %56 {strides = array<i32>} : memref<16x16x144xf32, #tpu.memory_space<vmem>>, vector<16x16x16xf32>,
    %58 = vector.extract_strided_slice %55 {offsets = [1, 0, 0], sizes = [16, 16, 16], strides = [1, 1, 1]} : vector<18x16x16xf32> to vector<16x16x16xf32>
    %c0_85 = arith.constant 0 : index
    %c0_86 = arith.constant 0 : index
    %c80_87 = arith.constant 80 : index
    %59 = vector.load %arg6[%c0_85, %c0_86, %c80_87] : memref<16x16x144xf32, #tpu.memory_space<vmem>>, vector<16x16x16xf32>
    tpu.vector_store %arg6[%c0_85, %c0_86, %c80_87], %58 {strides = array<i32>} : memref<16x16x144xf32, #tpu.memory_space<vmem>>, vector<16x16x16xf32>,
    %60 = vector.extract_strided_slice %55 {offsets = [2, 0, 0], sizes = [16, 16, 16], strides = [1, 1, 1]} : vector<18x16x16xf32> to vector<16x16x16xf32>
    %c0_88 = arith.constant 0 : index
    %c0_89 = arith.constant 0 : index
    %c128_90 = arith.constant 128 : index
    %61 = vector.load %arg6[%c0_88, %c0_89, %c128_90] : memref<16x16x144xf32, #tpu.memory_space<vmem>>, vector<16x16x16xf32>
    tpu.vector_store %arg6[%c0_88, %c0_89, %c128_90], %60 {strides = array<i32>} : memref<16x16x144xf32, #tpu.memory_space<vmem>>, vector<16x16x16xf32>,
    %c0_91 = arith.constant 0 : index
    %c0_92 = arith.constant 0 : index
    %c0_93 = arith.constant 0 : index
    %62 = vector.load %arg6[%c0_91, %c0_92, %c0_93] : memref<16x16x144xf32, #tpu.memory_space<vmem>>, vector<16x16x144xf32>
    %63 = vector.shape_cast %62 : vector<16x16x144xf32> to vector<256x144xf32>
    %c0_94 = arith.constant 0 : index
    %c0_95 = arith.constant 0 : index
    %64 = vector.load %arg3[%c0_94, %c0_95] : memref<144x16xf32, #tpu.memory_space<vmem>>, vector<144x16xf32>
    %cst_96 = arith.constant dense<0.000000e+00> : vector<256x16xf32>
    %65 = tpu.matmul %63, %64, %cst_96 {dimension_numbers = #tpu.dot_dimension_numbers<[1], [0], [0], [1], [0, 0, 1, 1], [], []>} : vector<256x144xf32>, vector<144x16xf32>, vector<256x16xf32> -> vector<256x16xf32>
    %cst_97 = arith.constant 0.000000e+00 : f32
    %66 = vector.broadcast %cst_97 : f32 to vector<256x16xf32>
    %67 = arith.subf %66, %65 : vector<256x16xf32>
    %68 = math.exp %67 : vector<256x16xf32>
    %cst_98 = arith.constant 1.000000e+00 : f32
    %69 = vector.broadcast %cst_98 : f32 to vector<256x16xf32>
    %70 = arith.addf %69, %68 : vector<256x16xf32>
    %cst_99 = arith.constant 1.000000e+00 : f32
    %71 = vector.broadcast %cst_99 : f32 to vector<256x16xf32>
    %72 = arith.divf %71, %70 : vector<256x16xf32>
    %73 = vector.shape_cast %72 : vector<256x16xf32> to vector<16x16x16xf32>
    %c0_100 = arith.constant 0 : index
    %c0_101 = arith.constant 0 : index
    %c0_102 = arith.constant 0 : index
    %c0_103 = arith.constant 0 : index
    %74 = vector.load %arg4[%c0_100, %c0_101, %c0_102, %c0_103] : memref<1x16x16x16xf32, #tpu.memory_space<vmem>>, vector<1x16x16x16xf32>
    %75 = vector.shape_cast %74 : vector<1x16x16x16xf32> to vector<16x16x16xf32>
    %76 = vector.shape_cast %73 : vector<16x16x16xf32> to vector<1x16x16x16xf32>
    tpu.vector_store %arg4[%c0_100, %c0_101, %c0_102, %c0_103], %76 {strides = array<i32>} : memref<1x16x16x16xf32, #tpu.memory_space<vmem>>, vector<1x16x16x16xf32>,
    return
  }
  func.func @transform_0(%arg0: i32) -> (i32, i32, i32, i32) {
    %c0_i32 = arith.constant 0 : i32
    %c0_i32_0 = arith.constant 0 : i32
    %c0_i32_1 = arith.constant 0 : i32
    %c0_i32_2 = arith.constant 0 : i32
    return %arg0, %c0_i32, %c0_i32_0, %c0_i32_1 : i32, i32, i32, i32
  }
  func.func @transform_1(%arg0: i32) -> (i32, i32) {
    %c0_i32 = arith.constant 0 : i32
    %c0_i32_0 = arith.constant 0 : i32
    %c0_i32_1 = arith.constant 0 : i32
    return %c0_i32, %c0_i32_0 : i32, i32
  }
  func.func @transform_2(%arg0: i32) -> (i32, i32) {
    %c0_i32 = arith.constant 0 : i32
    %c0_i32_0 = arith.constant 0 : i32
    %c0_i32_1 = arith.constant 0 : i32
    return %c0_i32, %c0_i32_0 : i32, i32
  }
  func.func @transform_3(%arg0: i32) -> (i32, i32, i32, i32) {
    %c0_i32 = arith.constant 0 : i32
    %c0_i32_0 = arith.constant 0 : i32
    %c0_i32_1 = arith.constant 0 : i32
    %c0_i32_2 = arith.constant 0 : i32
    return %arg0, %c0_i32, %c0_i32_0, %c0_i32_1 : i32, i32, i32, i32
  }
}

</mosaic_0001>

<bundles_post_ra>
// kernel: tpu_custom_call.1
= control target key start
LH: loop header
LB: loop body
LE: loop exit
PB: predicated region body
PF: predicated region fallthrough
CT: control target
= control target key end

     0   :  { %8 = vsyncpa [#allocation5], 0  ;;  %s6802_s0 = inlined_call_operand.hbm [shape: f32[2,16,16,16], index: 0, kind: input, shape index: {}]   ;;  %s6803_s1 = inlined_call_operand.vmem [shape: f32[144,16], index: 1, kind: input, shape index: {}]   ;;  %s6804_s2 = inlined_call_operand.vmem [shape: f32[144,16], index: 2, kind: input, shape index: {}]   ;;  %s6805_s3 = inlined_call_operand.hbm [shape: f32[2,16,16,16], index: 3, kind: output, shape index: {}]  }
   0x1   :  { %10 = vsyncpa [#allocation5 + $0x1], 0 }
   0x2   :  { %11 = vsyncpa [#allocation6], 0 }
   0x3   :  { %13 = vsyncpa [#allocation6 + $0x1], 0  ;;  %s4290_s12 = smov 0   ;;  %s4292_s13 = smov 0  }
   0x4   :  { %s4294_s14 = smov 0   ;;  %s4296_s15 = smov 0  }
   0x5 LB: > { %s4311_s16 = sadd.s32 4294967295, %s4254_s15   ;;  %s3896_s17 = sadd.s32 4294967294, %s4254_s15   ;;  %s4254_s15 = sphi %s4296_s15, %s6820_s15   ;;  %s4250_s14 = sphi %s4294_s14, %s6819_s14   ;;  %s4246_s13 = sphi %s4292_s13, %s6818_s13   ;;  %s4242_s12 = sphi %s4290_s12, %s6817_s12  }
   0x6   : > { %s4315_s18 = sadd.s32 1, %s4254_s15   ;;  %s26_s19 = sadd.s32 1, %s4250_s14 }
   0x7   : > { %s23_s20 = ssub.s32 %s4254_s15, %s4315_s18  ;;  %p33_p0 = scmp.ne.s32.totalorder %s4250_s14, %s4246_s13 }
   0x8   : > { %p24_p1 = scmp.eq.s32.totalorder %s23_s20, 0  ;;  %p34_p2 = scmp.eq.s32.totalorder %s4254_s15, 0 }
   0x9   : > { %p39_p3 = scmp.ne.s32.totalorder %s4246_s13, %s4242_s12  ;;  %p40_p4 = scmp.eq.s32.totalorder %s4311_s16, 0 }
   0xa   : > { %s4327_s21 = scalar_select %p24_p1, %s4250_s14, %s26_s19  }
   0xb   : > { %p4329_p5 = por %p34_p2, %p33_p0  ;;  %p4333_p6 = por %p40_p4, %p39_p3 }
   0xc   : > { %p105_p7 = scmp.eq.s32.totalorder %s4311_s16, 1  ;;  %p111_p8 = scmp.eq.s32.totalorder %s3896_s17, 1 }
   0xd   : > { %s6809_s23 = scalar_select %p4333_p6, 1, 0 }
   0xe   : > { %p3988_p10 = scmp.lt.s32.totalorder %s4254_s15, 2  ;;  %p4340_p11 = por %p105_p7, %p33_p0 }
   0xf   : > { %p4344_p12 = por %p111_p8, %p39_p3  ;;  %s137_s26 = sand.u32 1, %s4250_s14  }
  0x10   : > { %s6810_s24 = scalar_select %p4340_p11, 1, 0 }
  0x11   : > { %s6811_s25 = scalar_select %p4344_p12, 1, 0 }
  0x12   : > { %s3974_s27 = sshll.u32 %s4254_s15, 12  ;;  %s3899_s28 = sshll.u32 %s137_s26, 8 }
  0x13   : > { %s4353_s4 = scalar_lea.hbm %s6802_s0, %s3974_s27  ;;  %s141_s5 = scalar_lea.vmem [#allocation4], %s3899_s28 }
  0x14   : > { %s148_s6 = sshll.u32 %s141_s5, 4  ;;  %p4357_p13 = pnand %p3988_p10, %p4329_p5  ;;  %s4361_s6 = int_to_ptr.vmem [resolvable:$true] %s148_s6 }
  0x15   : > { %s4363_s8 = scalar_lea.sflag [#allocation5], %s137_s26  ;;  %s4162_s9 = scalar_lea.hbm %s4353_s4, 4096 }
  0x16   : > { %p4163_p0 = scmp.ne.s32.totalorder %s4353_s4, %s4162_s9  ;;  %p4164_p1 = pneg %p4357_p13 }
  0x17   : > { %s4167_s17 = scalar_lea.hbm %s6802_s0, 8192  ;;  %p4168_p4 = scmp.lt.s32.totalorder %s4353_s4, %s6802_s0 }
  0x18   : > { %p4165_p2 = pnand %p4164_p1, %p4163_p0  ;;  %p4169_p5 = scmp.lt.s32.totalorder %s4167_s17, %s4162_s9 }
  0x1a   : > { %p4166_p3 = pneg %p4165_p2  ;;  %p4170_p7 = por %p4169_p5, %p4168_p4 }
  0x1c   : > { %p4171_p8 = pnand %p4170_p7, %p4166_p3 }
  0x1e   : > { %4174 = shalt.err (!%p4171_p8)
}
  0x1f   : > { %s4175_s22 = scalar_lea.vmem %s4361_s6, 4096  ;;  %s4256_s26 = smov [#allocation4]  }
  0x20   : > { %p4176_p10 = scmp.ne.s32.totalorder %s4361_s6, %s4175_s22  ;;  %s4180_s27 = sshll.u32 %s4256_s26, 4  ;;  %s4181_s27 = int_to_ptr.vmem [resolvable:$false] %s4180_s27 }
  0x21   : > { %s4182_s28 = scalar_lea.vmem %s4181_s27, 8192  ;;  %p4183_p2 = scmp.lt.s32.totalorder %s4361_s6, %s4181_s27 }
  0x22   : > { %p4178_p9 = pnand %p4176_p10, %p4164_p1  ;;  %p4184_p12 = scmp.lt.s32.totalorder %s4182_s28, %s4175_s22 }
  0x24   : > { %p4179_p0 = pneg %p4178_p9  ;;  %p4185_p11 = por %p4184_p12, %p4183_p2 }
  0x26   : > { %p4186_p6 = pnand %p4185_p11, %p4179_p0 }
  0x28   : > { %4189 = shalt.err (!%p4186_p6)
}
  0x29   : > { %s4257_s29 = smov 128   ;;  %s4258_s30 = smov 8  }
  0x2a   : > { %3983 = dma.hbm_to_vmem [thread:$0]  (!%p4357_p13), %s4353_s4, 4096, %s4361_s6, %s4363_s8, %s4257_s29, %s4257_s29, %s4258_s30  }
  0x2b   : > { %p3902_p9 = scmp.ge.s32.totalorder %s4254_s15, 1  ;;  %p156_p1 = scmp.lt.s32.totalorder %s4254_s15, 3 }
  0x2d   : > { %p157_p3 = pnand %p3902_p9, %p156_p1 }
  0x2e   : > { %s4387_s5 = sand.u32 (!%p157_p3), 1, %s4246_s13   ;;  %p6813_p6 = scmp.ne.s32.totalorder (!%p157_p3), %s6809_s23, 0 }
  0x2f   : > { %160 = sbr.rel (%p157_p3) target bundleno = 1487 (0x5cf), region = 32  ;;  %s3903_s9 = sshll.u32 (!%p157_p3), %s4387_s5, 8 }
  0x30   : > { %s163_s10 = scalar_lea.sflag (!%p157_p3), [#allocation5], %s4387_s5  ;;  %s4393_s11 = scalar_lea.vmem (!%p157_p3), [#allocation4], %s3903_s9 }
  0x34   : > { %4233 = dma.done.wait (%p6813_p6), %s163_s10, 4096  }
  0x35   : > { %4235 = vsyncadd (%p6813_p6), %s163_s10, 4294963200  ;;  %vm189_vm0 = vcmask 130048   ;;  %vm198_vm1 = vcmask 122880   ;;  %v4259_v0 = vmov 0.0   ;;  %v235_v1 = vld [vmem:[%s4393_s11] sm:$0xff]  ;;  %v237_v2 = vld [vmem:[%s4393_s11 + $0x10] sm:$0xff] }
  0x36   : > { %200 = vst.msk [vmem:[#allocation2 + $0x18] sm:$0x1] %vm198_vm1, %v4259_v0  ;;  %201 = vst.msk [vmem:[#allocation2 + $0x30] sm:$0x1] %vm198_vm1, %v4259_v0  ;;  %1657 = vmatprep.subr.mxu0 %v4259_v0  ;;  %3360 = vmatprep.subr.mxu1 %v4259_v0  ;;  %v236_v3 = vld [vmem:[%s4393_s11 + $0x8] sm:$0xff]  ;;  %v238_v4 = vld [vmem:[%s4393_s11 + $0x18] sm:$0xff] }
  0x37   : > { %190 = vst.msk [vmem:[#allocation2] sm:$0xff] %vm189_vm0, %v4259_v0  ;;  %191 = vst.msk [vmem:[#allocation2 + $0x8] sm:$0xff] %vm189_vm0, %v4259_v0  ;;  %v239_v5 = vld [vmem:[%s4393_s11 + $0x20] sm:$0xff]  ;;  %v240_v6 = vld [vmem:[%s4393_s11 + $0x28] sm:$0xff]  ;;  %vm192_vm2 = vcmask 123904   ;;  %s4260_s23 = smov 48  }
  0x38   : > { %195 = vst.msk [vmem:[#allocation2 + $0x198] sm:$0xff] %vm189_vm0, %v4259_v0  ;;  %196 = vst.msk [vmem:[#allocation2 + $0x1a0] sm:$0xff] %vm189_vm0, %v4259_v0  ;;  %v241_v7 = vld [vmem:[%s4393_s11 + $0x30] sm:$0xff]  ;;  %v242_v8 = vld [vmem:[%s4393_s11 + $0x38] sm:$0xff]  ;;  %s4261_s4 = smov 96   ;;  %vm496_vm3 = vcmask 523648  }
  0x39   : > { %202 = vst.msk [vmem:[#allocation2 + $0x48] sm:$0x1] %vm198_vm1, %v4259_v0  ;;  %203 = vst.msk [vmem:[#allocation2 + $0x60] sm:$0x1] %vm198_vm1, %v4259_v0  ;;  %v243_v9 = vld [vmem:[%s4393_s11 + $0x40] sm:$0xff]  ;;  %v244_v10 = vld [vmem:[%s4393_s11 + $0x48] sm:$0xff] }
  0x3a   : > { %204 = vst.msk [vmem:[#allocation2 + $0x78] sm:$0x1] %vm198_vm1, %v4259_v0  ;;  %205 = vst.msk [vmem:[#allocation2 + $0x90] sm:$0x1] %vm198_vm1, %v4259_v0  ;;  %v245_v11 = vld [vmem:[%s4393_s11 + $0x50] sm:$0xff]  ;;  %v246_v12 = vld [vmem:[%s4393_s11 + $0x58] sm:$0xff] }
  0x3b   : > { %206 = vst.msk [vmem:[#allocation2 + $0xa8] sm:$0x1] %vm198_vm1, %v4259_v0  ;;  %207 = vst.msk [vmem:[#allocation2 + $0xc0] sm:$0x1] %vm198_vm1, %v4259_v0  ;;  %v247_v13 = vld [vmem:[%s4393_s11 + $0x60] sm:$0xff]  ;;  %v248_v14 = vld [vmem:[%s4393_s11 + $0x68] sm:$0xff] }
  0x3c   : > { %208 = vst.msk [vmem:[#allocation2 + $0xd8] sm:$0x1] %vm198_vm1, %v4259_v0  ;;  %209 = vst.msk [vmem:[#allocation2 + $0xf0] sm:$0x1] %vm198_vm1, %v4259_v0  ;;  %v249_v15 = vld [vmem:[%s4393_s11 + $0x70] sm:$0xff]  ;;  %v250_v16 = vld [vmem:[%s4393_s11 + $0x78] sm:$0xff] }
  0x3d   : > { %210 = vst.msk [vmem:[#allocation2 + $0x108] sm:$0x1] %vm198_vm1, %v4259_v0  ;;  %211 = vst.msk [vmem:[#allocation2 + $0x120] sm:$0x1] %vm198_vm1, %v4259_v0  ;;  %v251_v17 = vld [vmem:[%s4393_s11 + $0x80] sm:$0xff]  ;;  %v252_v18 = vld [vmem:[%s4393_s11 + $0x88] sm:$0xff] }
  0x3e   : > { %212 = vst.msk [vmem:[#allocation2 + $0x138] sm:$0x1] %vm198_vm1, %v4259_v0  ;;  %213 = vst.msk [vmem:[#allocation2 + $0x150] sm:$0x1] %vm198_vm1, %v4259_v0  ;;  %v253_v19 = vld [vmem:[%s4393_s11 + $0x90] sm:$0xff]  ;;  %v254_v20 = vld [vmem:[%s4393_s11 + $0x98] sm:$0xff] }
  0x3f   : > { %214 = vst.msk [vmem:[#allocation2 + $0x168] sm:$0x1] %vm198_vm1, %v4259_v0  ;;  %215 = vst.msk [vmem:[#allocation2 + $0x180] sm:$0x1] %vm198_vm1, %v4259_v0  ;;  %v255_v21 = vld [vmem:[%s4393_s11 + $0xa0] sm:$0xff]  ;;  %v256_v22 = vld [vmem:[%s4393_s11 + $0xa8] sm:$0xff] }
  0x40   : > { %218 = vst.msk [vmem:[#allocation2 + $0x29] sm:$0x1] %vm198_vm1, %v4259_v0  ;;  %219 = vst.msk [vmem:[#allocation2 + $0x41] sm:$0x1] %vm198_vm1, %v4259_v0  ;;  %v257_v23 = vld [vmem:[%s4393_s11 + $0xb0] sm:$0xff]  ;;  %v258_v24 = vld [vmem:[%s4393_s11 + $0xb8] sm:$0xff] }
  0x41   : > { %220 = vst.msk [vmem:[#allocation2 + $0x59] sm:$0x1] %vm198_vm1, %v4259_v0  ;;  %221 = vst.msk [vmem:[#allocation2 + $0x71] sm:$0x1] %vm198_vm1, %v4259_v0  ;;  %v259_v49 = vld [vmem:[%s4393_s11 + $0xc0] sm:$0xff]  ;;  %v260_v50 = vld [vmem:[%s4393_s11 + $0xc8] sm:$0xff] }
  0x42   : > { %222 = vst.msk [vmem:[#allocation2 + $0x89] sm:$0x1] %vm198_vm1, %v4259_v0  ;;  %223 = vst.msk [vmem:[#allocation2 + $0xa1] sm:$0x1] %vm198_vm1, %v4259_v0  ;;  %v261_v51 = vld [vmem:[%s4393_s11 + $0xd0] sm:$0xff]  ;;  %v262_v52 = vld [vmem:[%s4393_s11 + $0xd8] sm:$0xff] }
  0x43   : > { %224 = vst.msk [vmem:[#allocation2 + $0xb9] sm:$0x1] %vm198_vm1, %v4259_v0  ;;  %225 = vst.msk [vmem:[#allocation2 + $0xd1] sm:$0x1] %vm198_vm1, %v4259_v0  ;;  %v263_v53 = vld [vmem:[%s4393_s11 + $0xe0] sm:$0xff]  ;;  %v264_v55 = vld [vmem:[%s4393_s11 + $0xe8] sm:$0xff] }
  0x44   : > { %226 = vst.msk [vmem:[#allocation2 + $0xe9] sm:$0x1] %vm198_vm1, %v4259_v0  ;;  %227 = vst.msk [vmem:[#allocation2 + $0x101] sm:$0x1] %vm198_vm1, %v4259_v0  ;;  %v265_v56 = vld [vmem:[%s4393_s11 + $0xf0] sm:$0xff]  ;;  %v266_v57 = vld [vmem:[%s4393_s11 + $0xf8] sm:$0xff] }
  0x45   : > { %228 = vst.msk [vmem:[#allocation2 + $0x119] sm:$0x1] %vm198_vm1, %v4259_v0  ;;  %229 = vst.msk [vmem:[#allocation2 + $0x131] sm:$0x1] %vm198_vm1, %v4259_v0  ;;  %v301_v58 = vld [vmem:[#allocation2 + $0x8] sm:$0xff]  ;;  %s4262_s6 = smov 16  }
  0x46   : > { %230 = vst.msk [vmem:[#allocation2 + $0x149] sm:$0x1] %vm198_vm1, %v4259_v0  ;;  %231 = vst.msk [vmem:[#allocation2 + $0x161] sm:$0x1] %vm198_vm1, %v4259_v0  ;;  %vm627_vm4 = vcmask 917248   ;;  %s4263_s20 = smov 64  }
  0x47   : > { %232 = vst.msk [vmem:[#allocation2 + $0x179] sm:$0x1] %vm198_vm1, %v4259_v0  ;;  %233 = vst.msk [vmem:[#allocation2 + $0x191] sm:$0x1] %vm198_vm1, %v4259_v0  ;;  %s4264_s22 = smov 112   ;;  %s4265_s28 = smov 32  }
  0x48   : > { %199 = vst.msk [vmem:[#allocation2] sm:$0x1] %vm198_vm1, %v4259_v0  ;;  %216 = vst.msk [vmem:[#allocation2 + $0x198] sm:$0x1] %vm198_vm1, %v4259_v0  ;;  %s4266_s29 = smov 80   ;;  %vm824_vm5 = vcmask 261248  }
  0x49   : > { %268 = vst.msk [vmem:[#allocation2 + $0x19] sm:$0xff] %vm189_vm0, %v235_v1  ;;  %270 = vst.msk [vmem:[#allocation2 + $0x31] sm:$0xff] %vm189_vm0, %v237_v2  ;;  %vm955_vm6 = vcmask 654848   ;;  %vm1086_vm7 = vcmask 1048448   ;;  %vm1283_vm8 = vcmask 392448   ;;  %vm1414_vm9 = vcmask 786048  }
  0x4a   : > { %269 = vst.msk [vmem:[#allocation2 + $0x21] sm:$0xff] %vm189_vm0, %v236_v3  ;;  %271 = vst.msk [vmem:[#allocation2 + $0x39] sm:$0xff] %vm189_vm0, %v238_v4  ;;  %s6533_s8 = scalar_lea.vmem [#allocation7], %s3903_s9  ;;  %s3975_s9 = sshll.u32 %s4311_s16, 12 }
  0x4b   : > { %272 = vst.msk [vmem:[#allocation2 + $0x49] sm:$0xff] %vm189_vm0, %v239_v5  ;;  %273 = vst.msk [vmem:[#allocation2 + $0x51] sm:$0xff] %vm189_vm0, %v240_v6  ;;  %p6814_p12 = scmp.ne.s32.totalorder %s6810_s24, 0  ;;  %s4267_s16 = smov [#allocation7]  }
  0x4c   : > { %193 = vst.msk [vmem:[#allocation2 + $0x10] sm:$0x3] %vm192_vm2, %v4259_v0  ;;  %197 = vst.msk [vmem:[#allocation2 + $0x1a8] sm:$0x3] %vm192_vm2, %v4259_v0 }
  0x4d   : > { %274 = vst.msk [vmem:[#allocation2 + $0x61] sm:$0xff] %vm189_vm0, %v241_v7  ;;  %275 = vst.msk [vmem:[#allocation2 + $0x69] sm:$0xff] %vm189_vm0, %v242_v8 }
  0x4e   : > { %276 = vst.msk [vmem:[#allocation2 + $0x79] sm:$0xff] %vm189_vm0, %v243_v9  ;;  %277 = vst.msk [vmem:[#allocation2 + $0x81] sm:$0xff] %vm189_vm0, %v244_v10 }
  0x4f   : > { %217 = vst.msk [vmem:[#allocation2 + $0x11] sm:$0x1] %vm198_vm1, %v4259_v0  ;;  %234 = vst.msk [vmem:[#allocation2 + $0x1a9] sm:$0x1] %vm198_vm1, %v4259_v0  ;;  %v300_v54 = vld [vmem:[#allocation2] sm:$0xff] }
  0x50   : > { %278 = vst.msk [vmem:[#allocation2 + $0x91] sm:$0xff] %vm189_vm0, %v245_v11  ;;  %279 = vst.msk [vmem:[#allocation2 + $0x99] sm:$0xff] %vm189_vm0, %v246_v12  ;;  %v302_v25 = vld [vmem:[#allocation2 + $0x18] sm:$0xff]  ;;  %v4528_v26 = vld [vmem:[#allocation2 + $0x30] sm:$0xff] }
  0x51   : > { %280 = vst.msk [vmem:[#allocation2 + $0xa9] sm:$0xff] %vm189_vm0, %v247_v13  ;;  %281 = vst.msk [vmem:[#allocation2 + $0xb1] sm:$0xff] %vm189_vm0, %v248_v14  ;;  %v303_v27 = vld [vmem:[#allocation2 + $0x20] sm:$0xff]  ;;  %400 = vrot.lane.b32.xlu0 %v302_v25, %s4260_s23  ;;  %404 = vrot.lane.b32.xlu1 %v4528_v26, %s4260_s23  ;;  %v4540_v28 = vld [vmem:[#allocation2 + $0x38] sm:$0xff] }
  0x52   : > { %282 = vst.msk [vmem:[#allocation2 + $0xc1] sm:$0xff] %vm189_vm0, %v249_v15  ;;  %283 = vst.msk [vmem:[#allocation2 + $0xc9] sm:$0xff] %vm189_vm0, %v250_v16  ;;  %v4542_v29 = vld [vmem:[#allocation2 + $0x48] sm:$0xff]  ;;  %v4544_v30 = vld [vmem:[#allocation2 + $0x50] sm:$0xff] }
  0x53   : > { %284 = vst.msk [vmem:[#allocation2 + $0xd9] sm:$0xff] %vm189_vm0, %v251_v17  ;;  %285 = vst.msk [vmem:[#allocation2 + $0xe1] sm:$0xff] %vm189_vm0, %v252_v18  ;;  %v4747_v4 = vld [vmem:[#allocation2 + $0x32] sm:$0xff]  ;;  %v4759_v5 = vld [vmem:[#allocation2 + $0x3a] sm:$0xff] }
  0x54   : > { %286 = vst.msk [vmem:[#allocation2 + $0xf1] sm:$0xff] %vm189_vm0, %v253_v19  ;;  %287 = vst.msk [vmem:[#allocation2 + $0xf9] sm:$0xff] %vm189_vm0, %v254_v20  ;;  %v4552_v31 = vld [vmem:[#allocation2 + $0x60] sm:$0xff]  ;;  %v4554_v32 = vld [vmem:[#allocation2 + $0x68] sm:$0xff] }
  0x55   : > { %288 = vst.msk [vmem:[#allocation2 + $0x109] sm:$0xff] %vm189_vm0, %v255_v21  ;;  %289 = vst.msk [vmem:[#allocation2 + $0x111] sm:$0xff] %vm189_vm0, %v256_v22  ;;  %v4556_v33 = vld [vmem:[#allocation2 + $0x78] sm:$0xff]  ;;  %v4564_v34 = vld [vmem:[#allocation2 + $0x80] sm:$0xff]  ;;  %402 = vrot.lane.b32.xlu0 %v303_v27, %s4260_s23  ;;  %406 = vrot.lane.b32.xlu1 %v4540_v28, %s4260_s23 }
  0x56   : > { %290 = vst.msk [vmem:[#allocation2 + $0x121] sm:$0xff] %vm189_vm0, %v257_v23  ;;  %291 = vst.msk [vmem:[#allocation2 + $0x129] sm:$0xff] %vm189_vm0, %v258_v24  ;;  %v4771_v6 = vld [vmem:[#allocation2 + $0x4a] sm:$0xff]  ;;  %v4783_v7 = vld [vmem:[#allocation2 + $0x52] sm:$0xff] }
  0x57   : > { %338 = vst.msk [vmem:[#allocation3 + $0x20] sm:$0xff] %vm189_vm0, %v302_v25  ;;  %340 = vst.msk [vmem:[#allocation3 + $0x40] sm:$0xff] %vm189_vm0, %v4528_v26  ;;  %v4566_v35 = vld [vmem:[#allocation2 + $0x90] sm:$0xff]  ;;  %v4568_v36 = vld [vmem:[#allocation2 + $0x98] sm:$0xff] }
  0x58   : > { %339 = vst.msk [vmem:[#allocation3 + $0x30] sm:$0xff] %vm189_vm0, %v303_v27  ;;  %341 = vst.msk [vmem:[#allocation3 + $0x50] sm:$0xff] %vm189_vm0, %v4540_v28  ;;  %v4576_v37 = vld [vmem:[#allocation2 + $0xa8] sm:$0xff]  ;;  %v4578_v38 = vld [vmem:[#allocation2 + $0xb0] sm:$0xff] }
  0x59   : > { %342 = vst.msk [vmem:[#allocation3 + $0x60] sm:$0xff] %vm189_vm0, %v4542_v29  ;;  %343 = vst.msk [vmem:[#allocation3 + $0x70] sm:$0xff] %vm189_vm0, %v4544_v30  ;;  %v4580_v39 = vld [vmem:[#allocation2 + $0xc0] sm:$0xff]  ;;  %v4591_v40 = vld [vmem:[#allocation2 + $0xc8] sm:$0xff]  ;;  %408 = vrot.lane.b32.xlu0 %v4542_v29, %s4260_s23  ;;  %410 = vrot.lane.b32.xlu1 %v4544_v30, %s4260_s23 }
  0x5a   : > { %344 = vst.msk [vmem:[#allocation3 + $0x80] sm:$0xff] %vm189_vm0, %v4552_v31  ;;  %345 = vst.msk [vmem:[#allocation3 + $0x90] sm:$0xff] %vm189_vm0, %v4554_v32  ;;  %v4593_v41 = vld [vmem:[#allocation2 + $0xd8] sm:$0xff]  ;;  %v4595_v42 = vld [vmem:[#allocation2 + $0xe0] sm:$0xff] }
  0x5b   : > { %346 = vst.msk [vmem:[#allocation3 + $0xa0] sm:$0xff] %vm189_vm0, %v4556_v33  ;;  %347 = vst.msk [vmem:[#allocation3 + $0xb0] sm:$0xff] %vm189_vm0, %v4564_v34  ;;  %v4603_v43 = vld [vmem:[#allocation2 + $0xf0] sm:$0xff]  ;;  %v4605_v44 = vld [vmem:[#allocation2 + $0xf8] sm:$0xff] }
  0x5c   : > { %348 = vst.msk [vmem:[#allocation3 + $0xc0] sm:$0xff] %vm189_vm0, %v4566_v35  ;;  %349 = vst.msk [vmem:[#allocation3 + $0xd0] sm:$0xff] %vm189_vm0, %v4568_v36  ;;  %v4607_v45 = vld [vmem:[#allocation2 + $0x108] sm:$0xff]  ;;  %v4615_v46 = vld [vmem:[#allocation2 + $0x110] sm:$0xff] }
  0x5d   : > { %350 = vst.msk [vmem:[#allocation3 + $0xe0] sm:$0xff] %vm189_vm0, %v4576_v37  ;;  %351 = vst.msk [vmem:[#allocation3 + $0xf0] sm:$0xff] %vm189_vm0, %v4578_v38  ;;  %v4617_v47 = vld [vmem:[#allocation2 + $0x120] sm:$0xff]  ;;  %v4619_v48 = vld [vmem:[#allocation2 + $0x128] sm:$0xff]  ;;  %412 = vrot.lane.b32.xlu0 %v4552_v31, %s4260_s23  ;;  %414 = vrot.lane.b32.xlu1 %v4554_v32, %s4260_s23 }
  0x5e   : > { %352 = vst.msk [vmem:[#allocation3 + $0x100] sm:$0xff] %vm189_vm0, %v4580_v39  ;;  %353 = vst.msk [vmem:[#allocation3 + $0x110] sm:$0xff] %vm189_vm0, %v4591_v40  ;;  %v4797_v10 = vld [vmem:[#allocation2 + $0x62] sm:$0xff]  ;;  %v334_v13 = vld [vmem:[#allocation2 + $0x198] sm:$0xff] }
  0x5f   : > { %354 = vst.msk [vmem:[#allocation3 + $0x120] sm:$0xff] %vm189_vm0, %v4593_v41  ;;  %355 = vst.msk [vmem:[#allocation3 + $0x130] sm:$0xff] %vm189_vm0, %v4595_v42  ;;  %v335_v14 = vld [vmem:[#allocation2 + $0x1a0] sm:$0xff]  ;;  %v4809_v17 = vld [vmem:[#allocation2 + $0x6a] sm:$0xff] }
  0x60   : > { %356 = vst.msk [vmem:[#allocation3 + $0x140] sm:$0xff] %vm189_vm0, %v4603_v43  ;;  %357 = vst.msk [vmem:[#allocation3 + $0x150] sm:$0xff] %vm189_vm0, %v4605_v44  ;;  %v660_v18 = vld [vmem:[#allocation2 + $0x1] sm:$0xff]  ;;  %v661_v19 = vld [vmem:[#allocation2 + $0x9] sm:$0xff] }
  0x61   : > { %358 = vst.msk [vmem:[#allocation3 + $0x160] sm:$0xff] %vm189_vm0, %v4607_v45  ;;  %359 = vst.msk [vmem:[#allocation3 + $0x170] sm:$0xff] %vm189_vm0, %v4615_v46  ;;  %416 = vrot.lane.b32.xlu0 %v4556_v33, %s4260_s23  ;;  %418 = vrot.lane.b32.xlu1 %v4564_v34, %s4260_s23  ;;  %v4817_v22 = vld [vmem:[#allocation2 + $0x19] sm:$0xff]  ;;  %v4819_v23 = vld [vmem:[#allocation2 + $0x21] sm:$0xff] }
  0x62   : > { %360 = vst.msk [vmem:[#allocation3 + $0x180] sm:$0xff] %vm189_vm0, %v4617_v47  ;;  %361 = vst.msk [vmem:[#allocation3 + $0x190] sm:$0xff] %vm189_vm0, %v4619_v48  ;;  %v4829_v27 = vld [vmem:[#allocation2 + $0x31] sm:$0xff] }
  0x63   : > { %292 = vst.msk [vmem:[#allocation2 + $0x139] sm:$0xff] %vm189_vm0, %v259_v49  ;;  %293 = vst.msk [vmem:[#allocation2 + $0x141] sm:$0xff] %vm189_vm0, %v260_v50  ;;  %v4889_v49 = vld [vmem:[#allocation2 + $0xa9] sm:$0xff]  ;;  %v4891_v50 = vld [vmem:[#allocation2 + $0xb1] sm:$0xff] }
  0x64   : > { %294 = vst.msk [vmem:[#allocation2 + $0x151] sm:$0xff] %vm189_vm0, %v261_v51  ;;  %295 = vst.msk [vmem:[#allocation2 + $0x159] sm:$0xff] %vm189_vm0, %v262_v52 }
  0x65   : > { %296 = vst.msk [vmem:[#allocation2 + $0x169] sm:$0xff] %vm189_vm0, %v263_v53  ;;  %336 = vst.msk [vmem:[#allocation3] sm:$0xff] %vm189_vm0, %v300_v54  ;;  %420 = vrot.lane.b32.xlu0 %v4566_v35, %s4260_s23  ;;  %422 = vrot.lane.b32.xlu1 %v4568_v36, %s4260_s23  ;;  %v1558_v53 = vld [vmem:[%s6803_s1 + $0x78] sm:$0xff] }
  0x66   : > { %297 = vst.msk [vmem:[#allocation2 + $0x171] sm:$0xff] %vm189_vm0, %v264_v55  ;;  %298 = vst.msk [vmem:[#allocation2 + $0x181] sm:$0xff] %vm189_vm0, %v265_v56  ;;  %v4902_v54 = vld [vmem:[#allocation2 + $0x9a] sm:$0xff]  ;;  %v4906_v56 = vld [vmem:[#allocation2 + $0xc9] sm:$0xff]  ;;  %1658 = vmatpush1.msra.mxu0 %v1558_v53 }
  0x67   : > { %299 = vst.msk [vmem:[#allocation2 + $0x189] sm:$0xff] %vm189_vm0, %v266_v57  ;;  %337 = vst.msk [vmem:[#allocation3 + $0x10] sm:$0xff] %vm189_vm0, %v301_v58  ;;  %v4904_v55 = vld [vmem:[#allocation2 + $0xc1] sm:$0xff]  ;;  %1659 = vmatprep.subr.mxu0 %v4259_v0 }
  0x68   : > { %1447 = vst.msk [vmem:[#allocation3 + $0x8] sm:$0xff] %vm189_vm0, %v4747_v4  ;;  %1448 = vst.msk [vmem:[#allocation3 + $0x18] sm:$0xff] %vm189_vm0, %v4759_v5 }
  0x69   : > { %424 = vrot.lane.b32.xlu0 %v4576_v37, %s4260_s23  ;;  %426 = vrot.lane.b32.xlu1 %v4578_v38, %s4260_s23  ;;  %1449 = vst.msk [vmem:[#allocation3 + $0x28] sm:$0xff] %vm189_vm0, %v4771_v6  ;;  %1450 = vst.msk [vmem:[#allocation3 + $0x38] sm:$0xff] %vm189_vm0, %v4783_v7 }
  0x6a   : > { %v4653_v59 = vld [vmem:[#allocation2 + $0x138] sm:$0xff]  ;;  %v4655_v60 = vld [vmem:[#allocation2 + $0x140] sm:$0xff]  ;;  %1451 = vst.msk [vmem:[#allocation3 + $0x48] sm:$0xff] %vm189_vm0, %v4797_v10  ;;  %1452 = vst.msk [vmem:[#allocation3 + $0x58] sm:$0xff] %vm189_vm0, %v4809_v17 }
  0x6b   : > { %v4657_v61 = vld [vmem:[#allocation2 + $0x150] sm:$0xff]  ;;  %362 = vst.msk [vmem:[#allocation3 + $0x1a0] sm:$0xff] %vm189_vm0, %v4653_v59  ;;  %363 = vst.msk [vmem:[#allocation3 + $0x1b0] sm:$0xff] %vm189_vm0, %v4655_v60  ;;  %v4669_v62 = vld [vmem:[#allocation2 + $0x158] sm:$0xff] }
  0x6c   : > { %364 = vst.msk [vmem:[#allocation3 + $0x1c0] sm:$0xff] %vm189_vm0, %v4657_v61  ;;  %v4671_v63 = vld [vmem:[#allocation2 + $0x168] sm:$0xff]  ;;  %365 = vst.msk [vmem:[#allocation3 + $0x1d0] sm:$0xff] %vm189_vm0, %v4669_v62 }
  0x6d   : > { %366 = vst.msk [vmem:[#allocation3 + $0x1e0] sm:$0xff] %vm189_vm0, %v4671_v63  ;;  %v4677_v1 = vld [vmem:[#allocation2 + $0x170] sm:$0xff]  ;;  %428 = vrot.lane.b32.xlu0 %v4580_v39, %s4260_s23  ;;  %430 = vrot.lane.b32.xlu1 %v4591_v40, %s4260_s23  ;;  %v332_v2 = vld [vmem:[#allocation2 + $0x180] sm:$0xff]  ;;  %1456 = vst.msk [vmem:[#allocation3 + $0x98] sm:$0xff] %vm189_vm0, %v4902_v54 }
  0x6e   : > { %367 = vst.msk [vmem:[#allocation3 + $0x1f0] sm:$0xff] %vm189_vm0, %v4677_v1  ;;  %v333_v3 = vld [vmem:[#allocation2 + $0x188] sm:$0xff] }
  0x71   : > { %432 = vrot.lane.b32.xlu0 %v4593_v41, %s4260_s23  ;;  %434 = vrot.lane.b32.xlu1 %v4595_v42, %s4260_s23 }
  0x75   : > { %436 = vrot.lane.b32.xlu0 %v4603_v43, %s4260_s23  ;;  %438 = vrot.lane.b32.xlu1 %v4605_v44, %s4260_s23 }
  0x79   : > { %440 = vrot.lane.b32.xlu0 %v4607_v45, %s4260_s23  ;;  %442 = vrot.lane.b32.xlu1 %v4615_v46, %s4260_s23 }
  0x7d   : > { %444 = vrot.lane.b32.xlu0 %v4617_v47, %s4260_s23  ;;  %446 = vrot.lane.b32.xlu1 %v4619_v48, %s4260_s23 }
  0x81   : > { %448 = vrot.lane.b32.xlu0 %v4653_v59, %s4260_s23  ;;  %450 = vrot.lane.b32.xlu1 %v4655_v60, %s4260_s23 }
  0x85   : > { %452 = vrot.lane.b32.xlu0 %v4657_v61, %s4260_s23  ;;  %454 = vrot.lane.b32.xlu1 %v4669_v62, %s4260_s23 }
  0x89   : > { %456 = vrot.lane.b32.xlu0 %v4671_v63, %s4260_s23  ;;  %458 = vrot.lane.b32.xlu1 %v4677_v1, %s4260_s23 }
  0x8d   : > { %460 = vrot.lane.b32.xlu0 %v332_v2, %s4260_s23  ;;  %462 = vrot.lane.b32.xlu1 %v333_v3, %s4260_s23 }
  0x91   : > { %531 = vrot.lane.b32.xlu0 %v4528_v26, %s4261_s4  ;;  %533 = vrot.lane.b32.xlu1 %v4540_v28, %s4261_s4  ;;  %v4827_v26 = vld [vmem:[#allocation2 + $0x7a] sm:$0xff] }
  0x92   : > { %v4831_v28 = vld [vmem:[#allocation2 + $0x39] sm:$0xff]  ;;  %1453 = vst.msk [vmem:[#allocation3 + $0x68] sm:$0xff] %vm189_vm0, %v4827_v26 }
  0x95   : > { %535 = vrot.lane.b32.xlu0 %v4542_v29, %s4261_s4  ;;  %537 = vrot.lane.b32.xlu1 %v4544_v30, %s4261_s4 }
  0x99   : > { %539 = vrot.lane.b32.xlu0 %v4552_v31, %s4261_s4  ;;  %541 = vrot.lane.b32.xlu1 %v4554_v32, %s4261_s4  ;;  %v4841_v31 = vld [vmem:[#allocation2 + $0x49] sm:$0xff]  ;;  %v4843_v32 = vld [vmem:[#allocation2 + $0x51] sm:$0xff] }
  0x9d   : > { %543 = vrot.lane.b32.xlu0 %v4556_v33, %s4261_s4  ;;  %545 = vrot.lane.b32.xlu1 %v4564_v34, %s4261_s4 }
  0xa1   : > { %547 = vrot.lane.b32.xlu0 %v4566_v35, %s4261_s4  ;;  %549 = vrot.lane.b32.xlu1 %v4568_v36, %s4261_s4  ;;  %v4851_v35 = vld [vmem:[#allocation2 + $0x82] sm:$0xff] }
  0xa2   : > { %v4853_v36 = vld [vmem:[#allocation2 + $0x61] sm:$0xff]  ;;  %1454 = vst.msk [vmem:[#allocation3 + $0x78] sm:$0xff] %vm189_vm0, %v4851_v35 }
  0xa5   : > { %551 = vrot.lane.b32.xlu0 %v4576_v37, %s4261_s4  ;;  %553 = vrot.lane.b32.xlu1 %v4578_v38, %s4261_s4  ;;  %v4855_v37 = vld [vmem:[#allocation2 + $0x69] sm:$0xff] }
  0xa9   : > { %555 = vrot.lane.b32.xlu0 %v4580_v39, %s4261_s4  ;;  %557 = vrot.lane.b32.xlu1 %v4591_v40, %s4261_s4  ;;  %v4865_v40 = vld [vmem:[#allocation2 + $0x79] sm:$0xff] }
  0xad   : > { %559 = vrot.lane.b32.xlu0 %v4593_v41, %s4261_s4  ;;  %561 = vrot.lane.b32.xlu1 %v4595_v42, %s4261_s4  ;;  %v4867_v41 = vld [vmem:[#allocation2 + $0x81] sm:$0xff] }
  0xb1   : > { %563 = vrot.lane.b32.xlu0 %v4603_v43, %s4261_s4  ;;  %565 = vrot.lane.b32.xlu1 %v4605_v44, %s4261_s4  ;;  %v4875_v44 = vld [vmem:[#allocation2 + $0x92] sm:$0xff] }
  0xb2   : > { %1455 = vst.msk [vmem:[#allocation3 + $0x88] sm:$0xff] %vm189_vm0, %v4875_v44 }
  0xb5   : > { %567 = vrot.lane.b32.xlu0 %v4607_v45, %s4261_s4  ;;  %569 = vrot.lane.b32.xlu1 %v4615_v46, %s4261_s4  ;;  %v4877_v45 = vld [vmem:[#allocation2 + $0x91] sm:$0xff]  ;;  %v4879_v46 = vld [vmem:[#allocation2 + $0x99] sm:$0xff] }
  0xb9   : > { %571 = vrot.lane.b32.xlu0 %v4617_v47, %s4261_s4  ;;  %573 = vrot.lane.b32.xlu1 %v4619_v48, %s4261_s4 }
  0xbd   : > { %575 = vrot.lane.b32.xlu0 %v4653_v59, %s4261_s4  ;;  %577 = vrot.lane.b32.xlu1 %v4655_v60, %s4261_s4  ;;  %v1557_v59 = vld [vmem:[%s6803_s1 + $0x70] sm:$0xff]  ;;  %v1556_v60 = vld [vmem:[%s6803_s1 + $0x68] sm:$0xff] }
  0xbe   : > { %1660 = vmatpush1.msra.mxu0 %v1557_v59  ;;  %v5027_v59 = vld [vmem:[#allocation2 + $0x169] sm:$0xff] }
  0xbf   : > { %1661 = vmatprep.subr.mxu0 %v4259_v0 }
  0xc0   : > { %1662 = vmatpush1.msra.mxu0 %v1556_v60  ;;  %v5029_v60 = vld [vmem:[#allocation2 + $0x171] sm:$0xff] }
  0xc1   : > { %579 = vrot.lane.b32.xlu0 %v4657_v61, %s4261_s4  ;;  %581 = vrot.lane.b32.xlu1 %v4669_v62, %s4261_s4  ;;  %v4923_v61 = vld [vmem:[#allocation2 + $0xd9] sm:$0xff]  ;;  %v4925_v62 = vld [vmem:[#allocation2 + $0xe1] sm:$0xff] }
  0xc2   : > { %1663 = vmatprep.subr.mxu0 %v4259_v0 }
  0xc3   : > { %v401_v8 = vpop.permute.xlu0 %400  ;;  %v405_v9 = vpop.permute.xlu1 %404 }
  0xc4   : > { %497 = vst.msk [vmem:[#allocation3] sm:$0xff] %vm496_vm3, %v401_v8  ;;  %499 = vst.msk [vmem:[#allocation3 + $0x20] sm:$0xff] %vm496_vm3, %v405_v9  ;;  %v4941_v8 = vld [vmem:[#allocation2 + $0xaa] sm:$0xff] }
  0xc5   : > { %583 = vrot.lane.b32.xlu0 %v4671_v63, %s4261_s4  ;;  %585 = vrot.lane.b32.xlu1 %v4677_v1, %s4261_s4  ;;  %v4943_v9 = vld [vmem:[#allocation2 + $0xf1] sm:$0xff]  ;;  %1457 = vst.msk [vmem:[#allocation3 + $0xa8] sm:$0xff] %vm189_vm0, %v4941_v8 }
  0xc7   : > { %v403_v11 = vpop.permute.xlu0 %402  ;;  %v407_v12 = vpop.permute.xlu1 %406 }
  0xc8   : > { %498 = vst.msk [vmem:[#allocation3 + $0x10] sm:$0xff] %vm496_vm3, %v403_v11  ;;  %500 = vst.msk [vmem:[#allocation3 + $0x30] sm:$0xff] %vm496_vm3, %v407_v12  ;;  %v4945_v11 = vld [vmem:[#allocation2 + $0xf9] sm:$0xff] }
  0xc9   : > { %587 = vrot.lane.b32.xlu0 %v332_v2, %s4261_s4  ;;  %589 = vrot.lane.b32.xlu1 %v333_v3, %s4261_s4  ;;  %v1555_v2 = vld [vmem:[%s6803_s1 + $0x60] sm:$0xff]  ;;  %v1554_v3 = vld [vmem:[%s6803_s1 + $0x58] sm:$0xff] }
  0xca   : > { %1664 = vmatpush1.msra.mxu0 %v1555_v2  ;;  %v1546_v2 = vld [vmem:[%s6803_s1 + $0x18] sm:$0xff] }
  0xcb   : > { %v409_v15 = vpop.permute.xlu0 %408  ;;  %v411_v16 = vpop.permute.xlu1 %410  ;;  %1665 = vmatprep.subr.mxu0 %v4259_v0 }
  0xcc   : > { %501 = vst.msk [vmem:[#allocation3 + $0x40] sm:$0xff] %vm496_vm3, %v409_v15  ;;  %502 = vst.msk [vmem:[#allocation3 + $0x50] sm:$0xff] %vm496_vm3, %v411_v16  ;;  %1666 = vmatpush1.msra.mxu0 %v1554_v3  ;;  %v4959_v15 = vld [vmem:[#allocation2 + $0x109] sm:$0xff]  ;;  %v4961_v16 = vld [vmem:[#allocation2 + $0x111] sm:$0xff] }
  0xcd   : > { %591 = vrot.lane.b32.xlu0 %v334_v13, %s4261_s4  ;;  %593 = vrot.lane.b32.xlu1 %v335_v14, %s4261_s4  ;;  %v1553_v14 = vld [vmem:[%s6803_s1 + $0x50] sm:$0xff] }
  0xce   : > { %1667 = vmatprep.subr.mxu0 %v4259_v0  ;;  %v1545_v3 = vld [vmem:[%s6803_s1 + $0x10] sm:$0xff] }
  0xcf   : > { %v413_v20 = vpop.permute.xlu0 %412  ;;  %v415_v21 = vpop.permute.xlu1 %414  ;;  %1668 = vmatpush1.msra.mxu0 %v1553_v14  ;;  %v1480_v14 = vld [vmem:[#allocation3 + $0x8] sm:$0xff] }
  0xd0   : > { %503 = vst.msk [vmem:[#allocation3 + $0x60] sm:$0xff] %vm496_vm3, %v413_v20  ;;  %504 = vst.msk [vmem:[#allocation3 + $0x70] sm:$0xff] %vm496_vm3, %v415_v21  ;;  %v1552_v20 = vld [vmem:[%s6803_s1 + $0x48] sm:$0xff]  ;;  %1669 = vmatprep.subr.mxu0 %v4259_v0  ;;  %v1551_v21 = vld [vmem:[%s6803_s1 + $0x40] sm:$0xff]  ;;  %3905 = vmatprep.mubr.msk.f32.mxu0 %vm189_vm0, %v1480_v14 }
  0xd1   : > { %728 = vrot.lane.b32.xlu0 %v660_v18, %s4262_s6  ;;  %730 = vrot.lane.b32.xlu1 %v661_v19, %s4262_s6 }
  0xd2   : > { %1670 = vmatpush1.msra.mxu0 %v1552_v20  ;;  %v1121_v20 = vld [vmem:[#allocation2 + $0x1a] sm:$0xff] }
  0xd3   : > { %v417_v24 = vpop.permute.xlu0 %416  ;;  %v419_v25 = vpop.permute.xlu1 %418  ;;  %1671 = vmatprep.subr.mxu0 %v4259_v0 }
  0xd4   : > { %505 = vst.msk [vmem:[#allocation3 + $0x80] sm:$0xff] %vm496_vm3, %v417_v24  ;;  %506 = vst.msk [vmem:[#allocation3 + $0x90] sm:$0xff] %vm496_vm3, %v419_v25  ;;  %v4977_v24 = vld [vmem:[#allocation2 + $0xb2] sm:$0xff]  ;;  %v4979_v25 = vld [vmem:[#allocation2 + $0x121] sm:$0xff]  ;;  %1672 = vmatpush1.msra.mxu0 %v1551_v21 }
  0xd5   : > { %732 = vrot.lane.b32.xlu0 %v4817_v22, %s4262_s6  ;;  %734 = vrot.lane.b32.xlu1 %v4819_v23, %s4262_s6  ;;  %1458 = vst.msk [vmem:[#allocation3 + $0xb8] sm:$0xff] %vm189_vm0, %v4977_v24 }
  0xd6   : > { %1673 = vmatprep.subr.mxu0 %v4259_v0 }
  0xd7   : > { %v421_v29 = vpop.permute.xlu0 %420  ;;  %v423_v30 = vpop.permute.xlu1 %422 }
  0xd8   : > { %507 = vst.msk [vmem:[#allocation3 + $0xa0] sm:$0xff] %vm496_vm3, %v421_v29  ;;  %508 = vst.msk [vmem:[#allocation3 + $0xb0] sm:$0xff] %vm496_vm3, %v423_v30  ;;  %v4981_v29 = vld [vmem:[#allocation2 + $0x129] sm:$0xff] }
  0xd9   : > { %736 = vrot.lane.b32.xlu0 %v4829_v27, %s4262_s6  ;;  %738 = vrot.lane.b32.xlu1 %v4831_v28, %s4262_s6 }
  0xdb   : > { %v425_v33 = vpop.permute.xlu0 %424  ;;  %v427_v34 = vpop.permute.xlu1 %426 }
  0xdc   : > { %509 = vst.msk [vmem:[#allocation3 + $0xc0] sm:$0xff] %vm496_vm3, %v425_v33  ;;  %510 = vst.msk [vmem:[#allocation3 + $0xd0] sm:$0xff] %vm496_vm3, %v427_v34  ;;  %v1550_v34 = vld [vmem:[%s6803_s1 + $0x38] sm:$0xff] }
  0xdd   : > { %740 = vrot.lane.b32.xlu0 %v4841_v31, %s4262_s6  ;;  %742 = vrot.lane.b32.xlu1 %v4843_v32, %s4262_s6 }
  0xde   : > { %1674 = vmatpush1.msra.mxu0 %v1550_v34 }
  0xdf   : > { %v429_v38 = vpop.permute.xlu0 %428  ;;  %v431_v39 = vpop.permute.xlu1 %430  ;;  %1675 = vmatprep.subr.mxu0 %v4259_v0 }
  0xe0   : > { %511 = vst.msk [vmem:[#allocation3 + $0xe0] sm:$0xff] %vm496_vm3, %v429_v38  ;;  %512 = vst.msk [vmem:[#allocation3 + $0xf0] sm:$0xff] %vm496_vm3, %v431_v39  ;;  %v4995_v38 = vld [vmem:[#allocation2 + $0x139] sm:$0xff]  ;;  %v4997_v39 = vld [vmem:[#allocation2 + $0x141] sm:$0xff] }
  0xe1   : > { %744 = vrot.lane.b32.xlu0 %v4853_v36, %s4262_s6  ;;  %746 = vrot.lane.b32.xlu1 %v4855_v37, %s4262_s6 }
  0xe3   : > { %v433_v42 = vpop.permute.xlu0 %432  ;;  %v435_v43 = vpop.permute.xlu1 %434 }
  0xe4   : > { %513 = vst.msk [vmem:[#allocation3 + $0x100] sm:$0xff] %vm496_vm3, %v433_v42  ;;  %514 = vst.msk [vmem:[#allocation3 + $0x110] sm:$0xff] %vm496_vm3, %v435_v43 }
  0xe5   : > { %748 = vrot.lane.b32.xlu0 %v4865_v40, %s4262_s6  ;;  %750 = vrot.lane.b32.xlu1 %v4867_v41, %s4262_s6 }
  0xe7   : > { %v437_v47 = vpop.permute.xlu0 %436  ;;  %v439_v48 = vpop.permute.xlu1 %438 }
  0xe8   : > { %515 = vst.msk [vmem:[#allocation3 + $0x120] sm:$0xff] %vm496_vm3, %v437_v47  ;;  %516 = vst.msk [vmem:[#allocation3 + $0x130] sm:$0xff] %vm496_vm3, %v439_v48  ;;  %v1549_v47 = vld [vmem:[%s6803_s1 + $0x30] sm:$0xff]  ;;  %v1548_v48 = vld [vmem:[%s6803_s1 + $0x28] sm:$0xff] }
  0xe9   : > { %752 = vrot.lane.b32.xlu0 %v4877_v45, %s4262_s6  ;;  %754 = vrot.lane.b32.xlu1 %v4879_v46, %s4262_s6 }
  0xea   : > { %1676 = vmatpush1.msra.mxu0 %v1549_v47  ;;  %v1120_v47 = vld [vmem:[#allocation2 + $0xa] sm:$0xff] }
  0xeb   : > { %v441_v51 = vpop.permute.xlu0 %440  ;;  %v443_v52 = vpop.permute.xlu1 %442  ;;  %1677 = vmatprep.subr.mxu0 %v4259_v0 }
  0xec   : > { %517 = vst.msk [vmem:[#allocation3 + $0x140] sm:$0xff] %vm496_vm3, %v441_v51  ;;  %518 = vst.msk [vmem:[#allocation3 + $0x150] sm:$0xff] %vm496_vm3, %v443_v52  ;;  %v5013_v51 = vld [vmem:[#allocation2 + $0x151] sm:$0xff]  ;;  %v5015_v52 = vld [vmem:[#allocation2 + $0x159] sm:$0xff]  ;;  %1678 = vmatpush1.msra.mxu0 %v1548_v48 }
  0xed   : > { %756 = vrot.lane.b32.xlu0 %v4889_v49, %s4262_s6  ;;  %758 = vrot.lane.b32.xlu1 %v4891_v50, %s4262_s6  ;;  %v1122_v48 = vld [vmem:[#allocation2 + $0x22] sm:$0xff] }
  0xee   : > { %1679 = vmatprep.subr.mxu0 %v4259_v0 }
  0xef   : > { %v445_v57 = vpop.permute.xlu0 %444  ;;  %v447_v58 = vpop.permute.xlu1 %446 }
  0xf0   : > { %519 = vst.msk [vmem:[#allocation3 + $0x160] sm:$0xff] %vm496_vm3, %v445_v57  ;;  %520 = vst.msk [vmem:[#allocation3 + $0x170] sm:$0xff] %vm496_vm3, %v447_v58  ;;  %v1547_v58 = vld [vmem:[%s6803_s1 + $0x20] sm:$0xff] }
  0xf1   : > { %760 = vrot.lane.b32.xlu0 %v4904_v55, %s4262_s6  ;;  %762 = vrot.lane.b32.xlu1 %v4906_v56, %s4262_s6 }
  0xf2   : > { %1680 = vmatpush1.msra.mxu0 %v1547_v58 }
  0xf3   : > { %v449_v63 = vpop.permute.xlu0 %448  ;;  %v451_v1 = vpop.permute.xlu1 %450  ;;  %1681 = vmatprep.subr.mxu0 %v4259_v0 }
  0xf4   : > { %521 = vst.msk [vmem:[#allocation3 + $0x180] sm:$0xff] %vm496_vm3, %v449_v63  ;;  %522 = vst.msk [vmem:[#allocation3 + $0x190] sm:$0xff] %vm496_vm3, %v451_v1  ;;  %1682 = vmatpush1.msra.mxu0 %v1546_v2 }
  0xf5   : > { %764 = vrot.lane.b32.xlu0 %v4923_v61, %s4262_s6  ;;  %766 = vrot.lane.b32.xlu1 %v4925_v62, %s4262_s6 }
  0xf6   : > { %1683 = vmatprep.subr.mxu0 %v4259_v0 }
  0xf7   : > { %v453_v12 = vpop.permute.xlu0 %452  ;;  %v455_v13 = vpop.permute.xlu1 %454  ;;  %1684 = vmatpush1.msra.mxu0 %v1545_v3 }
  0xf8   : > { %523 = vst.msk [vmem:[#allocation3 + $0x1a0] sm:$0xff] %vm496_vm3, %v453_v12  ;;  %524 = vst.msk [vmem:[#allocation3 + $0x1b0] sm:$0xff] %vm496_vm3, %v455_v13  ;;  %1685 = vmatprep.subr.mxu0 %v4259_v0 }
  0xf9   : > { %768 = vrot.lane.b32.xlu0 %v4943_v9, %s4262_s6  ;;  %770 = vrot.lane.b32.xlu1 %v4945_v11, %s4262_s6 }
  0xfb   : > { %v457_v18 = vpop.permute.xlu0 %456  ;;  %v459_v19 = vpop.permute.xlu1 %458 }
  0xfc   : > { %525 = vst.msk [vmem:[#allocation3 + $0x1c0] sm:$0xff] %vm496_vm3, %v457_v18  ;;  %526 = vst.msk [vmem:[#allocation3 + $0x1d0] sm:$0xff] %vm496_vm3, %v459_v19  ;;  %v1544_v18 = vld [vmem:[%s6803_s1 + $0x8] sm:$0xff] }
  0xfd   : > { %772 = vrot.lane.b32.xlu0 %v4959_v15, %s4262_s6  ;;  %774 = vrot.lane.b32.xlu1 %v4961_v16, %s4262_s6  ;;  %v1119_v19 = vld [vmem:[#allocation2 + $0x2] sm:$0xff] }
  0xfe   : > { %1686 = vmatpush1.msra.mxu0 %v1544_v18 }
  0xff   : > { %v461_v30 = vpop.permute.xlu0 %460  ;;  %v463_v33 = vpop.permute.xlu1 %462  ;;  %1687 = vmatprep.subr.mxu0 %v4259_v0 }
 0x100   : > { %527 = vst.msk [vmem:[#allocation3 + $0x1e0] sm:$0xff] %vm496_vm3, %v461_v30  ;;  %528 = vst.msk [vmem:[#allocation3 + $0x1f0] sm:$0xff] %vm496_vm3, %v463_v33  ;;  %v1543_v33 = vld [vmem:[%s6803_s1] sm:$0xff] }
 0x101   : > { %776 = vrot.lane.b32.xlu0 %v4979_v25, %s4262_s6  ;;  %778 = vrot.lane.b32.xlu1 %v4981_v29, %s4262_s6 }
 0x102   : > { %1688 = vmatpush1.msra.mxu0 %v1543_v33 }
 0x103   : > { %v532_v42 = vpop.permute.xlu0 %531  ;;  %v534_v43 = vpop.permute.xlu1 %533  ;;  %1717 = vmatprep.subr.mxu0 %v4259_v0 }
 0x104   : > { %628 = vst.msk [vmem:[#allocation3] sm:$0xff] %vm627_vm4, %v532_v42  ;;  %629 = vst.msk [vmem:[#allocation3 + $0x10] sm:$0xff] %vm627_vm4, %v534_v43  ;;  %v1559_v43 = vld [vmem:[%s6803_s1 + $0x80] sm:$0xff] }
 0x105   : > { %780 = vrot.lane.b32.xlu0 %v4995_v38, %s4262_s6  ;;  %782 = vrot.lane.b32.xlu1 %v4997_v39, %s4262_s6 }
 0x107   : > { %v536_v53 = vpop.permute.xlu0 %535  ;;  %v538_v57 = vpop.permute.xlu1 %537 }
 0x108   : > { %630 = vst.msk [vmem:[#allocation3 + $0x20] sm:$0xff] %vm627_vm4, %v536_v53  ;;  %631 = vst.msk [vmem:[#allocation3 + $0x30] sm:$0xff] %vm627_vm4, %v538_v57 }
 0x109   : > { %784 = vrot.lane.b32.xlu0 %v5013_v51, %s4262_s6  ;;  %786 = vrot.lane.b32.xlu1 %v5015_v52, %s4262_s6 }
 0x10b   : > { %v540_v63 = vpop.permute.xlu0 %539  ;;  %v542_v1 = vpop.permute.xlu1 %541 }
 0x10c   : > { %632 = vst.msk [vmem:[#allocation3 + $0x40] sm:$0xff] %vm627_vm4, %v540_v63  ;;  %633 = vst.msk [vmem:[#allocation3 + $0x50] sm:$0xff] %vm627_vm4, %v542_v1 }
 0x10d   : > { %788 = vrot.lane.b32.xlu0 %v5027_v59, %s4262_s6  ;;  %790 = vrot.lane.b32.xlu1 %v5029_v60, %s4262_s6 }
 0x10f   : > { %v544_v12 = vpop.permute.xlu0 %543  ;;  %v546_v13 = vpop.permute.xlu1 %545 }
 0x110   : > { %634 = vst.msk [vmem:[#allocation3 + $0x60] sm:$0xff] %vm627_vm4, %v544_v12  ;;  %635 = vst.msk [vmem:[#allocation3 + $0x70] sm:$0xff] %vm627_vm4, %v546_v13 }
 0x111   : > { %859 = vrot.lane.b32.xlu0 %v4817_v22, %s4263_s20  ;;  %990 = vrot.lane.b32.xlu1 %v4829_v27, %s4264_s22  ;;  %v1560_v22 = vld [vmem:[%s6803_s1 + $0x88] sm:$0xff] }
 0x112   : > { %1718 = vmatpush2.msra.mxu0 %v1560_v22 }
 0x113   : > { %v548_v21 = vpop.permute.xlu0 %547  ;;  %v550_v30 = vpop.permute.xlu1 %549  ;;  %1719 = vmatprep.subr.mxu0 %v4259_v0 }
 0x114   : > { %636 = vst.msk [vmem:[#allocation3 + $0x80] sm:$0xff] %vm627_vm4, %v548_v21  ;;  %637 = vst.msk [vmem:[#allocation3 + $0x90] sm:$0xff] %vm627_vm4, %v550_v30  ;;  %1720 = vmatpush2.msra.mxu0 %v1559_v43 }
 0x115   : > { %1187 = vrot.lane.b32.xlu0 %v1119_v19, %s4265_s28  ;;  %1318 = vrot.lane.b32.xlu1 %v1121_v20, %s4266_s29 }
 0x117   : > { %v552_v34 = vpop.permute.xlu0 %551  ;;  %v554_v42 = vpop.permute.xlu1 %553 }
 0x118   : > { %638 = vst.msk [vmem:[#allocation3 + $0xa0] sm:$0xff] %vm627_vm4, %v552_v34  ;;  %639 = vst.msk [vmem:[#allocation3 + $0xb0] sm:$0xff] %vm627_vm4, %v554_v42 }
 0x119   : > { %861 = vrot.lane.b32.xlu0 %v4819_v23, %s4263_s20  ;;  %992 = vrot.lane.b32.xlu1 %v4831_v28, %s4264_s22 }
 0x11b   : > { %v556_v53 = vpop.permute.xlu0 %555  ;;  %v558_v57 = vpop.permute.xlu1 %557 }
 0x11c   : > { %640 = vst.msk [vmem:[#allocation3 + $0xc0] sm:$0xff] %vm627_vm4, %v556_v53  ;;  %641 = vst.msk [vmem:[#allocation3 + $0xd0] sm:$0xff] %vm627_vm4, %v558_v57  ;;  %v5183_v57 = vld [vmem:[#allocation2 + $0xca] sm:$0xff] }
 0x11d   : > { %1189 = vrot.lane.b32.xlu0 %v1120_v47, %s4265_s28  ;;  %1320 = vrot.lane.b32.xlu1 %v1122_v48, %s4266_s29  ;;  %1460 = vst.msk [vmem:[#allocation3 + $0xd8] sm:$0xff] %vm189_vm0, %v5183_v57 }
 0x11f   : > { %v560_v58 = vpop.permute.xlu0 %559  ;;  %v562_v23 = vpop.permute.xlu1 %561 }
 0x120   : > { %642 = vst.msk [vmem:[#allocation3 + $0xe0] sm:$0xff] %vm627_vm4, %v560_v58  ;;  %643 = vst.msk [vmem:[#allocation3 + $0xf0] sm:$0xff] %vm627_vm4, %v562_v23 }
 0x121   : > { %863 = vrot.lane.b32.xlu0 %v4829_v27, %s4263_s20  ;;  %994 = vrot.lane.b32.xlu1 %v4841_v31, %s4264_s22 }
 0x123   : > { %v564_v63 = vpop.permute.xlu0 %563  ;;  %v566_v1 = vpop.permute.xlu1 %565 }
 0x124   : > { %644 = vst.msk [vmem:[#allocation3 + $0x100] sm:$0xff] %vm627_vm4, %v564_v63  ;;  %645 = vst.msk [vmem:[#allocation3 + $0x110] sm:$0xff] %vm627_vm4, %v566_v1  ;;  %v5199_v63 = vld [vmem:[#allocation2 + $0xda] sm:$0xff] }
 0x125   : > { %1191 = vrot.lane.b32.xlu0 %v1121_v20, %s4265_s28  ;;  %1322 = vrot.lane.b32.xlu1 %v4747_v4, %s4266_s29  ;;  %1461 = vst.msk [vmem:[#allocation3 + $0xe8] sm:$0xff] %vm189_vm0, %v5199_v63 }
 0x127   : > { %v568_v2 = vpop.permute.xlu0 %567  ;;  %v570_v3 = vpop.permute.xlu1 %569 }
 0x128   : > { %646 = vst.msk [vmem:[#allocation3 + $0x120] sm:$0xff] %vm627_vm4, %v568_v2  ;;  %647 = vst.msk [vmem:[#allocation3 + $0x130] sm:$0xff] %vm627_vm4, %v570_v3  ;;  %v5215_v3 = vld [vmem:[#allocation2 + $0xe2] sm:$0xff] }
 0x129   : > { %865 = vrot.lane.b32.xlu0 %v4831_v28, %s4263_s20  ;;  %996 = vrot.lane.b32.xlu1 %v4843_v32, %s4264_s22  ;;  %1462 = vst.msk [vmem:[#allocation3 + $0xf8] sm:$0xff] %vm189_vm0, %v5215_v3 }
 0x12b   : > { %v572_v27 = vpop.permute.xlu0 %571  ;;  %v574_v12 = vpop.permute.xlu1 %573 }
 0x12c   : > { %648 = vst.msk [vmem:[#allocation3 + $0x140] sm:$0xff] %vm627_vm4, %v572_v27  ;;  %649 = vst.msk [vmem:[#allocation3 + $0x150] sm:$0xff] %vm627_vm4, %v574_v12 }
 0x12d   : > { %1193 = vrot.lane.b32.xlu0 %v1122_v48, %s4265_s28  ;;  %1324 = vrot.lane.b32.xlu1 %v4759_v5, %s4266_s29 }
 0x12f   : > { %v576_v13 = vpop.permute.xlu0 %575  ;;  %v578_v14 = vpop.permute.xlu1 %577 }
 0x130   : > { %650 = vst.msk [vmem:[#allocation3 + $0x160] sm:$0xff] %vm627_vm4, %v576_v13  ;;  %651 = vst.msk [vmem:[#allocation3 + $0x170] sm:$0xff] %vm627_vm4, %v578_v14  ;;  %v5239_v14 = vld [vmem:[#allocation2 + $0xfa] sm:$0xff] }
 0x131   : > { %867 = vrot.lane.b32.xlu0 %v4841_v31, %s4263_s20  ;;  %998 = vrot.lane.b32.xlu1 %v4853_v36, %s4264_s22  ;;  %1464 = vst.msk [vmem:[#allocation3 + $0x118] sm:$0xff] %vm189_vm0, %v5239_v14 }
 0x133   : > { %v580_v28 = vpop.permute.xlu0 %579  ;;  %v582_v18 = vpop.permute.xlu1 %581 }
 0x134   : > { %652 = vst.msk [vmem:[#allocation3 + $0x180] sm:$0xff] %vm627_vm4, %v580_v28  ;;  %653 = vst.msk [vmem:[#allocation3 + $0x190] sm:$0xff] %vm627_vm4, %v582_v18  ;;  %v5241_v28 = vld [vmem:[#allocation2 + $0x10a] sm:$0xff]  ;;  %v5251_v18 = vld [vmem:[#allocation2 + $0x122] sm:$0xff] }
 0x135   : > { %1195 = vrot.lane.b32.xlu0 %v4747_v4, %s4265_s28  ;;  %1326 = vrot.lane.b32.xlu1 %v4771_v6, %s4266_s29  ;;  %1465 = vst.msk [vmem:[#allocation3 + $0x128] sm:$0xff] %vm189_vm0, %v5241_v28  ;;  %1467 = vst.msk [vmem:[#allocation3 + $0x148] sm:$0xff] %vm189_vm0, %v5251_v18 }
 0x137   : > { %v584_v19 = vpop.permute.xlu0 %583  ;;  %v586_v20 = vpop.permute.xlu1 %585 }
 0x138   : > { %654 = vst.msk [vmem:[#allocation3 + $0x1a0] sm:$0xff] %vm627_vm4, %v584_v19  ;;  %655 = vst.msk [vmem:[#allocation3 + $0x1b0] sm:$0xff] %vm627_vm4, %v586_v20  ;;  %v5255_v19 = vld [vmem:[#allocation2 + $0x13a] sm:$0xff] }
 0x139   : > { %869 = vrot.lane.b32.xlu0 %v4843_v32, %s4263_s20  ;;  %1000 = vrot.lane.b32.xlu1 %v4855_v37, %s4264_s22  ;;  %1469 = vst.msk [vmem:[#allocation3 + $0x168] sm:$0xff] %vm189_vm0, %v5255_v19 }
 0x13b   : > { %v588_v31 = vpop.permute.xlu0 %587  ;;  %v590_v21 = vpop.permute.xlu1 %589 }
 0x13c   : > { %656 = vst.msk [vmem:[#allocation3 + $0x1c0] sm:$0xff] %vm627_vm4, %v588_v31  ;;  %657 = vst.msk [vmem:[#allocation3 + $0x1d0] sm:$0xff] %vm627_vm4, %v590_v21  ;;  %v5263_v21 = vld [vmem:[#allocation2 + $0x142] sm:$0xff] }
 0x13d   : > { %1197 = vrot.lane.b32.xlu0 %v4759_v5, %s4265_s28  ;;  %1328 = vrot.lane.b32.xlu1 %v4783_v7, %s4266_s29  ;;  %1470 = vst.msk [vmem:[#allocation3 + $0x178] sm:$0xff] %vm189_vm0, %v5263_v21 }
 0x13f   : > { %v592_v4 = vpop.permute.xlu0 %591  ;;  %v594_v30 = vpop.permute.xlu1 %593 }
 0x140   : > { %658 = vst.msk [vmem:[#allocation3 + $0x1e0] sm:$0xff] %vm627_vm4, %v592_v4  ;;  %659 = vst.msk [vmem:[#allocation3 + $0x1f0] sm:$0xff] %vm627_vm4, %v594_v30  ;;  %v5265_v4 = vld [vmem:[#allocation2 + $0x152] sm:$0xff]  ;;  %v5267_v30 = vld [vmem:[#allocation2 + $0x15a] sm:$0xff] }
 0x141   : > { %871 = vrot.lane.b32.xlu0 %v4853_v36, %s4263_s20  ;;  %1002 = vrot.lane.b32.xlu1 %v4865_v40, %s4264_s22  ;;  %1471 = vst.msk [vmem:[#allocation3 + $0x188] sm:$0xff] %vm189_vm0, %v5265_v4  ;;  %1472 = vst.msk [vmem:[#allocation3 + $0x198] sm:$0xff] %vm189_vm0, %v5267_v30 }
 0x143   : > { %v729_v32 = vpop.permute.xlu0 %728  ;;  %v731_v33 = vpop.permute.xlu1 %730 }
 0x144   : > { %825 = vst.msk [vmem:[#allocation3] sm:$0xff] %vm824_vm5, %v729_v32  ;;  %826 = vst.msk [vmem:[#allocation3 + $0x10] sm:$0xff] %vm824_vm5, %v731_v33  ;;  %v5277_v32 = vld [vmem:[#allocation2 + $0x16a] sm:$0xff] }
 0x145   : > { %1199 = vrot.lane.b32.xlu0 %v4771_v6, %s4265_s28  ;;  %1330 = vrot.lane.b32.xlu1 %v4797_v10, %s4266_s29  ;;  %1473 = vst.msk [vmem:[#allocation3 + $0x1a8] sm:$0xff] %vm189_vm0, %v5277_v32 }
 0x147   : > { %v733_v5 = vpop.permute.xlu0 %732  ;;  %v735_v22 = vpop.permute.xlu1 %734 }
 0x148   : > { %827 = vst.msk [vmem:[#allocation3 + $0x20] sm:$0xff] %vm824_vm5, %v733_v5  ;;  %828 = vst.msk [vmem:[#allocation3 + $0x30] sm:$0xff] %vm824_vm5, %v735_v22 }
 0x149   : > { %873 = vrot.lane.b32.xlu0 %v4855_v37, %s4263_s20  ;;  %1004 = vrot.lane.b32.xlu1 %v4867_v41, %s4264_s22 }
 0x14b   : > { %v737_v36 = vpop.permute.xlu0 %736  ;;  %v739_v34 = vpop.permute.xlu1 %738 }
 0x14c   : > { %829 = vst.msk [vmem:[#allocation3 + $0x40] sm:$0xff] %vm824_vm5, %v737_v36  ;;  %830 = vst.msk [vmem:[#allocation3 + $0x50] sm:$0xff] %vm824_vm5, %v739_v34  ;;  %v5292_v36 = vld [vmem:[#allocation2 + $0x172] sm:$0xff] }
 0x14d   : > { %1201 = vrot.lane.b32.xlu0 %v4783_v7, %s4265_s28  ;;  %1332 = vrot.lane.b32.xlu1 %v4809_v17, %s4266_s29  ;;  %1474 = vst.msk [vmem:[#allocation3 + $0x1b8] sm:$0xff] %vm189_vm0, %v5292_v36 }
 0x14f   : > { %v741_v6 = vpop.permute.xlu0 %740  ;;  %v743_v42 = vpop.permute.xlu1 %742 }
 0x150   : > { %831 = vst.msk [vmem:[#allocation3 + $0x60] sm:$0xff] %vm824_vm5, %v741_v6  ;;  %832 = vst.msk [vmem:[#allocation3 + $0x70] sm:$0xff] %vm824_vm5, %v743_v42 }
 0x151   : > { %875 = vrot.lane.b32.xlu0 %v4865_v40, %s4263_s20  ;;  %1006 = vrot.lane.b32.xlu1 %v4877_v45, %s4264_s22  ;;  %v5167_v40 = vld [vmem:[#allocation2 + $0xc2] sm:$0xff] }
 0x152   : > { %1459 = vst.msk [vmem:[#allocation3 + $0xc8] sm:$0xff] %vm189_vm0, %v5167_v40 }
 0x153   : > { %v745_v37 = vpop.permute.xlu0 %744  ;;  %v747_v43 = vpop.permute.xlu1 %746 }
 0x154   : > { %833 = vst.msk [vmem:[#allocation3 + $0x80] sm:$0xff] %vm824_vm5, %v745_v37  ;;  %834 = vst.msk [vmem:[#allocation3 + $0x90] sm:$0xff] %vm824_vm5, %v747_v43  ;;  %v1482_v43 = vld [vmem:[#allocation3 + $0x18] sm:$0xff] }
 0x155   : > { %1203 = vrot.lane.b32.xlu0 %v4797_v10, %s4265_s28  ;;  %1334 = vrot.lane.b32.xlu1 %v4827_v26, %s4266_s29 }
 0x157   : > { %v749_v7 = vpop.permute.xlu0 %748  ;;  %v751_v47 = vpop.permute.xlu1 %750 }
 0x158   : > { %835 = vst.msk [vmem:[#allocation3 + $0xa0] sm:$0xff] %vm824_vm5, %v749_v7  ;;  %836 = vst.msk [vmem:[#allocation3 + $0xb0] sm:$0xff] %vm824_vm5, %v751_v47 }
 0x159   : > { %877 = vrot.lane.b32.xlu0 %v4867_v41, %s4263_s20  ;;  %1008 = vrot.lane.b32.xlu1 %v4879_v46, %s4264_s22 }
 0x15b   : > { %v753_v10 = vpop.permute.xlu0 %752  ;;  %v755_v48 = vpop.permute.xlu1 %754 }
 0x15c   : > { %837 = vst.msk [vmem:[#allocation3 + $0xc0] sm:$0xff] %vm824_vm5, %v753_v10  ;;  %838 = vst.msk [vmem:[#allocation3 + $0xd0] sm:$0xff] %vm824_vm5, %v755_v48 }
 0x15d   : > { %1205 = vrot.lane.b32.xlu0 %v4809_v17, %s4265_s28  ;;  %1336 = vrot.lane.b32.xlu1 %v4851_v35, %s4266_s29 }
 0x15f   : > { %v757_v53 = vpop.permute.xlu0 %756  ;;  %v759_v41 = vpop.permute.xlu1 %758 }
 0x160   : > { %839 = vst.msk [vmem:[#allocation3 + $0xe0] sm:$0xff] %vm824_vm5, %v757_v53  ;;  %840 = vst.msk [vmem:[#allocation3 + $0xf0] sm:$0xff] %vm824_vm5, %v759_v41 }
 0x161   : > { %879 = vrot.lane.b32.xlu0 %v4877_v45, %s4263_s20  ;;  %1010 = vrot.lane.b32.xlu1 %v4889_v49, %s4264_s22 }
 0x163   : > { %v761_v17 = vpop.permute.xlu0 %760  ;;  %v763_v58 = vpop.permute.xlu1 %762 }
 0x164   : > { %841 = vst.msk [vmem:[#allocation3 + $0x100] sm:$0xff] %vm824_vm5, %v761_v17  ;;  %842 = vst.msk [vmem:[#allocation3 + $0x110] sm:$0xff] %vm824_vm5, %v763_v58 }
 0x165   : > { %1207 = vrot.lane.b32.xlu0 %v4827_v26, %s4265_s28  ;;  %1338 = vrot.lane.b32.xlu1 %v4875_v44, %s4266_s29 }
 0x167   : > { %v765_v23 = vpop.permute.xlu0 %764  ;;  %v767_v45 = vpop.permute.xlu1 %766 }
 0x168   : > { %843 = vst.msk [vmem:[#allocation3 + $0x120] sm:$0xff] %vm824_vm5, %v765_v23  ;;  %844 = vst.msk [vmem:[#allocation3 + $0x130] sm:$0xff] %vm824_vm5, %v767_v45 }
 0x169   : > { %881 = vrot.lane.b32.xlu0 %v4879_v46, %s4263_s20  ;;  %1012 = vrot.lane.b32.xlu1 %v4891_v50, %s4264_s22 }
 0x16b   : > { %v769_v26 = vpop.permute.xlu0 %768  ;;  %v771_v1 = vpop.permute.xlu1 %770 }
 0x16c   : > { %845 = vst.msk [vmem:[#allocation3 + $0x140] sm:$0xff] %vm824_vm5, %v769_v26  ;;  %846 = vst.msk [vmem:[#allocation3 + $0x150] sm:$0xff] %vm824_vm5, %v771_v1 }
 0x16d   : > { %1209 = vrot.lane.b32.xlu0 %v4851_v35, %s4265_s28  ;;  %1340 = vrot.lane.b32.xlu1 %v4902_v54, %s4266_s29  ;;  %v5223_v35 = vld [vmem:[#allocation2 + $0xf2] sm:$0xff] }
 0x16e   : > { %1463 = vst.msk [vmem:[#allocation3 + $0x108] sm:$0xff] %vm189_vm0, %v5223_v35 }
 0x16f   : > { %v773_v2 = vpop.permute.xlu0 %772  ;;  %v775_v46 = vpop.permute.xlu1 %774 }
 0x170   : > { %847 = vst.msk [vmem:[#allocation3 + $0x160] sm:$0xff] %vm824_vm5, %v773_v2  ;;  %848 = vst.msk [vmem:[#allocation3 + $0x170] sm:$0xff] %vm824_vm5, %v775_v46 }
 0x171   : > { %883 = vrot.lane.b32.xlu0 %v4889_v49, %s4263_s20  ;;  %1014 = vrot.lane.b32.xlu1 %v4904_v55, %s4264_s22 }
 0x173   : > { %v777_v27 = vpop.permute.xlu0 %776  ;;  %v779_v12 = vpop.permute.xlu1 %778 }
 0x174   : > { %849 = vst.msk [vmem:[#allocation3 + $0x180] sm:$0xff] %vm824_vm5, %v777_v27  ;;  %850 = vst.msk [vmem:[#allocation3 + $0x190] sm:$0xff] %vm824_vm5, %v779_v12 }
 0x175   : > { %1211 = vrot.lane.b32.xlu0 %v4875_v44, %s4265_s28  ;;  %1342 = vrot.lane.b32.xlu1 %v4941_v8, %s4266_s29  ;;  %v5243_v44 = vld [vmem:[#allocation2 + $0x112] sm:$0xff] }
 0x176   : > { %1466 = vst.msk [vmem:[#allocation3 + $0x138] sm:$0xff] %vm189_vm0, %v5243_v44 }
 0x177   : > { %v781_v49 = vpop.permute.xlu0 %780  ;;  %v783_v13 = vpop.permute.xlu1 %782 }
 0x178   : > { %851 = vst.msk [vmem:[#allocation3 + $0x1a0] sm:$0xff] %vm824_vm5, %v781_v49  ;;  %852 = vst.msk [vmem:[#allocation3 + $0x1b0] sm:$0xff] %vm824_vm5, %v783_v13 }
 0x179   : > { %885 = vrot.lane.b32.xlu0 %v4891_v50, %s4263_s20  ;;  %1016 = vrot.lane.b32.xlu1 %v4906_v56, %s4264_s22  ;;  %v5253_v50 = vld [vmem:[#allocation2 + $0x12a] sm:$0xff] }
 0x17a   : > { %1468 = vst.msk [vmem:[#allocation3 + $0x158] sm:$0xff] %vm189_vm0, %v5253_v50 }
 0x17b   : > { %v785_v20 = vpop.permute.xlu0 %784  ;;  %v787_v31 = vpop.permute.xlu1 %786 }
 0x17c   : > { %853 = vst.msk [vmem:[#allocation3 + $0x1c0] sm:$0xff] %vm824_vm5, %v785_v20  ;;  %854 = vst.msk [vmem:[#allocation3 + $0x1d0] sm:$0xff] %vm824_vm5, %v787_v31 }
 0x17d   : > { %1213 = vrot.lane.b32.xlu0 %v4902_v54, %s4265_s28  ;;  %1344 = vrot.lane.b32.xlu1 %v4977_v24, %s4266_s29 }
 0x17f   : > { %v789_v33 = vpop.permute.xlu0 %788  ;;  %v791_v5 = vpop.permute.xlu1 %790 }
 0x180   : > { %855 = vst.msk [vmem:[#allocation3 + $0x1e0] sm:$0xff] %vm824_vm5, %v789_v33  ;;  %856 = vst.msk [vmem:[#allocation3 + $0x1f0] sm:$0xff] %vm824_vm5, %v791_v5 }
 0x181   : > { %887 = vrot.lane.b32.xlu0 %v4904_v55, %s4263_s20  ;;  %1018 = vrot.lane.b32.xlu1 %v4923_v61, %s4264_s22 }
 0x183   : > { %v860_v54 = vpop.permute.xlu0 %859  ;;  %v991_v22 = vpop.permute.xlu1 %990 }
 0x184   : > { %956 = vst.msk [vmem:[#allocation3] sm:$0xff] %vm955_vm6, %v860_v54 }
 0x185   : > { %1087 = vst.msk [vmem:[#allocation3] sm:$0xff] %vm1086_vm7, %v991_v22  ;;  %1215 = vrot.lane.b32.xlu0 %v4941_v8, %s4265_s28  ;;  %1346 = vrot.lane.b32.xlu1 %v5167_v40, %s4266_s29 }
 0x187   : > { %v1188_v55 = vpop.permute.xlu0 %1187  ;;  %v1319_v34 = vpop.permute.xlu1 %1318 }
 0x188   : > { %1284 = vst.msk [vmem:[#allocation3] sm:$0xff] %vm1283_vm8, %v1188_v55 }
 0x189   : > { %1415 = vst.msk [vmem:[#allocation3] sm:$0xff] %vm1414_vm9, %v1319_v34  ;;  %889 = vrot.lane.b32.xlu0 %v4906_v56, %s4263_s20  ;;  %1020 = vrot.lane.b32.xlu1 %v4925_v62, %s4264_s22 }
 0x18b   : > { %v862_v8 = vpop.permute.xlu0 %861  ;;  %v993_v6 = vpop.permute.xlu1 %992 }
 0x18c   : > { %957 = vst.msk [vmem:[#allocation3 + $0x10] sm:$0xff] %vm955_vm6, %v862_v8 }
 0x18d   : > { %1088 = vst.msk [vmem:[#allocation3 + $0x10] sm:$0xff] %vm1086_vm7, %v993_v6  ;;  %1217 = vrot.lane.b32.xlu0 %v4977_v24, %s4265_s28  ;;  %1348 = vrot.lane.b32.xlu1 %v5183_v57, %s4266_s29 }
 0x18f   : > { %v1190_v42 = vpop.permute.xlu0 %1189  ;;  %v1321_v37 = vpop.permute.xlu1 %1320 }
 0x190   : > { %1285 = vst.msk [vmem:[#allocation3 + $0x10] sm:$0xff] %vm1283_vm8, %v1190_v42  ;;  %v1479_v56 = vld [vmem:[#allocation3] sm:$0xff] }
 0x191   : > { %1416 = vst.msk [vmem:[#allocation3 + $0x10] sm:$0xff] %vm1414_vm9, %v1321_v37  ;;  %1722 = vmatmul.mubr.f32.vlgmr.msra.gmra.mxu0 %v1479_v56  ;;  %891 = vrot.lane.b32.xlu0 %v4923_v61, %s4263_s20  ;;  %v1484_v61 = vld [vmem:[#allocation3 + $0x28] sm:$0xff] }
 0x192   : > { %3906 = vmatprep.mubr.msk.f32.mxu0 %vm189_vm0, %v1482_v43  ;;  %1022 = vrot.lane.b32.xlu1 %v4943_v9, %s4264_s22 }
 0x193   : > { %v864_v24 = vpop.permute.xlu0 %863  ;;  %v995_v7 = vpop.permute.xlu1 %994 }
 0x194   : > { %958 = vst.msk [vmem:[#allocation3 + $0x20] sm:$0xff] %vm955_vm6, %v864_v24 }
 0x195   : > { %1089 = vst.msk [vmem:[#allocation3 + $0x20] sm:$0xff] %vm1086_vm7, %v995_v7  ;;  %1219 = vrot.lane.b32.xlu0 %v5167_v40, %s4265_s28  ;;  %v5428_v7 = vld [vmem:[#allocation2 + $0x182] sm:$0xff] }
 0x196   : > { %1350 = vrot.lane.b32.xlu1 %v5199_v63, %s4266_s29  ;;  %1475 = vst.msk [vmem:[#allocation3 + $0x1c8] sm:$0xff] %vm189_vm0, %v5428_v7 }
 0x197   : > { %v1192_v47 = vpop.permute.xlu0 %1191  ;;  %v1323_v10 = vpop.permute.xlu1 %1322 }
 0x198   : > { %1286 = vst.msk [vmem:[#allocation3 + $0x20] sm:$0xff] %vm1283_vm8, %v1192_v47  ;;  %v1481_v48 = vld [vmem:[#allocation3 + $0x10] sm:$0xff] }
 0x199   : > { %1417 = vst.msk [vmem:[#allocation3 + $0x20] sm:$0xff] %vm1414_vm9, %v1323_v10  ;;  %1727 = vmatmul.mubr.f32.gmra.mxu0 %v1481_v48  ;;  %893 = vrot.lane.b32.xlu0 %v4925_v62, %s4263_s20  ;;  %v1486_v62 = vld [vmem:[#allocation3 + $0x38] sm:$0xff]  ;;  %v1500_v10 = vld [vmem:[#allocation3 + $0xa8] sm:$0xff] }
 0x19a   : > { %3907 = vmatprep.mubr.msk.f32.mxu0 %vm189_vm0, %v1484_v61  ;;  %1024 = vrot.lane.b32.xlu1 %v4945_v11, %s4264_s22 }
 0x19b   : > { %v866_v40 = vpop.permute.xlu0 %865  ;;  %v997_v53 = vpop.permute.xlu1 %996 }
 0x19c   : > { %959 = vst.msk [vmem:[#allocation3 + $0x30] sm:$0xff] %vm955_vm6, %v866_v40  ;;  %v5445_v40 = vld [vmem:[#allocation2 + $0x18a] sm:$0xff] }
 0x19d   : > { %1090 = vst.msk [vmem:[#allocation3 + $0x30] sm:$0xff] %vm1086_vm7, %v997_v53  ;;  %1221 = vrot.lane.b32.xlu0 %v5183_v57, %s4265_s28 }
 0x19e   : > { %1352 = vrot.lane.b32.xlu1 %v5215_v3, %s4266_s29  ;;  %1476 = vst.msk [vmem:[#allocation3 + $0x1d8] sm:$0xff] %vm189_vm0, %v5445_v40 }
 0x19f   : > { %v1194_v41 = vpop.permute.xlu0 %1193  ;;  %v1325_v17 = vpop.permute.xlu1 %1324 }
 0x1a0   : > { %1287 = vst.msk [vmem:[#allocation3 + $0x30] sm:$0xff] %vm1283_vm8, %v1194_v41  ;;  %v1483_v58 = vld [vmem:[#allocation3 + $0x20] sm:$0xff]  ;;  %v1502_v41 = vld [vmem:[#allocation3 + $0xb8] sm:$0xff] }
 0x1a1   : > { %1418 = vst.msk [vmem:[#allocation3 + $0x30] sm:$0xff] %vm1414_vm9, %v1325_v17  ;;  %1732 = vmatmul.mubr.f32.gmra.mxu0 %v1483_v58  ;;  %895 = vrot.lane.b32.xlu0 %v4943_v9, %s4263_s20  ;;  %v1488_v9 = vld [vmem:[#allocation3 + $0x48] sm:$0xff] }
 0x1a2   : > { %3908 = vmatprep.mubr.msk.f32.mxu0 %vm189_vm0, %v1486_v62  ;;  %1026 = vrot.lane.b32.xlu1 %v4959_v15, %s4264_s22 }
 0x1a3   : > { %v868_v57 = vpop.permute.xlu0 %867  ;;  %v999_v23 = vpop.permute.xlu1 %998 }
 0x1a4   : > { %960 = vst.msk [vmem:[#allocation3 + $0x40] sm:$0xff] %vm955_vm6, %v868_v57 }
 0x1a5   : > { %1091 = vst.msk [vmem:[#allocation3 + $0x40] sm:$0xff] %vm1086_vm7, %v999_v23  ;;  %1223 = vrot.lane.b32.xlu0 %v5199_v63, %s4265_s28 }
 0x1a6   : > { %1354 = vrot.lane.b32.xlu1 %v5223_v35, %s4266_s29 }
 0x1a7   : > { %v1196_v45 = vpop.permute.xlu0 %1195  ;;  %v1327_v26 = vpop.permute.xlu1 %1326 }
 0x1a8   : > { %1288 = vst.msk [vmem:[#allocation3 + $0x40] sm:$0xff] %vm1283_vm8, %v1196_v45  ;;  %v1485_v1 = vld [vmem:[#allocation3 + $0x30] sm:$0xff] }
 0x1a9   : > { %1419 = vst.msk [vmem:[#allocation3 + $0x40] sm:$0xff] %vm1414_vm9, %v1327_v26  ;;  %1737 = vmatmul.mubr.f32.gmra.mxu0 %v1485_v1  ;;  %897 = vrot.lane.b32.xlu0 %v4945_v11, %s4263_s20  ;;  %v1490_v11 = vld [vmem:[#allocation3 + $0x58] sm:$0xff] }
 0x1aa   : > { %3909 = vmatprep.mubr.msk.f32.mxu0 %vm189_vm0, %v1488_v9  ;;  %1028 = vrot.lane.b32.xlu1 %v4961_v16, %s4264_s22  ;;  %v692_v1 = vld [vmem:[#allocation2 + $0x181] sm:$0xff] }
 0x1ab   : > { %v870_v63 = vpop.permute.xlu0 %869  ;;  %v1001_v2 = vpop.permute.xlu1 %1000 }
 0x1ac   : > { %961 = vst.msk [vmem:[#allocation3 + $0x50] sm:$0xff] %vm955_vm6, %v870_v63 }
 0x1ad   : > { %1092 = vst.msk [vmem:[#allocation3 + $0x50] sm:$0xff] %vm1086_vm7, %v1001_v2  ;;  %1225 = vrot.lane.b32.xlu0 %v5215_v3, %s4265_s28 }
 0x1ae   : > { %1356 = vrot.lane.b32.xlu1 %v5239_v14, %s4266_s29 }
 0x1af   : > { %v1198_v46 = vpop.permute.xlu0 %1197  ;;  %v1329_v27 = vpop.permute.xlu1 %1328 }
 0x1b0   : > { %1289 = vst.msk [vmem:[#allocation3 + $0x50] sm:$0xff] %vm1283_vm8, %v1198_v46  ;;  %v1487_v12 = vld [vmem:[#allocation3 + $0x40] sm:$0xff] }
 0x1b1   : > { %1420 = vst.msk [vmem:[#allocation3 + $0x50] sm:$0xff] %vm1414_vm9, %v1329_v27  ;;  %1742 = vmatmul.mubr.f32.gmra.mxu0 %v1487_v12  ;;  %899 = vrot.lane.b32.xlu0 %v4959_v15, %s4263_s20  ;;  %v1492_v15 = vld [vmem:[#allocation3 + $0x68] sm:$0xff] }
 0x1b2   : > { %3910 = vmatprep.mubr.msk.f32.mxu0 %vm189_vm0, %v1490_v11  ;;  %1030 = vrot.lane.b32.xlu1 %v4979_v25, %s4264_s22  ;;  %v693_v11 = vld [vmem:[#allocation2 + $0x189] sm:$0xff] }
 0x1b3   : > { %v872_v3 = vpop.permute.xlu0 %871  ;;  %v1003_v49 = vpop.permute.xlu1 %1002 }
 0x1b4   : > { %962 = vst.msk [vmem:[#allocation3 + $0x60] sm:$0xff] %vm955_vm6, %v872_v3 }
 0x1b5   : > { %1093 = vst.msk [vmem:[#allocation3 + $0x60] sm:$0xff] %vm1086_vm7, %v1003_v49  ;;  %1227 = vrot.lane.b32.xlu0 %v5223_v35, %s4265_s28 }
 0x1b6   : > { %1358 = vrot.lane.b32.xlu1 %v5241_v28, %s4266_s29 }
 0x1b7   : > { %v1200_v13 = vpop.permute.xlu0 %1199  ;;  %v1331_v20 = vpop.permute.xlu1 %1330 }
 0x1b8   : > { %1290 = vst.msk [vmem:[#allocation3 + $0x60] sm:$0xff] %vm1283_vm8, %v1200_v13  ;;  %v1489_v31 = vld [vmem:[#allocation3 + $0x50] sm:$0xff] }
 0x1b9   : > { %1421 = vst.msk [vmem:[#allocation3 + $0x60] sm:$0xff] %vm1414_vm9, %v1331_v20  ;;  %1747 = vmatmul.mubr.f32.gmra.mxu0 %v1489_v31  ;;  %901 = vrot.lane.b32.xlu0 %v4961_v16, %s4263_s20  ;;  %v1494_v16 = vld [vmem:[#allocation3 + $0x78] sm:$0xff]  ;;  %v694_v13 = vld [vmem:[#allocation2 + $0x199] sm:$0xff] }
 0x1ba   : > { %3911 = vmatprep.mubr.msk.f32.mxu0 %vm189_vm0, %v1492_v15  ;;  %1032 = vrot.lane.b32.xlu1 %v4981_v29, %s4264_s22  ;;  %v1510_v20 = vld [vmem:[#allocation3 + $0xf8] sm:$0xff] }
 0x1bb   : > { %v874_v35 = vpop.permute.xlu0 %873  ;;  %v1005_v33 = vpop.permute.xlu1 %1004 }
 0x1bc   : > { %963 = vst.msk [vmem:[#allocation3 + $0x70] sm:$0xff] %vm955_vm6, %v874_v35 }
 0x1bd   : > { %1094 = vst.msk [vmem:[#allocation3 + $0x70] sm:$0xff] %vm1086_vm7, %v1005_v33  ;;  %1229 = vrot.lane.b32.xlu0 %v5239_v14, %s4265_s28  ;;  %v695_v33 = vld [vmem:[#allocation2 + $0x1a1] sm:$0xff] }
 0x1be   : > { %1360 = vrot.lane.b32.xlu1 %v5243_v44, %s4266_s29 }
 0x1bf   : > { %v1202_v5 = vpop.permute.xlu0 %1201  ;;  %v1333_v54 = vpop.permute.xlu1 %1332 }
 0x1c0   : > { %1291 = vst.msk [vmem:[#allocation3 + $0x70] sm:$0xff] %vm1283_vm8, %v1202_v5  ;;  %v1491_v22 = vld [vmem:[#allocation3 + $0x60] sm:$0xff] }
 0x1c1   : > { %1422 = vst.msk [vmem:[#allocation3 + $0x70] sm:$0xff] %vm1414_vm9, %v1333_v54  ;;  %1752 = vmatmul.mubr.f32.gmra.mxu0 %v1491_v22  ;;  %903 = vrot.lane.b32.xlu0 %v4979_v25, %s4263_s20  ;;  %v1496_v25 = vld [vmem:[#allocation3 + $0x88] sm:$0xff] }
 0x1c2   : > { %3912 = vmatprep.mubr.msk.f32.mxu0 %vm189_vm0, %v1494_v16  ;;  %1034 = vrot.lane.b32.xlu1 %v4995_v38, %s4264_s22 }
 0x1c3   : > { %v876_v14 = vpop.permute.xlu0 %875  ;;  %v1007_v55 = vpop.permute.xlu1 %1006 }
 0x1c4   : > { %964 = vst.msk [vmem:[#allocation3 + $0x80] sm:$0xff] %vm955_vm6, %v876_v14 }
 0x1c5   : > { %1095 = vst.msk [vmem:[#allocation3 + $0x80] sm:$0xff] %vm1086_vm7, %v1007_v55  ;;  %1231 = vrot.lane.b32.xlu0 %v5241_v28, %s4265_s28  ;;  %v1512_v55 = vld [vmem:[#allocation3 + $0x108] sm:$0xff] }
 0x1c6   : > { %1362 = vrot.lane.b32.xlu1 %v5251_v18, %s4266_s29 }
 0x1c7   : > { %v1204_v34 = vpop.permute.xlu0 %1203  ;;  %v1335_v8 = vpop.permute.xlu1 %1334 }
 0x1c8   : > { %1292 = vst.msk [vmem:[#allocation3 + $0x80] sm:$0xff] %vm1283_vm8, %v1204_v34  ;;  %v1493_v6 = vld [vmem:[#allocation3 + $0x70] sm:$0xff] }
 0x1c9   : > { %1423 = vst.msk [vmem:[#allocation3 + $0x80] sm:$0xff] %vm1414_vm9, %v1335_v8  ;;  %1757 = vmatmul.mubr.f32.gmra.mxu0 %v1493_v6  ;;  %905 = vrot.lane.b32.xlu0 %v4981_v29, %s4263_s20  ;;  %v1498_v29 = vld [vmem:[#allocation3 + $0x98] sm:$0xff] }
 0x1ca   : > { %3913 = vmatprep.mubr.msk.f32.mxu0 %vm189_vm0, %v1496_v25  ;;  %1036 = vrot.lane.b32.xlu1 %v4997_v39, %s4264_s22 }
 0x1cb   : > { %v878_v28 = vpop.permute.xlu0 %877  ;;  %v1009_v42 = vpop.permute.xlu1 %1008 }
 0x1cc   : > { %965 = vst.msk [vmem:[#allocation3 + $0x90] sm:$0xff] %vm955_vm6, %v878_v28 }
 0x1cd   : > { %1096 = vst.msk [vmem:[#allocation3 + $0x90] sm:$0xff] %vm1086_vm7, %v1009_v42  ;;  %1233 = vrot.lane.b32.xlu0 %v5243_v44, %s4265_s28 }
 0x1ce   : > { %1364 = vrot.lane.b32.xlu1 %v5253_v50, %s4266_s29 }
 0x1cf   : > { %v1206_v37 = vpop.permute.xlu0 %1205  ;;  %v1337_v43 = vpop.permute.xlu1 %1336 }
 0x1d0   : > { %1293 = vst.msk [vmem:[#allocation3 + $0x90] sm:$0xff] %vm1283_vm8, %v1206_v37  ;;  %v1495_v56 = vld [vmem:[#allocation3 + $0x80] sm:$0xff] }
 0x1d1   : > { %1424 = vst.msk [vmem:[#allocation3 + $0x90] sm:$0xff] %vm1414_vm9, %v1337_v43  ;;  %1762 = vmatmul.mubr.f32.gmra.mxu0 %v1495_v56  ;;  %907 = vrot.lane.b32.xlu0 %v4995_v38, %s4263_s20 }
 0x1d2   : > { %3914 = vmatprep.mubr.msk.f32.mxu0 %vm189_vm0, %v1498_v29  ;;  %1038 = vrot.lane.b32.xlu1 %v5013_v51, %s4264_s22 }
 0x1d3   : > { %v880_v44 = vpop.permute.xlu0 %879  ;;  %v1011_v24 = vpop.permute.xlu1 %1010 }
 0x1d4   : > { %966 = vst.msk [vmem:[#allocation3 + $0xa0] sm:$0xff] %vm955_vm6, %v880_v44 }
 0x1d5   : > { %1097 = vst.msk [vmem:[#allocation3 + $0xa0] sm:$0xff] %vm1086_vm7, %v1011_v24  ;;  %1235 = vrot.lane.b32.xlu0 %v5251_v18, %s4265_s28 }
 0x1d6   : > { %1366 = vrot.lane.b32.xlu1 %v5255_v19, %s4266_s29 }
 0x1d7   : > { %v1208_v38 = vpop.permute.xlu0 %1207  ;;  %v1339_v47 = vpop.permute.xlu1 %1338 }
 0x1d8   : > { %1294 = vst.msk [vmem:[#allocation3 + $0xa0] sm:$0xff] %vm1283_vm8, %v1208_v38  ;;  %v1497_v61 = vld [vmem:[#allocation3 + $0x90] sm:$0xff] }
 0x1d9   : > { %1425 = vst.msk [vmem:[#allocation3 + $0xa0] sm:$0xff] %vm1414_vm9, %v1339_v47  ;;  %1767 = vmatmul.mubr.f32.gmra.mxu0 %v1497_v61  ;;  %909 = vrot.lane.b32.xlu0 %v4997_v39, %s4263_s20  ;;  %v1516_v61 = vld [vmem:[#allocation3 + $0x128] sm:$0xff] }
 0x1da   : > { %3915 = vmatprep.mubr.msk.f32.mxu0 %vm189_vm0, %v1500_v10  ;;  %1040 = vrot.lane.b32.xlu1 %v5015_v52, %s4264_s22 }
 0x1db   : > { %v882_v18 = vpop.permute.xlu0 %881  ;;  %v1013_v48 = vpop.permute.xlu1 %1012 }
 0x1dc   : > { %967 = vst.msk [vmem:[#allocation3 + $0xb0] sm:$0xff] %vm955_vm6, %v882_v18 }
 0x1dd   : > { %1098 = vst.msk [vmem:[#allocation3 + $0xb0] sm:$0xff] %vm1086_vm7, %v1013_v48  ;;  %1237 = vrot.lane.b32.xlu0 %v5253_v50, %s4265_s28 }
 0x1de   : > { %1368 = vrot.lane.b32.xlu1 %v5263_v21, %s4266_s29 }
 0x1df   : > { %v1210_v39 = vpop.permute.xlu0 %1209  ;;  %v1341_v53 = vpop.permute.xlu1 %1340 }
 0x1e0   : > { %1295 = vst.msk [vmem:[#allocation3 + $0xb0] sm:$0xff] %vm1283_vm8, %v1210_v39  ;;  %v1499_v17 = vld [vmem:[#allocation3 + $0xa0] sm:$0xff]  ;;  %v1518_v39 = vld [vmem:[#allocation3 + $0x138] sm:$0xff] }
 0x1e1   : > { %1426 = vst.msk [vmem:[#allocation3 + $0xb0] sm:$0xff] %vm1414_vm9, %v1341_v53  ;;  %1772 = vmatmul.mubr.f32.gmra.mxu0 %v1499_v17  ;;  %911 = vrot.lane.b32.xlu0 %v5013_v51, %s4263_s20  ;;  %v1504_v51 = vld [vmem:[#allocation3 + $0xc8] sm:$0xff] }
 0x1e2   : > { %3916 = vmatprep.mubr.msk.f32.mxu0 %vm189_vm0, %v1502_v41  ;;  %1042 = vrot.lane.b32.xlu1 %v5027_v59, %s4264_s22 }
 0x1e3   : > { %v884_v50 = vpop.permute.xlu0 %883  ;;  %v1015_v62 = vpop.permute.xlu1 %1014 }
 0x1e4   : > { %968 = vst.msk [vmem:[#allocation3 + $0xc0] sm:$0xff] %vm955_vm6, %v884_v50 }
 0x1e5   : > { %1099 = vst.msk [vmem:[#allocation3 + $0xc0] sm:$0xff] %vm1086_vm7, %v1015_v62  ;;  %1239 = vrot.lane.b32.xlu0 %v5255_v19, %s4265_s28 }
 0x1e6   : > { %1370 = vrot.lane.b32.xlu1 %v5265_v4, %s4266_s29 }
 0x1e7   : > { %v1212_v58 = vpop.permute.xlu0 %1211  ;;  %v1343_v57 = vpop.permute.xlu1 %1342 }
 0x1e8   : > { %1296 = vst.msk [vmem:[#allocation3 + $0xc0] sm:$0xff] %vm1283_vm8, %v1212_v58  ;;  %v1501_v23 = vld [vmem:[#allocation3 + $0xb0] sm:$0xff] }
 0x1e9   : > { %1427 = vst.msk [vmem:[#allocation3 + $0xc0] sm:$0xff] %vm1414_vm9, %v1343_v57  ;;  %1777 = vmatmul.mubr.f32.gmra.mxu0 %v1501_v23  ;;  %913 = vrot.lane.b32.xlu0 %v5015_v52, %s4263_s20  ;;  %v1506_v52 = vld [vmem:[#allocation3 + $0xd8] sm:$0xff] }
 0x1ea   : > { %3917 = vmatprep.mubr.msk.f32.mxu0 %vm189_vm0, %v1504_v51  ;;  %1044 = vrot.lane.b32.xlu1 %v5029_v60, %s4264_s22  ;;  %v1520_v51 = vld [vmem:[#allocation3 + $0x148] sm:$0xff] }
 0x1eb   : > { %v886_v19 = vpop.permute.xlu0 %885  ;;  %v1017_v45 = vpop.permute.xlu1 %1016 }
 0x1ec   : > { %969 = vst.msk [vmem:[#allocation3 + $0xd0] sm:$0xff] %vm955_vm6, %v886_v19 }
 0x1ed   : > { %1100 = vst.msk [vmem:[#allocation3 + $0xd0] sm:$0xff] %vm1086_vm7, %v1017_v45  ;;  %1241 = vrot.lane.b32.xlu0 %v5263_v21, %s4265_s28 }
 0x1ee   : > { %1372 = vrot.lane.b32.xlu1 %v5267_v30, %s4266_s29 }
 0x1ef   : > { %v1214_v26 = vpop.permute.xlu0 %1213  ;;  %v1345_v9 = vpop.permute.xlu1 %1344 }
 0x1f0   : > { %1297 = vst.msk [vmem:[#allocation3 + $0xd0] sm:$0xff] %vm1283_vm8, %v1214_v26  ;;  %v1503_v63 = vld [vmem:[#allocation3 + $0xc0] sm:$0xff]  ;;  %v1522_v26 = vld [vmem:[#allocation3 + $0x158] sm:$0xff] }
 0x1f1   : > { %1428 = vst.msk [vmem:[#allocation3 + $0xd0] sm:$0xff] %vm1414_vm9, %v1345_v9  ;;  %1782 = vmatmul.mubr.f32.gmra.mxu0 %v1503_v63  ;;  %915 = vrot.lane.b32.xlu0 %v5027_v59, %s4263_s20  ;;  %v1508_v59 = vld [vmem:[#allocation3 + $0xe8] sm:$0xff] }
 0x1f2   : > { %3918 = vmatprep.mubr.msk.f32.mxu0 %vm189_vm0, %v1506_v52  ;;  %1046 = vrot.lane.b32.xlu1 %v692_v1, %s4264_s22 }
 0x1f3   : > { %v888_v21 = vpop.permute.xlu0 %887  ;;  %v1019_v2 = vpop.permute.xlu1 %1018 }
 0x1f4   : > { %970 = vst.msk [vmem:[#allocation3 + $0xe0] sm:$0xff] %vm955_vm6, %v888_v21 }
 0x1f5   : > { %1243 = vrot.lane.b32.xlu0 %v5265_v4, %s4265_s28  ;;  %1101 = vst.msk [vmem:[#allocation3 + $0xe0] sm:$0xff] %vm1086_vm7, %v1019_v2 }
 0x1f6   : > { %1374 = vrot.lane.b32.xlu1 %v5277_v32, %s4266_s29 }
 0x1f7   : > { %v1216_v46 = vpop.permute.xlu0 %1215  ;;  %v1347_v27 = vpop.permute.xlu1 %1346 }
 0x1f8   : > { %v1505_v12 = vld [vmem:[#allocation3 + $0xd0] sm:$0xff]  ;;  %1298 = vst.msk [vmem:[#allocation3 + $0xe0] sm:$0xff] %vm1283_vm8, %v1216_v46 }
 0x1f9   : > { %1787 = vmatmul.mubr.f32.gmra.mxu0 %v1505_v12  ;;  %917 = vrot.lane.b32.xlu0 %v5029_v60, %s4263_s20  ;;  %1429 = vst.msk [vmem:[#allocation3 + $0xe0] sm:$0xff] %vm1414_vm9, %v1347_v27  ;;  %v1524_v27 = vld [vmem:[#allocation3 + $0x168] sm:$0xff] }
 0x1fa   : > { %1048 = vrot.lane.b32.xlu1 %v693_v11, %s4264_s22  ;;  %3919 = vmatprep.mubr.msk.f32.mxu0 %vm189_vm0, %v1508_v59  ;;  %v2010_v59 = vld [vmem:[#allocation2] sm:$0xff] }
 0x1fb   : > { %v890_v4 = vpop.permute.xlu0 %889  ;;  %v1021_v3 = vpop.permute.xlu1 %1020  ;;  %2046 = vst.msk [vmem:[#allocation3] sm:$0xff] %vm189_vm0, %v2010_v59 }
 0x1fc   : > { %971 = vst.msk [vmem:[#allocation3 + $0xf0] sm:$0xff] %vm955_vm6, %v890_v4 }
 0x1fd   : > { %1245 = vrot.lane.b32.xlu0 %v5267_v30, %s4265_s28  ;;  %1102 = vst.msk [vmem:[#allocation3 + $0xf0] sm:$0xff] %vm1086_vm7, %v1021_v3 }
 0x1fe   : > { %1376 = vrot.lane.b32.xlu1 %v5292_v36, %s4266_s29 }
 0x1ff   : > { %v1218_v49 = vpop.permute.xlu0 %1217  ;;  %v1349_v60 = vpop.permute.xlu1 %1348 }
 0x200   : > { %1299 = vst.msk [vmem:[#allocation3 + $0xf0] sm:$0xff] %vm1283_vm8, %v1218_v49  ;;  %v1507_v15 = vld [vmem:[#allocation3 + $0xe0] sm:$0xff]  ;;  %v1526_v49 = vld [vmem:[#allocation3 + $0x178] sm:$0xff] }
 0x201   : > { %919 = vrot.lane.b32.xlu0 %v692_v1, %s4263_s20  ;;  %1430 = vst.msk [vmem:[#allocation3 + $0xf0] sm:$0xff] %vm1414_vm9, %v1349_v60  ;;  %1792 = vmatmul.mubr.f32.gmra.mxu0 %v1507_v15 }
 0x202   : > { %1050 = vrot.lane.b32.xlu1 %v694_v13, %s4264_s22  ;;  %3920 = vmatprep.mubr.msk.f32.mxu0 %vm189_vm0, %v1510_v20 }
 0x203   : > { %v892_v30 = vpop.permute.xlu0 %891 }
 0x204   : > { %972 = vst.msk [vmem:[#allocation3 + $0x100] sm:$0xff] %vm955_vm6, %v892_v30  ;;  %v1023_v31 = vpop.permute.xlu1 %1022 }
 0x205   : > { %1247 = vrot.lane.b32.xlu0 %v5277_v32, %s4265_s28  ;;  %1103 = vst.msk [vmem:[#allocation3 + $0x100] sm:$0xff] %vm1086_vm7, %v1023_v31 }
 0x206   : > { %1378 = vrot.lane.b32.xlu1 %v5428_v7, %s4266_s29 }
 0x207   : > { %v1220_v35 = vpop.permute.xlu0 %1219 }
 0x208   : > { %1300 = vst.msk [vmem:[#allocation3 + $0x100] sm:$0xff] %vm1283_vm8, %v1220_v35  ;;  %v1351_v5 = vpop.permute.xlu1 %1350  ;;  %v1509_v54 = vld [vmem:[#allocation3 + $0xf0] sm:$0xff]  ;;  %v2011_v35 = vld [vmem:[#allocation2 + $0x8] sm:$0xff] }
 0x209   : > { %921 = vrot.lane.b32.xlu0 %v693_v11, %s4263_s20  ;;  %1431 = vst.msk [vmem:[#allocation3 + $0x100] sm:$0xff] %vm1414_vm9, %v1351_v5  ;;  %1797 = vmatmul.mubr.f32.gmra.mxu0 %v1509_v54 }
 0x20a   : > { %1052 = vrot.lane.b32.xlu1 %v695_v33, %s4264_s22  ;;  %3921 = vmatprep.mubr.msk.f32.mxu0 %vm189_vm0, %v1512_v55  ;;  %2047 = vst.msk [vmem:[#allocation3 + $0x10] sm:$0xff] %vm189_vm0, %v2011_v35 }
 0x20b   : > { %v894_v16 = vpop.permute.xlu0 %893 }
 0x20c   : > { %973 = vst.msk [vmem:[#allocation3 + $0x110] sm:$0xff] %vm955_vm6, %v894_v16  ;;  %v1025_v32 = vpop.permute.xlu1 %1024 }
 0x20d   : > { %1249 = vrot.lane.b32.xlu0 %v5292_v36, %s4265_s28  ;;  %1104 = vst.msk [vmem:[#allocation3 + $0x110] sm:$0xff] %vm1086_vm7, %v1025_v32  ;;  %v1514_v36 = vld [vmem:[#allocation3 + $0x118] sm:$0xff] }
 0x20e   : > { %1380 = vrot.lane.b32.xlu1 %v5445_v40, %s4266_s29 }
 0x20f   : > { %v1222_v22 = vpop.permute.xlu0 %1221 }
 0x210   : > { %1301 = vst.msk [vmem:[#allocation3 + $0x110] sm:$0xff] %vm1283_vm8, %v1222_v22  ;;  %v1353_v14 = vpop.permute.xlu1 %1352  ;;  %v1511_v8 = vld [vmem:[#allocation3 + $0x100] sm:$0xff] }
 0x211   : > { %1432 = vst.msk [vmem:[#allocation3 + $0x110] sm:$0xff] %vm1414_vm9, %v1353_v14  ;;  %1802 = vmatmul.mubr.f32.gmra.mxu0 %v1511_v8  ;;  %v1528_v8 = vld [vmem:[#allocation3 + $0x188] sm:$0xff] }
 0x212   : > { %3922 = vmatprep.mubr.msk.f32.mxu0 %vm189_vm0, %v1514_v36 }
 0x213   : > { %v896_v34 = vpop.permute.xlu0 %895 }
 0x214   : > { %974 = vst.msk [vmem:[#allocation3 + $0x120] sm:$0xff] %vm955_vm6, %v896_v34  ;;  %v1027_v25 = vpop.permute.xlu1 %1026 }
 0x215   : > { %1105 = vst.msk [vmem:[#allocation3 + $0x120] sm:$0xff] %vm1086_vm7, %v1027_v25 }
 0x217   : > { %v1224_v6 = vpop.permute.xlu0 %1223 }
 0x218   : > { %1302 = vst.msk [vmem:[#allocation3 + $0x120] sm:$0xff] %vm1283_vm8, %v1224_v6  ;;  %v1355_v28 = vpop.permute.xlu1 %1354  ;;  %v1513_v42 = vld [vmem:[#allocation3 + $0x110] sm:$0xff] }
 0x219   : > { %1433 = vst.msk [vmem:[#allocation3 + $0x120] sm:$0xff] %vm1414_vm9, %v1355_v28  ;;  %1807 = vmatmul.mubr.f32.gmra.mxu0 %v1513_v42  ;;  %v1530_v42 = vld [vmem:[#allocation3 + $0x198] sm:$0xff] }
 0x21a   : > { %3923 = vmatprep.mubr.msk.f32.mxu0 %vm189_vm0, %v1516_v61 }
 0x21b   : > { %v898_v37 = vpop.permute.xlu0 %897 }
 0x21c   : > { %975 = vst.msk [vmem:[#allocation3 + $0x130] sm:$0xff] %vm955_vm6, %v898_v37  ;;  %v1029_v43 = vpop.permute.xlu1 %1028 }
 0x21d   : > { %1106 = vst.msk [vmem:[#allocation3 + $0x130] sm:$0xff] %vm1086_vm7, %v1029_v43 }
 0x21f   : > { %v1226_v29 = vpop.permute.xlu0 %1225 }
 0x220   : > { %1303 = vst.msk [vmem:[#allocation3 + $0x130] sm:$0xff] %vm1283_vm8, %v1226_v29  ;;  %v1357_v56 = vpop.permute.xlu1 %1356  ;;  %v1515_v18 = vld [vmem:[#allocation3 + $0x120] sm:$0xff] }
 0x221   : > { %1434 = vst.msk [vmem:[#allocation3 + $0x130] sm:$0xff] %vm1414_vm9, %v1357_v56  ;;  %1812 = vmatmul.mubr.f32.gmra.mxu0 %v1515_v18 }
 0x222   : > { %3924 = vmatprep.mubr.msk.f32.mxu0 %vm189_vm0, %v1518_v39 }
 0x223   : > { %v900_v44 = vpop.permute.xlu0 %899 }
 0x224   : > { %976 = vst.msk [vmem:[#allocation3 + $0x140] sm:$0xff] %vm955_vm6, %v900_v44  ;;  %v1031_v24 = vpop.permute.xlu1 %1030 }
 0x225   : > { %1107 = vst.msk [vmem:[#allocation3 + $0x140] sm:$0xff] %vm1086_vm7, %v1031_v24 }
 0x227   : > { %v1228_v7 = vpop.permute.xlu0 %1227 }
 0x228   : > { %1304 = vst.msk [vmem:[#allocation3 + $0x140] sm:$0xff] %vm1283_vm8, %v1228_v7  ;;  %v1359_v38 = vpop.permute.xlu1 %1358  ;;  %v1517_v53 = vld [vmem:[#allocation3 + $0x130] sm:$0xff] }
 0x229   : > { %1435 = vst.msk [vmem:[#allocation3 + $0x140] sm:$0xff] %vm1414_vm9, %v1359_v38  ;;  %1817 = vmatmul.mubr.f32.gmra.mxu0 %v1517_v53 }
 0x22a   : > { %3925 = vmatprep.mubr.msk.f32.mxu0 %vm189_vm0, %v1520_v51 }
 0x22b   : > { %v902_v47 = vpop.permute.xlu0 %901 }
 0x22c   : > { %977 = vst.msk [vmem:[#allocation3 + $0x150] sm:$0xff] %vm955_vm6, %v902_v47  ;;  %v1033_v10 = vpop.permute.xlu1 %1032 }
 0x22d   : > { %1108 = vst.msk [vmem:[#allocation3 + $0x150] sm:$0xff] %vm1086_vm7, %v1033_v10 }
 0x22f   : > { %v1230_v48 = vpop.permute.xlu0 %1229 }
 0x230   : > { %1305 = vst.msk [vmem:[#allocation3 + $0x150] sm:$0xff] %vm1283_vm8, %v1230_v48  ;;  %v1361_v40 = vpop.permute.xlu1 %1360  ;;  %v1519_v23 = vld [vmem:[#allocation3 + $0x140] sm:$0xff] }
 0x231   : > { %1436 = vst.msk [vmem:[#allocation3 + $0x150] sm:$0xff] %vm1414_vm9, %v1361_v40  ;;  %1822 = vmatmul.mubr.f32.gmra.mxu0 %v1519_v23 }
 0x232   : > { %3926 = vmatprep.mubr.msk.f32.mxu0 %vm189_vm0, %v1522_v26 }
 0x233   : > { %v904_v41 = vpop.permute.xlu0 %903 }
 0x234   : > { %978 = vst.msk [vmem:[#allocation3 + $0x160] sm:$0xff] %vm955_vm6, %v904_v41  ;;  %v1035_v17 = vpop.permute.xlu1 %1034  ;;  %v1532_v41 = vld [vmem:[#allocation3 + $0x1a8] sm:$0xff] }
 0x235   : > { %1109 = vst.msk [vmem:[#allocation3 + $0x160] sm:$0xff] %vm1086_vm7, %v1035_v17 }
 0x237   : > { %v1232_v50 = vpop.permute.xlu0 %1231 }
 0x238   : > { %1306 = vst.msk [vmem:[#allocation3 + $0x160] sm:$0xff] %vm1283_vm8, %v1232_v50  ;;  %v1363_v62 = vpop.permute.xlu1 %1362  ;;  %v1521_v9 = vld [vmem:[#allocation3 + $0x150] sm:$0xff] }
 0x239   : > { %1437 = vst.msk [vmem:[#allocation3 + $0x160] sm:$0xff] %vm1414_vm9, %v1363_v62  ;;  %1827 = vmatmul.mubr.f32.gmra.mxu0 %v1521_v9 }
 0x23a   : > { %3927 = vmatprep.mubr.msk.f32.mxu0 %vm189_vm0, %v1524_v27 }
 0x23b   : > { %v906_v58 = vpop.permute.xlu0 %905 }
 0x23c   : > { %979 = vst.msk [vmem:[#allocation3 + $0x170] sm:$0xff] %vm955_vm6, %v906_v58  ;;  %v1037_v57 = vpop.permute.xlu1 %1036 }
 0x23d   : > { %1110 = vst.msk [vmem:[#allocation3 + $0x170] sm:$0xff] %vm1086_vm7, %v1037_v57  ;;  %v1534_v57 = vld [vmem:[#allocation3 + $0x1b8] sm:$0xff] }
 0x23f   : > { %v1234_v19 = vpop.permute.xlu0 %1233 }
 0x240   : > { %1307 = vst.msk [vmem:[#allocation3 + $0x170] sm:$0xff] %vm1283_vm8, %v1234_v19  ;;  %v1365_v45 = vpop.permute.xlu1 %1364  ;;  %v1523_v11 = vld [vmem:[#allocation3 + $0x160] sm:$0xff] }
 0x241   : > { %1438 = vst.msk [vmem:[#allocation3 + $0x170] sm:$0xff] %vm1414_vm9, %v1365_v45  ;;  %1832 = vmatmul.mubr.f32.gmra.mxu0 %v1523_v11 }
 0x242   : > { %3928 = vmatprep.mubr.msk.f32.mxu0 %vm189_vm0, %v1526_v49 }
 0x243   : > { %v908_v52 = vpop.permute.xlu0 %907 }
 0x244   : > { %980 = vst.msk [vmem:[#allocation3 + $0x180] sm:$0xff] %vm955_vm6, %v908_v52  ;;  %v1039_v1 = vpop.permute.xlu1 %1038 }
 0x245   : > { %1111 = vst.msk [vmem:[#allocation3 + $0x180] sm:$0xff] %vm1086_vm7, %v1039_v1 }
 0x247   : > { %v1236_v63 = vpop.permute.xlu0 %1235 }
 0x248   : > { %1308 = vst.msk [vmem:[#allocation3 + $0x180] sm:$0xff] %vm1283_vm8, %v1236_v63  ;;  %v1367_v21 = vpop.permute.xlu1 %1366  ;;  %v1525_v60 = vld [vmem:[#allocation3 + $0x170] sm:$0xff] }
 0x249   : > { %1439 = vst.msk [vmem:[#allocation3 + $0x180] sm:$0xff] %vm1414_vm9, %v1367_v21  ;;  %1837 = vmatmul.mubr.f32.gmra.mxu0 %v1525_v60  ;;  %v1536_v60 = vld [vmem:[#allocation3 + $0x1c8] sm:$0xff] }
 0x24a   : > { %3929 = vmatprep.mubr.msk.f32.mxu0 %vm189_vm0, %v1528_v8  ;;  %v1154_v8 = vld [vmem:[#allocation2 + $0x1a2] sm:$0xff] }
 0x24b   : > { %v910_v2 = vpop.permute.xlu0 %909  ;;  %1478 = vst.msk [vmem:[#allocation3 + $0x1f8] sm:$0xff] %vm189_vm0, %v1154_v8 }
 0x24c   : > { %981 = vst.msk [vmem:[#allocation3 + $0x190] sm:$0xff] %vm955_vm6, %v910_v2  ;;  %v1041_v46 = vpop.permute.xlu1 %1040 }
 0x24d   : > { %1112 = vst.msk [vmem:[#allocation3 + $0x190] sm:$0xff] %vm1086_vm7, %v1041_v46 }
 0x24f   : > { %v1238_v12 = vpop.permute.xlu0 %1237 }
 0x250   : > { %1309 = vst.msk [vmem:[#allocation3 + $0x190] sm:$0xff] %vm1283_vm8, %v1238_v12  ;;  %v1369_v4 = vpop.permute.xlu1 %1368  ;;  %v1527_v25 = vld [vmem:[#allocation3 + $0x180] sm:$0xff] }
 0x251   : > { %v1723_v3 = vpop.f32.mrf.mxu0  ;;  %1440 = vst.msk [vmem:[#allocation3 + $0x190] sm:$0xff] %vm1414_vm9, %v1369_v4  ;;  %1842 = vmatmul.mubr.f32.gmra.mxu0 %v1527_v25 }
 0x252   : > { %vm1882_vm10 = vcmp.ge.f32.partialorder %v1723_v3, 0.0  ;;  %v1914_v13 = vmul.f32 0.01, %v1723_v3  ;;  %3930 = vmatprep.mubr.msk.f32.mxu0 %vm189_vm0, %v1530_v42 }
 0x253   : > { %v1725_v20 = vpop.f32.mrf.mxu0  ;;  %v912_v15 = vpop.permute.xlu0 %911 }
 0x254   : > { %v1946_v30 = vsel %vm1882_vm10, %v1723_v3, %v1914_v13  ;;  %982 = vst.msk [vmem:[#allocation3 + $0x1a0] sm:$0xff] %vm955_vm6, %v912_v15  ;;  %v1043_v31 = vpop.permute.xlu1 %1042 }
 0x255   : > { %1978 = vst.msk [vmem:[#allocation2 + $0x19] sm:$0xff] %vm189_vm0, %v1946_v30 }
 0x256   : > { %1113 = vst.msk [vmem:[#allocation3 + $0x1a0] sm:$0xff] %vm1086_vm7, %v1043_v31  ;;  %v1538_v31 = vld [vmem:[#allocation3 + $0x1d8] sm:$0xff] }
 0x257   : > { %v1240_v33 = vpop.permute.xlu0 %1239 }
 0x258   : > { %1310 = vst.msk [vmem:[#allocation3 + $0x1a0] sm:$0xff] %vm1283_vm8, %v1240_v33  ;;  %v1371_v5 = vpop.permute.xlu1 %1370  ;;  %v1529_v37 = vld [vmem:[#allocation3 + $0x190] sm:$0xff] }
 0x259   : > { %v1728_v54 = vpop.f32.mrf.mxu0  ;;  %1441 = vst.msk [vmem:[#allocation3 + $0x1a0] sm:$0xff] %vm1414_vm9, %v1371_v5  ;;  %1847 = vmatmul.mubr.f32.gmra.mxu0 %v1529_v37 }
 0x25a   : > { %vm1883_vm11 = vcmp.ge.f32.partialorder %v1728_v54, 0.0  ;;  %v1915_v16 = vmul.f32 0.01, %v1728_v54  ;;  %3931 = vmatprep.mubr.msk.f32.mxu0 %vm189_vm0, %v1532_v41  ;;  %v3261_v41 = vld [vmem:[%s6804_s2 + $0x78] sm:$0xff] }
 0x25b   : > { %v1730_v32 = vpop.f32.mrf.mxu0  ;;  %v914_v22 = vpop.permute.xlu0 %913  ;;  %3361 = vmatpush1.msra.mxu1 %v3261_v41 }
 0x25c   : > { %v1947_v14 = vsel %vm1883_vm11, %v1728_v54, %v1915_v16  ;;  %v2012_v55 = vld [vmem:[#allocation2 + $0x18] sm:$0xff]  ;;  %983 = vst.msk [vmem:[#allocation3 + $0x1b0] sm:$0xff] %vm955_vm6, %v914_v22  ;;  %v1045_v34 = vpop.permute.xlu1 %1044  ;;  %3362 = vmatprep.subr.mxu1 %v4259_v0 }
 0x25d   : > { %1979 = vst.msk [vmem:[#allocation2 + $0x21] sm:$0xff] %vm189_vm0, %v1947_v14  ;;  %2110 = vrot.lane.b32.xlu0 %v2012_v55, %s4260_s23  ;;  %2048 = vst.msk [vmem:[#allocation3 + $0x20] sm:$0xff] %vm189_vm0, %v2012_v55  ;;  %v1153_v14 = vld [vmem:[#allocation2 + $0x19a] sm:$0xff] }
 0x25e   : > { %1114 = vst.msk [vmem:[#allocation3 + $0x1b0] sm:$0xff] %vm1086_vm7, %v1045_v34 }
 0x25f   : > { %v1242_v36 = vpop.permute.xlu0 %1241  ;;  %1477 = vst.msk [vmem:[#allocation3 + $0x1e8] sm:$0xff] %vm189_vm0, %v1153_v14 }
 0x260   : > { %1311 = vst.msk [vmem:[#allocation3 + $0x1b0] sm:$0xff] %vm1283_vm8, %v1242_v36  ;;  %v1373_v6 = vpop.permute.xlu1 %1372  ;;  %v1531_v17 = vld [vmem:[#allocation3 + $0x1a0] sm:$0xff] }
 0x261   : > { %v1733_v28 = vpop.f32.mrf.mxu0  ;;  %1442 = vst.msk [vmem:[#allocation3 + $0x1b0] sm:$0xff] %vm1414_vm9, %v1373_v6  ;;  %1852 = vmatmul.mubr.f32.gmra.mxu0 %v1531_v17 }
 0x262   : > { %vm1884_vm12 = vcmp.ge.f32.partialorder %v1733_v28, 0.0  ;;  %v1916_v43 = vmul.f32 0.01, %v1733_v28  ;;  %3932 = vmatprep.mubr.msk.f32.mxu0 %vm189_vm0, %v1534_v57 }
 0x263   : > { %v1735_v29 = vpop.f32.mrf.mxu0  ;;  %v916_v56 = vpop.permute.xlu0 %915 }
 0x264   : > { %v1948_v44 = vsel %vm1884_vm12, %v1733_v28, %v1916_v43  ;;  %v2013_v24 = vld [vmem:[#allocation2 + $0x20] sm:$0xff]  ;;  %984 = vst.msk [vmem:[#allocation3 + $0x1c0] sm:$0xff] %vm955_vm6, %v916_v56  ;;  %v1047_v7 = vpop.permute.xlu1 %1046  ;;  %v1542_v56 = vld [vmem:[#allocation3 + $0x1f8] sm:$0xff] }
 0x265   : > { %1980 = vst.msk [vmem:[#allocation2 + $0x31] sm:$0xff] %vm189_vm0, %v1948_v44  ;;  %2112 = vrot.lane.b32.xlu1 %v2013_v24, %s4260_s23  ;;  %2049 = vst.msk [vmem:[#allocation3 + $0x30] sm:$0xff] %vm189_vm0, %v2013_v24  ;;  %v2371_v41 = vld [vmem:[#allocation2 + $0x21] sm:$0xff] }
 0x266   : > { %1115 = vst.msk [vmem:[#allocation3 + $0x1c0] sm:$0xff] %vm1086_vm7, %v1047_v7  ;;  %v1540_v42 = vld [vmem:[#allocation3 + $0x1e8] sm:$0xff] }
 0x267   : > { %v1244_v38 = vpop.permute.xlu0 %1243  ;;  %3180 = vst.msk [vmem:[#allocation3 + $0x1e8] sm:$0xff] %vm189_vm0, %v1153_v14  ;;  %3181 = vst.msk [vmem:[#allocation3 + $0x1f8] sm:$0xff] %vm189_vm0, %v1154_v8  ;;  %v2370_v8 = vld [vmem:[#allocation2 + $0x19] sm:$0xff] }
 0x268   : > { %1312 = vst.msk [vmem:[#allocation3 + $0x1c0] sm:$0xff] %vm1283_vm8, %v1244_v38  ;;  %v1375_v47 = vpop.permute.xlu1 %1374  ;;  %v1533_v51 = vld [vmem:[#allocation3 + $0x1b0] sm:$0xff] }
 0x269   : > { %v1738_v10 = vpop.f32.mrf.mxu0  ;;  %1443 = vst.msk [vmem:[#allocation3 + $0x1c0] sm:$0xff] %vm1414_vm9, %v1375_v47  ;;  %1857 = vmatmul.mubr.f32.gmra.mxu0 %v1533_v51  ;;  %v3260_v51 = vld [vmem:[%s6804_s2 + $0x70] sm:$0xff] }
 0x26a   : > { %vm1885_vm13 = vcmp.ge.f32.partialorder %v1738_v10, 0.0  ;;  %v1917_v61 = vmul.f32 0.01, %v1738_v10  ;;  %3933 = vmatprep.mubr.msk.f32.mxu0 %vm189_vm0, %v1536_v60  ;;  %3363 = vmatpush1.msra.mxu1 %v3260_v51 }
 0x26b   : > { %v1740_v18 = vpop.f32.mrf.mxu0  ;;  %v918_v48 = vpop.permute.xlu0 %917  ;;  %3364 = vmatprep.subr.mxu1 %v4259_v0 }
 0x26c   : > { %v1949_v40 = vsel %vm1885_vm13, %v1738_v10, %v1917_v61  ;;  %v5587_v39 = vld [vmem:[#allocation2 + $0x30] sm:$0xff]  ;;  %985 = vst.msk [vmem:[#allocation3 + $0x1d0] sm:$0xff] %vm955_vm6, %v918_v48  ;;  %v1049_v53 = vpop.permute.xlu1 %1048 }
 0x26d   : > { %1981 = vst.msk [vmem:[#allocation2 + $0x39] sm:$0xff] %vm189_vm0, %v1949_v40  ;;  %2114 = vrot.lane.b32.xlu0 %v5587_v39, %s4260_s23  ;;  %2050 = vst.msk [vmem:[#allocation3 + $0x40] sm:$0xff] %vm189_vm0, %v5587_v39 }
 0x26e   : > { %1116 = vst.msk [vmem:[#allocation3 + $0x1d0] sm:$0xff] %vm1086_vm7, %v1049_v53 }
 0x26f   : > { %v1246_v50 = vpop.permute.xlu0 %1245 }
 0x270   : > { %1313 = vst.msk [vmem:[#allocation3 + $0x1d0] sm:$0xff] %vm1283_vm8, %v1246_v50  ;;  %v1377_v62 = vpop.permute.xlu1 %1376  ;;  %v1535_v13 = vld [vmem:[#allocation3 + $0x1c0] sm:$0xff] }
 0x271   : > { %v1743_v58 = vpop.f32.mrf.mxu0  ;;  %1444 = vst.msk [vmem:[#allocation3 + $0x1d0] sm:$0xff] %vm1414_vm9, %v1377_v62  ;;  %1862 = vmatmul.mubr.f32.gmra.mxu0 %v1535_v13 }
 0x272   : > { %vm1886_vm14 = vcmp.ge.f32.partialorder %v1743_v58, 0.0  ;;  %v1918_v23 = vmul.f32 0.01, %v1743_v58  ;;  %3934 = vmatprep.mubr.msk.f32.mxu0 %vm189_vm0, %v1538_v31  ;;  %v3252_v31 = vld [vmem:[%s6804_s2 + $0x30] sm:$0xff] }
 0x273   : > { %v1745_v19 = vpop.f32.mrf.mxu0  ;;  %v920_v45 = vpop.permute.xlu0 %919 }
 0x274   : > { %v1950_v26 = vsel %vm1886_vm14, %v1743_v58, %v1918_v23  ;;  %v5600_v9 = vld [vmem:[#allocation2 + $0x38] sm:$0xff]  ;;  %986 = vst.msk [vmem:[#allocation3 + $0x1e0] sm:$0xff] %vm955_vm6, %v920_v45  ;;  %v1051_v1 = vpop.permute.xlu1 %1050  ;;  %v3259_v19 = vld [vmem:[%s6804_s2 + $0x68] sm:$0xff] }
 0x275   : > { %v5602_v52 = vld [vmem:[#allocation2 + $0x32] sm:$0xff]  ;;  %1982 = vst.msk [vmem:[#allocation2 + $0x49] sm:$0xff] %vm189_vm0, %v1950_v26  ;;  %2116 = vrot.lane.b32.xlu1 %v5600_v9, %s4260_s23  ;;  %2051 = vst.msk [vmem:[#allocation3 + $0x50] sm:$0xff] %vm189_vm0, %v5600_v9  ;;  %v5613_v63 = vld [vmem:[#allocation2 + $0x3a] sm:$0xff]  ;;  %3365 = vmatpush1.msra.mxu1 %v3259_v19 }
 0x276   : > { %3150 = vst.msk [vmem:[#allocation3 + $0x8] sm:$0xff] %vm189_vm0, %v5602_v52  ;;  %3151 = vst.msk [vmem:[#allocation3 + $0x18] sm:$0xff] %vm189_vm0, %v5613_v63  ;;  %v3258_v26 = vld [vmem:[%s6804_s2 + $0x60] sm:$0xff]  ;;  %3366 = vmatprep.subr.mxu1 %v4259_v0 }
 0x277   : > { %1117 = vst.msk [vmem:[#allocation3 + $0x1e0] sm:$0xff] %vm1086_vm7, %v1051_v1  ;;  %v1248_v21 = vpop.permute.xlu0 %1247  ;;  %3367 = vmatpush1.msra.mxu1 %v3258_v26  ;;  %v2826_v19 = vld [vmem:[#allocation2 + $0x1a] sm:$0xff] }
 0x278   : > { %1314 = vst.msk [vmem:[#allocation3 + $0x1e0] sm:$0xff] %vm1283_vm8, %v1248_v21  ;;  %v1379_v2 = vpop.permute.xlu1 %1378  ;;  %v1537_v35 = vld [vmem:[#allocation3 + $0x1d0] sm:$0xff]  ;;  %3368 = vmatprep.subr.mxu1 %v4259_v0 }
 0x279   : > { %v1748_v46 = vpop.f32.mrf.mxu0  ;;  %1445 = vst.msk [vmem:[#allocation3 + $0x1e0] sm:$0xff] %vm1414_vm9, %v1379_v2  ;;  %1867 = vmatmul.mubr.f32.gmra.mxu0 %v1537_v35 }
 0x27a   : > { %vm1887_vm15 = vcmp.ge.f32.partialorder %v1748_v46, 0.0  ;;  %v1919_v27 = vmul.f32 0.01, %v1748_v46  ;;  %3935 = vmatprep.mubr.msk.f32.mxu0 %vm189_vm0, %v1540_v42 }
 0x27b   : > { %v1750_v11 = vpop.f32.mrf.mxu0  ;;  %v922_v59 = vpop.permute.xlu0 %921 }
 0x27c   : > { %v1951_v12 = vsel %vm1887_vm15, %v1748_v46, %v1919_v27  ;;  %v5619_v3 = vld [vmem:[#allocation2 + $0x48] sm:$0xff]  ;;  %987 = vst.msk [vmem:[#allocation3 + $0x1f0] sm:$0xff] %vm955_vm6, %v922_v59  ;;  %v1053_v49 = vpop.permute.xlu1 %1052  ;;  %v3257_v27 = vld [vmem:[%s6804_s2 + $0x58] sm:$0xff]  ;;  %v3256_v11 = vld [vmem:[%s6804_s2 + $0x50] sm:$0xff] }
 0x27d   : > { %v3183_v4 = vld [vmem:[#allocation3 + $0x8] sm:$0xff]  ;;  %1983 = vst.msk [vmem:[#allocation2 + $0x51] sm:$0xff] %vm189_vm0, %v1951_v12  ;;  %2118 = vrot.lane.b32.xlu0 %v5619_v3, %s4260_s23  ;;  %2052 = vst.msk [vmem:[#allocation3 + $0x60] sm:$0xff] %vm189_vm0, %v5619_v3  ;;  %3369 = vmatpush1.msra.mxu1 %v3257_v27  ;;  %v3255_v59 = vld [vmem:[%s6804_s2 + $0x48] sm:$0xff] }
 0x27e   : > { %3937 = vmatprep.mubr.msk.f32.mxu1 %vm189_vm0, %v3183_v4  ;;  %1118 = vst.msk [vmem:[#allocation3 + $0x1f0] sm:$0xff] %vm1086_vm7, %v1053_v49  ;;  %3370 = vmatprep.subr.mxu1 %v4259_v0  ;;  %v3254_v4 = vld [vmem:[%s6804_s2 + $0x40] sm:$0xff] }
 0x27f   : > { %v1250_v20 = vpop.permute.xlu0 %1249  ;;  %3371 = vmatpush1.msra.mxu1 %v3256_v11 }
 0x280   : > { %1315 = vst.msk [vmem:[#allocation3 + $0x1f0] sm:$0xff] %vm1283_vm8, %v1250_v20  ;;  %v1381_v15 = vpop.permute.xlu1 %1380  ;;  %v1539_v28 = vld [vmem:[#allocation3 + $0x1e0] sm:$0xff]  ;;  %3372 = vmatprep.subr.mxu1 %v4259_v0 }
 0x281   : > { %v1753_v30 = vpop.f32.mrf.mxu0  ;;  %1446 = vst.msk [vmem:[#allocation3 + $0x1f0] sm:$0xff] %vm1414_vm9, %v1381_v15  ;;  %1872 = vmatmul.mubr.f32.gmra.mxu0 %v1539_v28  ;;  %3373 = vmatpush1.msra.mxu1 %v3255_v59  ;;  %v3248_v28 = vld [vmem:[%s6804_s2 + $0x10] sm:$0xff] }
 0x282   : > { %vm1888_vm1 = vcmp.ge.f32.partialorder %v1753_v30, 0.0  ;;  %v1920_v33 = vmul.f32 0.01, %v1753_v30  ;;  %3936 = vmatprep.mubr.msk.f32.mxu0 %vm189_vm0, %v1542_v56  ;;  %3374 = vmatprep.subr.mxu1 %v4259_v0 }
 0x283   : > { %v1755_v5 = vpop.f32.mrf.mxu0  ;;  %3375 = vmatpush1.msra.mxu1 %v3254_v4 }
 0x284   : > { %v1952_v54 = vsel %vm1888_vm1, %v1753_v30, %v1920_v33  ;;  %v5633_v16 = vld [vmem:[#allocation2 + $0x50] sm:$0xff]  ;;  %3376 = vmatprep.subr.mxu1 %v4259_v0  ;;  %v3253_v30 = vld [vmem:[%s6804_s2 + $0x38] sm:$0xff]  ;;  %v3251_v33 = vld [vmem:[%s6804_s2 + $0x28] sm:$0xff] }
 0x285   : > { %v5635_v32 = vld [vmem:[#allocation2 + $0x4a] sm:$0xff]  ;;  %1984 = vst.msk [vmem:[#allocation2 + $0x61] sm:$0xff] %vm189_vm0, %v1952_v54  ;;  %2120 = vrot.lane.b32.xlu1 %v5633_v16, %s4260_s23  ;;  %2053 = vst.msk [vmem:[#allocation3 + $0x70] sm:$0xff] %vm189_vm0, %v5633_v16  ;;  %v5644_v22 = vld [vmem:[#allocation2 + $0x52] sm:$0xff]  ;;  %3377 = vmatpush1.msra.mxu1 %v3253_v30 }
 0x286   : > { %3152 = vst.msk [vmem:[#allocation3 + $0x28] sm:$0xff] %vm189_vm0, %v5635_v32  ;;  %3153 = vst.msk [vmem:[#allocation3 + $0x38] sm:$0xff] %vm189_vm0, %v5644_v22  ;;  %3378 = vmatprep.subr.mxu1 %v4259_v0  ;;  %v3250_v54 = vld [vmem:[%s6804_s2 + $0x20] sm:$0xff] }
 0x287   : > { %3379 = vmatpush1.msra.mxu1 %v3252_v31 }
 0x288   : > { %v1541_v43 = vld [vmem:[#allocation3 + $0x1f0] sm:$0xff]  ;;  %3380 = vmatprep.subr.mxu1 %v4259_v0 }
 0x289   : > { %v1758_v55 = vpop.f32.mrf.mxu0  ;;  %1877 = vmatmul.mubr.f32.gmra.mxu0 %v1541_v43  ;;  %3381 = vmatpush1.msra.mxu1 %v3251_v33  ;;  %v2369_v43 = vld [vmem:[#allocation2 + $0x9] sm:$0xff] }
 0x28a   : > { %vm1889_vm2 = vcmp.ge.f32.partialorder %v1758_v55, 0.0  ;;  %v1921_v34 = vmul.f32 0.01, %v1758_v55  ;;  %3382 = vmatprep.subr.mxu1 %v4259_v0  ;;  %v2374_v33 = vld [vmem:[#allocation2 + $0x49] sm:$0xff] }
 0x28b   : > { %v1760_v25 = vpop.f32.mrf.mxu0  ;;  %3383 = vmatpush1.msra.mxu1 %v3250_v54 }
 0x28c   : > { %v1953_v36 = vsel %vm1889_vm2, %v1758_v55, %v1921_v34  ;;  %v5650_v6 = vld [vmem:[#allocation2 + $0x60] sm:$0xff]  ;;  %3384 = vmatprep.subr.mxu1 %v4259_v0 }
 0x28d   : > { %1985 = vst.msk [vmem:[#allocation2 + $0x69] sm:$0xff] %vm189_vm0, %v1953_v36  ;;  %2122 = vrot.lane.b32.xlu0 %v5650_v6, %s4260_s23  ;;  %2054 = vst.msk [vmem:[#allocation3 + $0x80] sm:$0xff] %vm189_vm0, %v5650_v6  ;;  %v2368_v36 = vld [vmem:[#allocation2 + $0x1] sm:$0xff] }
 0x291   : > { %v1763_v37 = vpop.f32.mrf.mxu0 }
 0x292   : > { %vm1890_vm10 = vcmp.ge.f32.partialorder %v1763_v37, 0.0  ;;  %v1922_v29 = vmul.f32 0.01, %v1763_v37 }
 0x293   : > { %v1765_v44 = vpop.f32.mrf.mxu0 }
 0x294   : > { %v1954_v24 = vsel %vm1890_vm10, %v1763_v37, %v1922_v29  ;;  %v5661_v7 = vld [vmem:[#allocation2 + $0x68] sm:$0xff]  ;;  %v5792_v44 = vld [vmem:[#allocation2 + $0x31] sm:$0xff] }
 0x295   : > { %v5663_v38 = vld [vmem:[#allocation2 + $0x62] sm:$0xff]  ;;  %1986 = vst.msk [vmem:[#allocation2 + $0x79] sm:$0xff] %vm189_vm0, %v1954_v24  ;;  %2124 = vrot.lane.b32.xlu1 %v5661_v7, %s4260_s23  ;;  %2055 = vst.msk [vmem:[#allocation3 + $0x90] sm:$0xff] %vm189_vm0, %v5661_v7  ;;  %v5672_v47 = vld [vmem:[#allocation2 + $0x6a] sm:$0xff] }
 0x296   : > { %3154 = vst.msk [vmem:[#allocation3 + $0x48] sm:$0xff] %vm189_vm0, %v5663_v38  ;;  %3155 = vst.msk [vmem:[#allocation3 + $0x58] sm:$0xff] %vm189_vm0, %v5672_v47  ;;  %v3247_v37 = vld [vmem:[%s6804_s2 + $0x8] sm:$0xff] }
 0x299   : > { %v1768_v10 = vpop.f32.mrf.mxu0 }
 0x29a   : > { %vm1891_vm11 = vcmp.ge.f32.partialorder %v1768_v10, 0.0  ;;  %v1923_v61 = vmul.f32 0.01, %v1768_v10 }
 0x29b   : > { %v1770_v18 = vpop.f32.mrf.mxu0 }
 0x29c   : > { %v1955_v48 = vsel %vm1891_vm11, %v1768_v10, %v1923_v61  ;;  %v5676_v40 = vld [vmem:[#allocation2 + $0x78] sm:$0xff] }
 0x29d   : > { %1987 = vst.msk [vmem:[#allocation2 + $0x81] sm:$0xff] %vm189_vm0, %v1955_v48  ;;  %2126 = vrot.lane.b32.xlu0 %v5676_v40, %s4260_s23  ;;  %2056 = vst.msk [vmem:[#allocation3 + $0xa0] sm:$0xff] %vm189_vm0, %v5676_v40  ;;  %v2824_v48 = vld [vmem:[#allocation2 + $0x2] sm:$0xff] }
 0x2a1   : > { %v1773_v53 = vpop.f32.mrf.mxu0 }
 0x2a2   : > { %vm1892_vm12 = vcmp.ge.f32.partialorder %v1773_v53, 0.0  ;;  %v1924_v17 = vmul.f32 0.01, %v1773_v53 }
 0x2a3   : > { %v1775_v50 = vpop.f32.mrf.mxu0 }
 0x2a4   : > { %v1956_v62 = vsel %vm1892_vm12, %v1773_v53, %v1924_v17  ;;  %v5687_v58 = vld [vmem:[#allocation2 + $0x80] sm:$0xff]  ;;  %v3263_v53 = vld [vmem:[%s6804_s2 + $0x88] sm:$0xff] }
 0x2a5   : > { %v5689_v57 = vld [vmem:[#allocation2 + $0x7a] sm:$0xff]  ;;  %1988 = vst.msk [vmem:[#allocation2 + $0x91] sm:$0xff] %vm189_vm0, %v1956_v62  ;;  %2128 = vrot.lane.b32.xlu1 %v5687_v58, %s4260_s23  ;;  %2057 = vst.msk [vmem:[#allocation3 + $0xb0] sm:$0xff] %vm189_vm0, %v5687_v58  ;;  %v5701_v23 = vld [vmem:[#allocation2 + $0x82] sm:$0xff] }
 0x2a6   : > { %3156 = vst.msk [vmem:[#allocation3 + $0x68] sm:$0xff] %vm189_vm0, %v5689_v57  ;;  %3157 = vst.msk [vmem:[#allocation3 + $0x78] sm:$0xff] %vm189_vm0, %v5701_v23  ;;  %v3262_v50 = vld [vmem:[%s6804_s2 + $0x80] sm:$0xff] }
 0x2a9   : > { %v1778_v45 = vpop.f32.mrf.mxu0 }
 0x2aa   : > { %vm1893_vm13 = vcmp.ge.f32.partialorder %v1778_v45, 0.0  ;;  %v1925_v1 = vmul.f32 0.01, %v1778_v45 }
 0x2ab   : > { %v1780_v21 = vpop.f32.mrf.mxu0 }
 0x2ac   : > { %v1957_v2 = vsel %vm1893_vm13, %v1778_v45, %v1925_v1  ;;  %v5713_v46 = vld [vmem:[#allocation2 + $0x90] sm:$0xff] }
 0x2ad   : > { %1989 = vst.msk [vmem:[#allocation2 + $0x99] sm:$0xff] %vm189_vm0, %v1957_v2  ;;  %2130 = vrot.lane.b32.xlu0 %v5713_v46, %s4260_s23  ;;  %2058 = vst.msk [vmem:[#allocation3 + $0xc0] sm:$0xff] %vm189_vm0, %v5713_v46  ;;  %v2825_v21 = vld [vmem:[#allocation2 + $0xa] sm:$0xff] }
 0x2b1   : > { %v1783_v12 = vpop.f32.mrf.mxu0 }
 0x2b2   : > { %vm1894_vm14 = vcmp.ge.f32.partialorder %v1783_v12, 0.0  ;;  %v1926_v49 = vmul.f32 0.01, %v1783_v12 }
 0x2b3   : > { %v1785_v60 = vpop.f32.mrf.mxu0 }
 0x2b4   : > { %v1958_v13 = vsel %vm1894_vm14, %v1783_v12, %v1926_v49  ;;  %v5736_v20 = vld [vmem:[#allocation2 + $0x98] sm:$0xff]  ;;  %v2827_v60 = vld [vmem:[#allocation2 + $0x22] sm:$0xff] }
 0x2b5   : > { %v5739_v15 = vld [vmem:[#allocation2 + $0x92] sm:$0xff]  ;;  %1990 = vst.msk [vmem:[#allocation2 + $0xa9] sm:$0xff] %vm189_vm0, %v1958_v13  ;;  %2132 = vrot.lane.b32.xlu1 %v5736_v20, %s4260_s23  ;;  %2059 = vst.msk [vmem:[#allocation3 + $0xd0] sm:$0xff] %vm189_vm0, %v5736_v20  ;;  %v5754_v35 = vld [vmem:[#allocation2 + $0x9a] sm:$0xff] }
 0x2b6   : > { %3158 = vst.msk [vmem:[#allocation3 + $0x88] sm:$0xff] %vm189_vm0, %v5739_v15  ;;  %3159 = vst.msk [vmem:[#allocation3 + $0x98] sm:$0xff] %vm189_vm0, %v5754_v35 }
 0x2b9   : > { %2240 = vrot.lane.b32.xlu1 %v5587_v39, %s4261_s4  ;;  %v1788_v5 = vpop.f32.mrf.mxu0  ;;  %v3249_v39 = vld [vmem:[%s6804_s2 + $0x18] sm:$0xff] }
 0x2ba   : > { %vm1895_vm15 = vcmp.ge.f32.partialorder %v1788_v5, 0.0  ;;  %v1927_v14 = vmul.f32 0.01, %v1788_v5  ;;  %3385 = vmatpush1.msra.mxu1 %v3249_v39 }
 0x2bb   : > { %v1790_v55 = vpop.f32.mrf.mxu0  ;;  %3386 = vmatprep.subr.mxu1 %v4259_v0 }
 0x2bc   : > { %v1959_v34 = vsel %vm1895_vm15, %v1788_v5, %v1927_v14  ;;  %v5769_v25 = vld [vmem:[#allocation2 + $0xa8] sm:$0xff]  ;;  %3387 = vmatpush1.msra.mxu1 %v3248_v28 }
 0x2bd   : > { %1991 = vst.msk [vmem:[#allocation2 + $0xb1] sm:$0xff] %vm189_vm0, %v1959_v34  ;;  %2566 = vrot.lane.b32.xlu1 %v2370_v8, %s4263_s20  ;;  %2134 = vrot.lane.b32.xlu0 %v5769_v25, %s4260_s23  ;;  %2060 = vst.msk [vmem:[#allocation3 + $0xe0] sm:$0xff] %vm189_vm0, %v5769_v25 }
 0x2be   : > { %3388 = vmatprep.subr.mxu1 %v4259_v0 }
 0x2bf   : > { %3389 = vmatpush1.msra.mxu1 %v3247_v37 }
 0x2c0   : > { %3390 = vmatprep.subr.mxu1 %v4259_v0 }
 0x2c1   : > { %2242 = vrot.lane.b32.xlu1 %v5600_v9, %s4261_s4  ;;  %2436 = vrot.lane.b32.xlu0 %v2368_v36, %s4262_s6  ;;  %v1793_v42 = vpop.f32.mrf.mxu0  ;;  %v3246_v9 = vld [vmem:[%s6804_s2] sm:$0xff] }
 0x2c2   : > { %vm1896_vm1 = vcmp.ge.f32.partialorder %v1793_v42, 0.0  ;;  %v1928_v29 = vmul.f32 0.01, %v1793_v42  ;;  %3391 = vmatpush1.msra.mxu1 %v3246_v9 }
 0x2c3   : > { %v1795_v56 = vpop.f32.mrf.mxu0  ;;  %3420 = vmatprep.subr.mxu1 %v4259_v0 }
 0x2c4   : > { %v1960_v24 = vsel %vm1896_vm1, %v1793_v42, %v1928_v29  ;;  %v5794_v10 = vld [vmem:[#allocation2 + $0xb0] sm:$0xff]  ;;  %3421 = vmatpush2.msra.mxu1 %v3263_v53 }
 0x2c5   : > { %2438 = vrot.lane.b32.xlu1 %v2369_v43, %s4262_s6  ;;  %2696 = vrot.lane.b32.xlu0 %v5792_v44, %s4264_s22  ;;  %1992 = vst.msk [vmem:[#allocation2 + $0xc1] sm:$0xff] %vm189_vm0, %v1960_v24  ;;  %2061 = vst.msk [vmem:[#allocation3 + $0xf0] sm:$0xff] %vm189_vm0, %v5794_v10  ;;  %v5805_v61 = vld [vmem:[#allocation2 + $0xaa] sm:$0xff]  ;;  %v5807_v18 = vld [vmem:[#allocation2 + $0xb2] sm:$0xff] }
 0x2c6   : > { %3160 = vst.msk [vmem:[#allocation3 + $0xa8] sm:$0xff] %vm189_vm0, %v5805_v61  ;;  %3161 = vst.msk [vmem:[#allocation3 + $0xb8] sm:$0xff] %vm189_vm0, %v5807_v18  ;;  %3422 = vmatprep.subr.mxu1 %v4259_v0  ;;  %v5833_v0 = vld [vmem:[#allocation2 + $0x39] sm:$0xff]  ;;  %v5897_v43 = vld [vmem:[#allocation2 + $0x61] sm:$0xff] }
 0x2c7   : > { %3423 = vmatpush2.msra.mxu1 %v3262_v50 }
 0x2c9   : > { %2568 = vrot.lane.b32.xlu1 %v2371_v41, %s4263_s20  ;;  %2892 = vrot.lane.b32.xlu0 %v2824_v48, %s4265_s28  ;;  %v1798_v17 = vpop.f32.mrf.mxu0 }
 0x2ca   : > { %vm1897_vm2 = vcmp.ge.f32.partialorder %v1798_v17, 0.0  ;;  %v1929_v62 = vmul.f32 0.01, %v1798_v17 }
 0x2cb   : > { %v1800_v51 = vpop.f32.mrf.mxu0 }
 0x2cc   : > { %v1961_v45 = vsel %vm1897_vm2, %v1798_v17, %v1929_v62  ;;  %v5824_v26 = vld [vmem:[#allocation2 + $0xc0] sm:$0xff]  ;;  %v5925_v17 = vld [vmem:[#allocation2 + $0x69] sm:$0xff] }
 0x2cd   : > { %2244 = vrot.lane.b32.xlu1 %v5619_v3, %s4261_s4  ;;  %3022 = vrot.lane.b32.xlu0 %v2826_v19, %s4266_s29  ;;  %1993 = vst.msk [vmem:[#allocation2 + $0xc9] sm:$0xff] %vm189_vm0, %v1961_v45  ;;  %2062 = vst.msk [vmem:[#allocation3 + $0x100] sm:$0xff] %vm189_vm0, %v5824_v26 }
 0x2cf   : > { %v2111_v1 = vpop.permute.xlu0 %2110 }
 0x2d0   : > { %2206 = vst.msk [vmem:[#allocation3] sm:$0xff] %vm496_vm3, %v2111_v1 }
 0x2d1   : > { %2440 = vrot.lane.b32.xlu1 %v2370_v8, %s4262_s6  ;;  %2698 = vrot.lane.b32.xlu0 %v5833_v0, %s4264_s22  ;;  %v1803_v2 = vpop.f32.mrf.mxu0  ;;  %v5882_v8 = vld [vmem:[#allocation2 + $0x51] sm:$0xff] }
 0x2d2   : > { %vm1898_vm10 = vcmp.ge.f32.partialorder %v1803_v2, 0.0  ;;  %v1930_v11 = vmul.f32 0.01, %v1803_v2 }
 0x2d3   : > { %v1805_v59 = vpop.f32.mrf.mxu0 }
 0x2d4   : > { %v5838_v3 = vld [vmem:[#allocation2 + $0xc8] sm:$0xff]  ;;  %v1962_v4 = vsel %vm1898_vm10, %v1803_v2, %v1930_v11 }
 0x2d5   : > { %v5840_v27 = vld [vmem:[#allocation2 + $0xc2] sm:$0xff]  ;;  %2570 = vrot.lane.b32.xlu1 %v5792_v44, %s4263_s20  ;;  %2894 = vrot.lane.b32.xlu0 %v2825_v21, %s4265_s28  ;;  %2063 = vst.msk [vmem:[#allocation3 + $0x110] sm:$0xff] %vm189_vm0, %v5838_v3  ;;  %v5849_v49 = vld [vmem:[#allocation2 + $0xca] sm:$0xff]  ;;  %1994 = vst.msk [vmem:[#allocation2 + $0xd9] sm:$0xff] %vm189_vm0, %v1962_v4 }
 0x2d6   : > { %3162 = vst.msk [vmem:[#allocation3 + $0xc8] sm:$0xff] %vm189_vm0, %v5840_v27  ;;  %3163 = vst.msk [vmem:[#allocation3 + $0xd8] sm:$0xff] %vm189_vm0, %v5849_v49 }
 0x2d7   : > { %v2113_v12 = vpop.permute.xlu1 %2112 }
 0x2d8   : > { %2207 = vst.msk [vmem:[#allocation3 + $0x10] sm:$0xff] %vm496_vm3, %v2113_v12 }
 0x2d9   : > { %2246 = vrot.lane.b32.xlu1 %v5633_v16, %s4261_s4  ;;  %3024 = vrot.lane.b32.xlu0 %v2827_v60, %s4266_s29  ;;  %v1808_v13 = vpop.f32.mrf.mxu0 }
 0x2da   : > { %vm1899_vm11 = vcmp.ge.f32.partialorder %v1808_v13, 0.0  ;;  %v1931_v30 = vmul.f32 0.01, %v1808_v13 }
 0x2db   : > { %v1810_v31 = vpop.f32.mrf.mxu0 }
 0x2dc   : > { %v1963_v5 = vsel %vm1899_vm11, %v1808_v13, %v1931_v30  ;;  %v5865_v16 = vld [vmem:[#allocation2 + $0xd8] sm:$0xff] }
 0x2dd   : > { %2442 = vrot.lane.b32.xlu1 %v2371_v41, %s4262_s6  ;;  %2700 = vrot.lane.b32.xlu0 %v2374_v33, %s4264_s22  ;;  %1995 = vst.msk [vmem:[#allocation2 + $0xe1] sm:$0xff] %vm189_vm0, %v1963_v5  ;;  %2064 = vst.msk [vmem:[#allocation3 + $0x120] sm:$0xff] %vm189_vm0, %v5865_v16 }
 0x2df   : > { %v2115_v54 = vpop.permute.xlu0 %2114 }
 0x2e0   : > { %2208 = vst.msk [vmem:[#allocation3 + $0x20] sm:$0xff] %vm496_vm3, %v2115_v54 }
 0x2e1   : > { %2572 = vrot.lane.b32.xlu1 %v5833_v0, %s4263_s20  ;;  %2896 = vrot.lane.b32.xlu0 %v2826_v19, %s4265_s28  ;;  %v1813_v39 = vpop.f32.mrf.mxu0 }
 0x2e2   : > { %vm1900_vm12 = vcmp.ge.f32.partialorder %v1813_v39, 0.0  ;;  %v1932_v36 = vmul.f32 0.01, %v1813_v39 }
 0x2e3   : > { %v1815_v28 = vpop.f32.mrf.mxu0 }
 0x2e4   : > { %v5869_v14 = vld [vmem:[#allocation2 + $0xe0] sm:$0xff]  ;;  %v1964_v42 = vsel %vm1900_vm12, %v1813_v39, %v1932_v36 }
 0x2e5   : > { %v5871_v55 = vld [vmem:[#allocation2 + $0xda] sm:$0xff]  ;;  %2248 = vrot.lane.b32.xlu1 %v5650_v6, %s4261_s4  ;;  %3026 = vrot.lane.b32.xlu0 %v5602_v52, %s4266_s29  ;;  %2065 = vst.msk [vmem:[#allocation3 + $0x130] sm:$0xff] %vm189_vm0, %v5869_v14  ;;  %v5895_v37 = vld [vmem:[#allocation2 + $0xe2] sm:$0xff]  ;;  %1996 = vst.msk [vmem:[#allocation2 + $0xf1] sm:$0xff] %vm189_vm0, %v1964_v42 }
 0x2e6   : > { %3164 = vst.msk [vmem:[#allocation3 + $0xe8] sm:$0xff] %vm189_vm0, %v5871_v55  ;;  %3165 = vst.msk [vmem:[#allocation3 + $0xf8] sm:$0xff] %vm189_vm0, %v5895_v37 }
 0x2e7   : > { %v2117_v34 = vpop.permute.xlu1 %2116 }
 0x2e8   : > { %2209 = vst.msk [vmem:[#allocation3 + $0x30] sm:$0xff] %vm496_vm3, %v2117_v34  ;;  %v5980_v34 = vld [vmem:[#allocation2 + $0x81] sm:$0xff] }
 0x2e9   : > { %2444 = vrot.lane.b32.xlu1 %v5792_v44, %s4262_s6  ;;  %2702 = vrot.lane.b32.xlu0 %v5882_v8, %s4264_s22  ;;  %v1818_v29 = vpop.f32.mrf.mxu0 }
 0x2ea   : > { %vm1901_vm13 = vcmp.ge.f32.partialorder %v1818_v29, 0.0 }
 0x2eb   : > { %v1820_v56 = vpop.f32.mrf.mxu0 }
 0x2ec   : > { %v5916_v9 = vld [vmem:[#allocation2 + $0xf0] sm:$0xff] }
 0x2ed   : > { %2574 = vrot.lane.b32.xlu1 %v2374_v33, %s4263_s20  ;;  %2898 = vrot.lane.b32.xlu0 %v2827_v60, %s4265_s28  ;;  %2066 = vst.msk [vmem:[#allocation3 + $0x140] sm:$0xff] %vm189_vm0, %v5916_v9 }
 0x2ef   : > { %v2119_v6 = vpop.permute.xlu0 %2118 }
 0x2f0   : > { %2210 = vst.msk [vmem:[#allocation3 + $0x40] sm:$0xff] %vm496_vm3, %v2119_v6 }
 0x2f1   : > { %2250 = vrot.lane.b32.xlu1 %v5661_v7, %s4261_s4  ;;  %3028 = vrot.lane.b32.xlu0 %v5613_v63, %s4266_s29  ;;  %v1933_v7 = vmul.f32 0.01, %v1818_v29 }
 0x2f3   : > { %v1965_v24 = vsel %vm1901_vm13, %v1818_v29, %v1933_v7 }
 0x2f4   : > { %1997 = vst.msk [vmem:[#allocation2 + $0xf9] sm:$0xff] %vm189_vm0, %v1965_v24 }
 0x2f5   : > { %2446 = vrot.lane.b32.xlu1 %v5833_v0, %s4262_s6  ;;  %2704 = vrot.lane.b32.xlu0 %v5897_v43, %s4264_s22 }
 0x2f7   : > { %v2121_v44 = vpop.permute.xlu1 %2120 }
 0x2f8   : > { %2211 = vst.msk [vmem:[#allocation3 + $0x50] sm:$0xff] %vm496_vm3, %v2121_v44 }
 0x2f9   : > { %2576 = vrot.lane.b32.xlu1 %v5882_v8, %s4263_s20  ;;  %2900 = vrot.lane.b32.xlu0 %v5602_v52, %s4265_s28  ;;  %v1823_v52 = vpop.f32.mrf.mxu0 }
 0x2fa   : > { %vm1902_vm14 = vcmp.ge.f32.partialorder %v1823_v52, 0.0 }
 0x2fb   : > { %v5920_v53 = vld [vmem:[#allocation2 + $0xf8] sm:$0xff]  ;;  %v1825_v50 = vpop.f32.mrf.mxu0 }
 0x2fc   : > { %v5922_v41 = vld [vmem:[#allocation2 + $0xf2] sm:$0xff]  ;;  %2067 = vst.msk [vmem:[#allocation3 + $0x150] sm:$0xff] %vm189_vm0, %v5920_v53  ;;  %v5939_v21 = vld [vmem:[#allocation2 + $0xfa] sm:$0xff] }
 0x2fd   : > { %2252 = vrot.lane.b32.xlu1 %v5676_v40, %s4261_s4  ;;  %3030 = vrot.lane.b32.xlu0 %v5635_v32, %s4266_s29  ;;  %3166 = vst.msk [vmem:[#allocation3 + $0x108] sm:$0xff] %vm189_vm0, %v5922_v41  ;;  %v1934_v40 = vmul.f32 0.01, %v1823_v52  ;;  %v1828_v51 = vpop.f32.mrf.mxu0  ;;  %3167 = vst.msk [vmem:[#allocation3 + $0x118] sm:$0xff] %vm189_vm0, %v5939_v21 }
 0x2fe   : > { %vm1903_vm15 = vcmp.ge.f32.partialorder %v1828_v51, 0.0  ;;  %v1935_v19 = vmul.f32 0.01, %v1828_v51 }
 0x2ff   : > { %v2123_v48 = vpop.permute.xlu0 %2122  ;;  %v1966_v62 = vsel %vm1902_vm14, %v1823_v52, %v1934_v40  ;;  %v1830_v45 = vpop.f32.mrf.mxu0 }
 0x300   : > { %2212 = vst.msk [vmem:[#allocation3 + $0x60] sm:$0xff] %vm496_vm3, %v2123_v48  ;;  %v1967_v0 = vsel %vm1903_vm15, %v1828_v51, %v1935_v19 }
 0x301   : > { %2448 = vrot.lane.b32.xlu1 %v2374_v33, %s4262_s6  ;;  %2706 = vrot.lane.b32.xlu0 %v5925_v17, %s4264_s22  ;;  %1998 = vst.msk [vmem:[#allocation2 + $0x109] sm:$0xff] %vm189_vm0, %v1966_v62  ;;  %1999 = vst.msk [vmem:[#allocation2 + $0x111] sm:$0xff] %vm189_vm0, %v1967_v0  ;;  %v1833_v12 = vpop.f32.mrf.mxu0  ;;  %v6037_v62 = vld [vmem:[#allocation2 + $0x99] sm:$0xff] }
 0x302   : > { %vm1904_vm1 = vcmp.ge.f32.partialorder %v1833_v12, 0.0  ;;  %v1936_v4 = vmul.f32 0.01, %v1833_v12 }
 0x303   : > { %v1835_v60 = vpop.f32.mrf.mxu0 }
 0x304   : > { %v1968_v13 = vsel %vm1904_vm1, %v1833_v12, %v1936_v4 }
 0x305   : > { %2578 = vrot.lane.b32.xlu1 %v5897_v43, %s4263_s20  ;;  %2902 = vrot.lane.b32.xlu0 %v5613_v63, %s4265_s28  ;;  %v5949_v63 = vld [vmem:[#allocation2 + $0x79] sm:$0xff]  ;;  %2000 = vst.msk [vmem:[#allocation2 + $0x121] sm:$0xff] %vm189_vm0, %v1968_v13 }
 0x307   : > { %v2125_v1 = vpop.permute.xlu1 %2124 }
 0x308   : > { %2213 = vst.msk [vmem:[#allocation3 + $0x70] sm:$0xff] %vm496_vm3, %v2125_v1  ;;  %v5955_v11 = vld [vmem:[#allocation2 + $0x108] sm:$0xff]  ;;  %v5957_v59 = vld [vmem:[#allocation2 + $0x110] sm:$0xff] }
 0x309   : > { %2254 = vrot.lane.b32.xlu1 %v5687_v58, %s4261_s4  ;;  %3032 = vrot.lane.b32.xlu0 %v5644_v22, %s4266_s29  ;;  %2068 = vst.msk [vmem:[#allocation3 + $0x160] sm:$0xff] %vm189_vm0, %v5955_v11  ;;  %2069 = vst.msk [vmem:[#allocation3 + $0x170] sm:$0xff] %vm189_vm0, %v5957_v59  ;;  %v5964_v58 = vld [vmem:[#allocation2 + $0x10a] sm:$0xff]  ;;  %v1838_v30 = vpop.f32.mrf.mxu0  ;;  %v5977_v54 = vld [vmem:[#allocation2 + $0x112] sm:$0xff] }
 0x30a   : > { %3168 = vst.msk [vmem:[#allocation3 + $0x128] sm:$0xff] %vm189_vm0, %v5964_v58  ;;  %vm1905_vm2 = vcmp.ge.f32.partialorder %v1838_v30, 0.0  ;;  %v1937_v31 = vmul.f32 0.01, %v1838_v30  ;;  %3169 = vst.msk [vmem:[#allocation3 + $0x138] sm:$0xff] %vm189_vm0, %v5977_v54 }
 0x30b   : > { %v1840_v33 = vpop.f32.mrf.mxu0 }
 0x30c   : > { %v1969_v5 = vsel %vm1905_vm2, %v1838_v30, %v1937_v31  ;;  %v6072_v33 = vld [vmem:[#allocation2 + $0xa9] sm:$0xff] }
 0x30d   : > { %2450 = vrot.lane.b32.xlu1 %v5882_v8, %s4262_s6  ;;  %2708 = vrot.lane.b32.xlu0 %v5949_v63, %s4264_s22  ;;  %2001 = vst.msk [vmem:[#allocation2 + $0x129] sm:$0xff] %vm189_vm0, %v1969_v5  ;;  %v5993_v8 = vld [vmem:[#allocation2 + $0x120] sm:$0xff] }
 0x30e   : > { %2070 = vst.msk [vmem:[#allocation3 + $0x180] sm:$0xff] %vm189_vm0, %v5993_v8 }
 0x30f   : > { %v2127_v2 = vpop.permute.xlu0 %2126 }
 0x310   : > { %2214 = vst.msk [vmem:[#allocation3 + $0x80] sm:$0xff] %vm496_vm3, %v2127_v2 }
 0x311   : > { %2580 = vrot.lane.b32.xlu1 %v5925_v17, %s4263_s20  ;;  %2904 = vrot.lane.b32.xlu0 %v5635_v32, %s4265_s28  ;;  %v1843_v39 = vpop.f32.mrf.mxu0 }
 0x312   : > { %vm1906_vm10 = vcmp.ge.f32.partialorder %v1843_v39, 0.0 }
 0x313   : > { %v1845_v28 = vpop.f32.mrf.mxu0 }
 0x314   : > { %v5995_v6 = vld [vmem:[#allocation2 + $0x128] sm:$0xff] }
 0x315   : > { %2256 = vrot.lane.b32.xlu1 %v5713_v46, %s4261_s4  ;;  %3034 = vrot.lane.b32.xlu0 %v5663_v38, %s4266_s29  ;;  %2071 = vst.msk [vmem:[#allocation3 + $0x190] sm:$0xff] %vm189_vm0, %v5995_v6  ;;  %v6002_v36 = vld [vmem:[#allocation2 + $0x122] sm:$0xff]  ;;  %v6017_v24 = vld [vmem:[#allocation2 + $0x12a] sm:$0xff] }
 0x316   : > { %3170 = vst.msk [vmem:[#allocation3 + $0x148] sm:$0xff] %vm189_vm0, %v6002_v36  ;;  %3171 = vst.msk [vmem:[#allocation3 + $0x158] sm:$0xff] %vm189_vm0, %v6017_v24 }
 0x317   : > { %v2129_v32 = vpop.permute.xlu1 %2128 }
 0x318   : > { %2215 = vst.msk [vmem:[#allocation3 + $0x90] sm:$0xff] %vm496_vm3, %v2129_v32 }
 0x319   : > { %2452 = vrot.lane.b32.xlu1 %v5897_v43, %s4262_s6  ;;  %2710 = vrot.lane.b32.xlu0 %v5980_v34, %s4264_s22  ;;  %v6010_v43 = vld [vmem:[#allocation2 + $0x91] sm:$0xff]  ;;  %v1848_v29 = vpop.f32.mrf.mxu0 }
 0x31a   : > { %vm1907_vm11 = vcmp.ge.f32.partialorder %v1848_v29, 0.0 }
 0x31b   : > { %v1850_v7 = vpop.f32.mrf.mxu0 }
 0x31d   : > { %2582 = vrot.lane.b32.xlu1 %v5949_v63, %s4263_s20  ;;  %2906 = vrot.lane.b32.xlu0 %v5644_v22, %s4265_s28  ;;  %v1938_v22 = vmul.f32 0.01, %v1843_v39 }
 0x31f   : > { %v2131_v46 = vpop.permute.xlu0 %2130  ;;  %v1970_v42 = vsel %vm1906_vm10, %v1843_v39, %v1938_v22 }
 0x320   : > { %2216 = vst.msk [vmem:[#allocation3 + $0xa0] sm:$0xff] %vm496_vm3, %v2131_v46 }
 0x321   : > { %2258 = vrot.lane.b32.xlu1 %v5736_v20, %s4261_s4  ;;  %3036 = vrot.lane.b32.xlu0 %v5672_v47, %s4266_s29  ;;  %2002 = vst.msk [vmem:[#allocation2 + $0x139] sm:$0xff] %vm189_vm0, %v1970_v42  ;;  %v1939_v20 = vmul.f32 0.01, %v1848_v29 }
 0x323   : > { %v1971_v44 = vsel %vm1907_vm11, %v1848_v29, %v1939_v20 }
 0x324   : > { %2003 = vst.msk [vmem:[#allocation2 + $0x141] sm:$0xff] %vm189_vm0, %v1971_v44 }
 0x325   : > { %2454 = vrot.lane.b32.xlu1 %v5925_v17, %s4262_s6  ;;  %2712 = vrot.lane.b32.xlu0 %v6010_v43, %s4264_s22 }
 0x327   : > { %v2133_v56 = vpop.permute.xlu1 %2132 }
 0x328   : > { %2217 = vst.msk [vmem:[#allocation3 + $0xb0] sm:$0xff] %vm496_vm3, %v2133_v56  ;;  %v6032_v40 = vld [vmem:[#allocation2 + $0x138] sm:$0xff] }
 0x329   : > { %2584 = vrot.lane.b32.xlu1 %v5980_v34, %s4263_s20  ;;  %2908 = vrot.lane.b32.xlu0 %v5663_v38, %s4265_s28  ;;  %v1853_v38 = vpop.f32.mrf.mxu0  ;;  %2072 = vst.msk [vmem:[#allocation3 + $0x1a0] sm:$0xff] %vm189_vm0, %v6032_v40 }
 0x32a   : > { %vm1908_vm12 = vcmp.ge.f32.partialorder %v1853_v38, 0.0  ;;  %v1940_v51 = vmul.f32 0.01, %v1853_v38 }
 0x32b   : > { %v2241_v48 = vpop.permute.xlu1 %2240  ;;  %v6034_v50 = vld [vmem:[#allocation2 + $0x140] sm:$0xff]  ;;  %v1855_v19 = vpop.f32.mrf.mxu0 }
 0x32c   : > { %2336 = vst.msk [vmem:[#allocation3] sm:$0xff] %vm627_vm4, %v2241_v48  ;;  %v1972_v0 = vsel %vm1908_vm12, %v1853_v38, %v1940_v51  ;;  %v6059_v30 = vld [vmem:[#allocation2 + $0x142] sm:$0xff] }
 0x32d   : > { %2260 = vrot.lane.b32.xlu1 %v5769_v25, %s4261_s4  ;;  %3038 = vrot.lane.b32.xlu0 %v5689_v57, %s4266_s29  ;;  %2073 = vst.msk [vmem:[#allocation3 + $0x1b0] sm:$0xff] %vm189_vm0, %v6034_v50  ;;  %v6043_v25 = vld [vmem:[#allocation2 + $0x13a] sm:$0xff]  ;;  %2004 = vst.msk [vmem:[#allocation2 + $0x151] sm:$0xff] %vm189_vm0, %v1972_v0  ;;  %v1858_v2 = vpop.f32.mrf.mxu0  ;;  %v3185_v19 = vld [vmem:[#allocation3 + $0x18] sm:$0xff] }
 0x32e   : > { %3172 = vst.msk [vmem:[#allocation3 + $0x168] sm:$0xff] %vm189_vm0, %v6043_v25  ;;  %vm1909_vm13 = vcmp.ge.f32.partialorder %v1858_v2, 0.0  ;;  %3173 = vst.msk [vmem:[#allocation3 + $0x178] sm:$0xff] %vm189_vm0, %v6059_v30 }
 0x32f   : > { %v2567_v17 = vpop.permute.xlu1 %2566  ;;  %v2135_v52 = vpop.permute.xlu0 %2134 }
 0x330   : > { %2218 = vst.msk [vmem:[#allocation3 + $0xc0] sm:$0xff] %vm496_vm3, %v2135_v52  ;;  %v1860_v12 = vpop.f32.mrf.mxu0 }
 0x331   : > { %2456 = vrot.lane.b32.xlu1 %v5949_v63, %s4262_s6  ;;  %2714 = vrot.lane.b32.xlu0 %v6037_v62, %s4264_s22  ;;  %v1941_v63 = vmul.f32 0.01, %v1858_v2 }
 0x332   : > { %v1863_v22 = vpop.f32.mrf.mxu0 }
 0x333   : > { %v2243_v45 = vpop.permute.xlu1 %2242  ;;  %v2437_v1 = vpop.permute.xlu0 %2436  ;;  %v1973_v13 = vsel %vm1909_vm13, %v1858_v2, %v1941_v63  ;;  %vm1910_vm14 = vcmp.ge.f32.partialorder %v1863_v22, 0.0 }
 0x334   : > { %2337 = vst.msk [vmem:[#allocation3 + $0x10] sm:$0xff] %vm627_vm4, %v2243_v45  ;;  %v6078_v46 = vld [vmem:[#allocation2 + $0x150] sm:$0xff]  ;;  %v1865_v42 = vpop.f32.mrf.mxu0 }
 0x335   : > { %2532 = vst.msk [vmem:[#allocation3] sm:$0xff] %vm824_vm5, %v2437_v1  ;;  %2586 = vrot.lane.b32.xlu1 %v6010_v43, %s4263_s20  ;;  %2910 = vrot.lane.b32.xlu0 %v5672_v47, %s4265_s28  ;;  %v6107_v45 = vld [vmem:[#allocation2 + $0xb1] sm:$0xff] }
 0x336   : > { %2662 = vst.msk [vmem:[#allocation3] sm:$0xff] %vm955_vm6, %v2567_v17 }
 0x337   : > { %v2439_v4 = vpop.permute.xlu1 %2438  ;;  %v2697_v60 = vpop.permute.xlu0 %2696  ;;  %2005 = vst.msk [vmem:[#allocation2 + $0x159] sm:$0xff] %vm189_vm0, %v1973_v13  ;;  %2074 = vst.msk [vmem:[#allocation3 + $0x1c0] sm:$0xff] %vm189_vm0, %v6078_v46 }
 0x338   : > { %2533 = vst.msk [vmem:[#allocation3 + $0x10] sm:$0xff] %vm824_vm5, %v2439_v4 }
 0x339   : > { %2792 = vst.msk [vmem:[#allocation3] sm:$0xff] %vm1086_vm7, %v2697_v60  ;;  %3040 = vrot.lane.b32.xlu0 %v5701_v23, %s4266_s29  ;;  %2262 = vrot.lane.b32.xlu1 %v5794_v10, %s4261_s4  ;;  %v1868_v56 = vpop.f32.mrf.mxu0  ;;  %v6137_v60 = vld [vmem:[#allocation2 + $0xc1] sm:$0xff] }
 0x33a   : > { %vm1911_vm15 = vcmp.ge.f32.partialorder %v1868_v56, 0.0 }
 0x33b   : > { %v2569_v47 = vpop.permute.xlu1 %2568  ;;  %v2893_v31 = vpop.permute.xlu0 %2892 }
 0x33c   : > { %2663 = vst.msk [vmem:[#allocation3 + $0x10] sm:$0xff] %vm955_vm6, %v2569_v47  ;;  %v1870_v44 = vpop.f32.mrf.mxu0 }
 0x33d   : > { %2988 = vst.msk [vmem:[#allocation3] sm:$0xff] %vm1283_vm8, %v2893_v31  ;;  %2716 = vrot.lane.b32.xlu0 %v6072_v33, %s4264_s22  ;;  %2458 = vrot.lane.b32.xlu1 %v5980_v34, %s4262_s6  ;;  %v1942_v34 = vmul.f32 0.01, %v1863_v22 }
 0x33e   : > { %v6080_v39 = vld [vmem:[#allocation2 + $0x158] sm:$0xff] }
 0x33f   : > { %v2245_v32 = vpop.permute.xlu1 %2244  ;;  %v3023_v5 = vpop.permute.xlu0 %3022  ;;  %2075 = vst.msk [vmem:[#allocation3 + $0x1d0] sm:$0xff] %vm189_vm0, %v6080_v39  ;;  %v6088_v28 = vld [vmem:[#allocation2 + $0x152] sm:$0xff]  ;;  %v1974_v7 = vsel %vm1910_vm14, %v1863_v22, %v1942_v34  ;;  %v6103_v51 = vld [vmem:[#allocation2 + $0x15a] sm:$0xff] }
 0x340   : > { %2338 = vst.msk [vmem:[#allocation3 + $0x20] sm:$0xff] %vm627_vm4, %v2245_v32  ;;  %v3187_v34 = vld [vmem:[#allocation3 + $0x28] sm:$0xff] }
 0x341   : > { %3118 = vst.msk [vmem:[#allocation3] sm:$0xff] %vm1414_vm9, %v3023_v5  ;;  %2912 = vrot.lane.b32.xlu0 %v5689_v57, %s4265_s28  ;;  %2588 = vrot.lane.b32.xlu1 %v6037_v62, %s4263_s20  ;;  %v1943_v57 = vmul.f32 0.01, %v1868_v56 }
 0x342   : > { %3174 = vst.msk [vmem:[#allocation3 + $0x188] sm:$0xff] %vm189_vm0, %v6088_v28  ;;  %2006 = vst.msk [vmem:[#allocation2 + $0x169] sm:$0xff] %vm189_vm0, %v1974_v7 }
 0x343   : > { %v2441_v29 = vpop.permute.xlu1 %2440  ;;  %v2699_v20 = vpop.permute.xlu0 %2698  ;;  %v1975_v38 = vsel %vm1911_vm15, %v1868_v56, %v1943_v57  ;;  %3175 = vst.msk [vmem:[#allocation3 + $0x198] sm:$0xff] %vm189_vm0, %v6103_v51 }
 0x344   : > { %2534 = vst.msk [vmem:[#allocation3 + $0x20] sm:$0xff] %vm824_vm5, %v2441_v29 }
 0x345   : > { %2793 = vst.msk [vmem:[#allocation3 + $0x10] sm:$0xff] %vm1086_vm7, %v2699_v20  ;;  %3042 = vrot.lane.b32.xlu0 %v5739_v15, %s4266_s29  ;;  %2264 = vrot.lane.b32.xlu1 %v5824_v26, %s4261_s4 }
 0x346   : > { %2007 = vst.msk [vmem:[#allocation2 + $0x171] sm:$0xff] %vm189_vm0, %v1975_v38  ;;  %v3189_v38 = vld [vmem:[#allocation3 + $0x38] sm:$0xff] }
 0x347   : > { %v2571_v48 = vpop.permute.xlu1 %2570  ;;  %v2895_v17 = vpop.permute.xlu0 %2894 }
 0x348   : > { %v3182_v52 = vld [vmem:[#allocation3] sm:$0xff]  ;;  %2664 = vst.msk [vmem:[#allocation3 + $0x20] sm:$0xff] %vm955_vm6, %v2571_v48 }
 0x349   : > { %2989 = vst.msk [vmem:[#allocation3 + $0x10] sm:$0xff] %vm1283_vm8, %v2895_v17  ;;  %3425 = vmatmul.mubr.f32.vlgmr.msra.gmra.mxu1 %v3182_v52  ;;  %2718 = vrot.lane.b32.xlu0 %v6107_v45, %s4264_s22  ;;  %v6123_v12 = vld [vmem:[#allocation2 + $0x168] sm:$0xff] }
 0x34a   : > { %3938 = vmatprep.mubr.msk.f32.mxu1 %vm189_vm0, %v3185_v19  ;;  %2460 = vrot.lane.b32.xlu1 %v6010_v43, %s4262_s6  ;;  %v1873_v43 = vpop.f32.mrf.mxu0  ;;  %2076 = vst.msk [vmem:[#allocation3 + $0x1e0] sm:$0xff] %vm189_vm0, %v6123_v12 }
 0x34b   : > { %v2247_v1 = vpop.permute.xlu1 %2246  ;;  %v3025_v0 = vpop.permute.xlu0 %3024  ;;  %vm1912_vm1 = vcmp.ge.f32.partialorder %v1873_v43, 0.0  ;;  %v1944_v13 = vmul.f32 0.01, %v1873_v43 }
 0x34c   : > { %2339 = vst.msk [vmem:[#allocation3 + $0x30] sm:$0xff] %vm627_vm4, %v2247_v1  ;;  %v1875_v47 = vpop.f32.mrf.mxu0  ;;  %v6181_v1 = vld [vmem:[#allocation2 + $0xc9] sm:$0xff] }
 0x34d   : > { %3119 = vst.msk [vmem:[#allocation3 + $0x10] sm:$0xff] %vm1414_vm9, %v3025_v0  ;;  %2914 = vrot.lane.b32.xlu0 %v5701_v23, %s4265_s28  ;;  %v6125_v4 = vld [vmem:[#allocation2 + $0x170] sm:$0xff]  ;;  %v1976_v22 = vsel %vm1912_vm1, %v1873_v43, %v1944_v13  ;;  %v3191_v47 = vld [vmem:[#allocation3 + $0x48] sm:$0xff] }
 0x34e   : > { %2590 = vrot.lane.b32.xlu1 %v6072_v33, %s4263_s20  ;;  %2077 = vst.msk [vmem:[#allocation3 + $0x1f0] sm:$0xff] %vm189_vm0, %v6125_v4  ;;  %v6133_v23 = vld [vmem:[#allocation2 + $0x16a] sm:$0xff]  ;;  %2008 = vst.msk [vmem:[#allocation2 + $0x181] sm:$0xff] %vm189_vm0, %v1976_v22  ;;  %v1878_v42 = vpop.f32.mrf.mxu0  ;;  %v6151_v44 = vld [vmem:[#allocation2 + $0x172] sm:$0xff] }
 0x34f   : > { %v2443_v2 = vpop.permute.xlu1 %2442  ;;  %v2701_v63 = vpop.permute.xlu0 %2700  ;;  %3176 = vst.msk [vmem:[#allocation3 + $0x1a8] sm:$0xff] %vm189_vm0, %v6133_v23  ;;  %vm1913_vm2 = vcmp.ge.f32.partialorder %v1878_v42, 0.0  ;;  %v1945_v29 = vmul.f32 0.01, %v1878_v42  ;;  %3177 = vst.msk [vmem:[#allocation3 + $0x1b8] sm:$0xff] %vm189_vm0, %v6151_v44 }
 0x350   : > { %2535 = vst.msk [vmem:[#allocation3 + $0x30] sm:$0xff] %vm824_vm5, %v2443_v2  ;;  %v1880_v20 = vpop.f32.mrf.mxu0 }
 0x351   : > { %2794 = vst.msk [vmem:[#allocation3 + $0x20] sm:$0xff] %vm1086_vm7, %v2701_v63  ;;  %3044 = vrot.lane.b32.xlu0 %v5754_v35, %s4266_s29  ;;  %v1977_v57 = vsel %vm1913_vm2, %v1878_v42, %v1945_v29 }
 0x352   : > { %2720 = vrot.lane.b32.xlu1 %v6137_v60, %s4264_s22  ;;  %2009 = vst.msk [vmem:[#allocation2 + $0x189] sm:$0xff] %vm189_vm0, %v1977_v57 }
 0x353   : > { %v2573_v31 = vpop.permute.xlu1 %2572  ;;  %v2897_v32 = vpop.permute.xlu0 %2896 }
 0x354   : > { %v3184_v5 = vld [vmem:[#allocation3 + $0x10] sm:$0xff]  ;;  %2665 = vst.msk [vmem:[#allocation3 + $0x30] sm:$0xff] %vm955_vm6, %v2573_v31 }
 0x355   : > { %2990 = vst.msk [vmem:[#allocation3 + $0x20] sm:$0xff] %vm1283_vm8, %v2897_v32  ;;  %3430 = vmatmul.mubr.f32.gmra.mxu1 %v3184_v5  ;;  %2136 = vrot.lane.b32.xlu0 %v5794_v10, %s4260_s23  ;;  %v6202_v31 = vld [vmem:[#allocation2 + $0xd9] sm:$0xff] }
 0x356   : > { %3939 = vmatprep.mubr.msk.f32.mxu1 %vm189_vm0, %v3187_v34  ;;  %2916 = vrot.lane.b32.xlu1 %v5739_v15, %s4265_s28 }
 0x357   : > { %v2249_v7 = vpop.permute.xlu1 %2248  ;;  %v3027_v56 = vpop.permute.xlu0 %3026 }
 0x358   : > { %2340 = vst.msk [vmem:[#allocation3 + $0x40] sm:$0xff] %vm627_vm4, %v2249_v7 }
 0x359   : > { %3120 = vst.msk [vmem:[#allocation3 + $0x20] sm:$0xff] %vm1414_vm9, %v3027_v56  ;;  %2266 = vrot.lane.b32.xlu0 %v5838_v3, %s4261_s4  ;;  %v6170_v19 = vld [vmem:[#allocation2 + $0x182] sm:$0xff]  ;;  %v6187_v63 = vld [vmem:[#allocation2 + $0x18a] sm:$0xff] }
 0x35a   : > { %3046 = vrot.lane.b32.xlu1 %v5805_v61, %s4266_s29  ;;  %3178 = vst.msk [vmem:[#allocation3 + $0x1c8] sm:$0xff] %vm189_vm0, %v6170_v19  ;;  %3179 = vst.msk [vmem:[#allocation3 + $0x1d8] sm:$0xff] %vm189_vm0, %v6187_v63 }
 0x35b   : > { %v2445_v15 = vpop.permute.xlu1 %2444  ;;  %v2703_v10 = vpop.permute.xlu0 %2702 }
 0x35c   : > { %2536 = vst.msk [vmem:[#allocation3 + $0x40] sm:$0xff] %vm824_vm5, %v2445_v15 }
 0x35d   : > { %2795 = vst.msk [vmem:[#allocation3 + $0x30] sm:$0xff] %vm1086_vm7, %v2703_v10  ;;  %2462 = vrot.lane.b32.xlu0 %v6037_v62, %s4262_s6  ;;  %v3195_v10 = vld [vmem:[#allocation3 + $0x68] sm:$0xff] }
 0x35e   : > { %2138 = vrot.lane.b32.xlu1 %v5824_v26, %s4260_s23 }
 0x35f   : > { %v2575_v48 = vpop.permute.xlu1 %2574  ;;  %v2899_v17 = vpop.permute.xlu0 %2898 }
 0x360   : > { %v3186_v52 = vld [vmem:[#allocation3 + $0x20] sm:$0xff]  ;;  %2666 = vst.msk [vmem:[#allocation3 + $0x40] sm:$0xff] %vm955_vm6, %v2575_v48 }
 0x361   : > { %2991 = vst.msk [vmem:[#allocation3 + $0x30] sm:$0xff] %vm1283_vm8, %v2899_v17  ;;  %3435 = vmatmul.mubr.f32.gmra.mxu1 %v3186_v52  ;;  %2592 = vrot.lane.b32.xlu0 %v6107_v45, %s4263_s20 }
 0x362   : > { %3940 = vmatprep.mubr.msk.f32.mxu1 %vm189_vm0, %v3189_v38  ;;  %2268 = vrot.lane.b32.xlu1 %v5865_v16, %s4261_s4 }
 0x363   : > { %v2251_v26 = vpop.permute.xlu1 %2250  ;;  %v3029_v62 = vpop.permute.xlu0 %3028 }
 0x364   : > { %2341 = vst.msk [vmem:[#allocation3 + $0x50] sm:$0xff] %vm627_vm4, %v2251_v26 }
 0x365   : > { %3121 = vst.msk [vmem:[#allocation3 + $0x30] sm:$0xff] %vm1414_vm9, %v3029_v62  ;;  %2722 = vrot.lane.b32.xlu0 %v6181_v1, %s4264_s22 }
 0x366   : > { %2464 = vrot.lane.b32.xlu1 %v6072_v33, %s4262_s6 }
 0x367   : > { %v2447_v0 = vpop.permute.xlu1 %2446  ;;  %v2705_v2 = vpop.permute.xlu0 %2704 }
 0x368   : > { %2537 = vst.msk [vmem:[#allocation3 + $0x50] sm:$0xff] %vm824_vm5, %v2447_v0  ;;  %v3197_v0 = vld [vmem:[#allocation3 + $0x78] sm:$0xff] }
 0x369   : > { %2796 = vst.msk [vmem:[#allocation3 + $0x40] sm:$0xff] %vm1086_vm7, %v2705_v2  ;;  %2918 = vrot.lane.b32.xlu0 %v5754_v35, %s4265_s28 }
 0x36a   : > { %2594 = vrot.lane.b32.xlu1 %v6137_v60, %s4263_s20 }
 0x36b   : > { %v2577_v43 = vpop.permute.xlu1 %2576  ;;  %v2901_v13 = vpop.permute.xlu0 %2900 }
 0x36c   : > { %v3188_v33 = vld [vmem:[#allocation3 + $0x30] sm:$0xff]  ;;  %2667 = vst.msk [vmem:[#allocation3 + $0x50] sm:$0xff] %vm955_vm6, %v2577_v43 }
 0x36d   : > { %2992 = vst.msk [vmem:[#allocation3 + $0x40] sm:$0xff] %vm1283_vm8, %v2901_v13  ;;  %3440 = vmatmul.mubr.f32.gmra.mxu1 %v3188_v33  ;;  %3048 = vrot.lane.b32.xlu0 %v5807_v18, %s4266_s29 }
 0x36e   : > { %3941 = vmatprep.mubr.msk.f32.mxu1 %vm189_vm0, %v3191_v47  ;;  %2724 = vrot.lane.b32.xlu1 %v6202_v31, %s4264_s22 }
 0x36f   : > { %v2253_v35 = vpop.permute.xlu1 %2252  ;;  %v3031_v32 = vpop.permute.xlu0 %3030 }
 0x370   : > { %2342 = vst.msk [vmem:[#allocation3 + $0x60] sm:$0xff] %vm627_vm4, %v2253_v35 }
 0x371   : > { %3122 = vst.msk [vmem:[#allocation3 + $0x40] sm:$0xff] %vm1414_vm9, %v3031_v32  ;;  %2140 = vrot.lane.b32.xlu0 %v5838_v3, %s4260_s23 }
 0x372   : > { %2920 = vrot.lane.b32.xlu1 %v5805_v61, %s4265_s28  ;;  %v3193_v61 = vld [vmem:[#allocation3 + $0x58] sm:$0xff] }
 0x373   : > { %v2449_v5 = vpop.permute.xlu1 %2448  ;;  %v2707_v22 = vpop.permute.xlu0 %2706 }
 0x374   : > { %2538 = vst.msk [vmem:[#allocation3 + $0x60] sm:$0xff] %vm824_vm5, %v2449_v5 }
 0x375   : > { %2797 = vst.msk [vmem:[#allocation3 + $0x50] sm:$0xff] %vm1086_vm7, %v2707_v22  ;;  %2270 = vrot.lane.b32.xlu0 %v5869_v14, %s4261_s4 }
 0x376   : > { %3050 = vrot.lane.b32.xlu1 %v5840_v27, %s4266_s29 }
 0x377   : > { %v2579_v34 = vpop.permute.xlu1 %2578  ;;  %v2903_v42 = vpop.permute.xlu0 %2902 }
 0x378   : > { %v3190_v29 = vld [vmem:[#allocation3 + $0x40] sm:$0xff]  ;;  %2668 = vst.msk [vmem:[#allocation3 + $0x60] sm:$0xff] %vm955_vm6, %v2579_v34 }
 0x379   : > { %2993 = vst.msk [vmem:[#allocation3 + $0x50] sm:$0xff] %vm1283_vm8, %v2903_v42  ;;  %3445 = vmatmul.mubr.f32.gmra.mxu1 %v3190_v29  ;;  %2466 = vrot.lane.b32.xlu0 %v6107_v45, %s4262_s6  ;;  %v6233_v45 = vld [vmem:[#allocation2 + $0xe1] sm:$0xff] }
 0x37a   : > { %3942 = vmatprep.mubr.msk.f32.mxu1 %vm189_vm0, %v3193_v61  ;;  %2142 = vrot.lane.b32.xlu1 %v5865_v16, %s4260_s23  ;;  %v3201_v29 = vld [vmem:[#allocation3 + $0x98] sm:$0xff] }
 0x37b   : > { %v2255_v3 = vpop.permute.xlu1 %2254  ;;  %v3033_v20 = vpop.permute.xlu0 %3032 }
 0x37c   : > { %2343 = vst.msk [vmem:[#allocation3 + $0x70] sm:$0xff] %vm627_vm4, %v2255_v3 }
 0x37d   : > { %3123 = vst.msk [vmem:[#allocation3 + $0x50] sm:$0xff] %vm1414_vm9, %v3033_v20  ;;  %2596 = vrot.lane.b32.xlu0 %v6181_v1, %s4263_s20 }
 0x37e   : > { %2272 = vrot.lane.b32.xlu1 %v5916_v9, %s4261_s4 }
 0x37f   : > { %v2451_v7 = vpop.permute.xlu1 %2450  ;;  %v2709_v56 = vpop.permute.xlu0 %2708 }
 0x380   : > { %2539 = vst.msk [vmem:[#allocation3 + $0x70] sm:$0xff] %vm824_vm5, %v2451_v7 }
 0x381   : > { %2798 = vst.msk [vmem:[#allocation3 + $0x60] sm:$0xff] %vm1086_vm7, %v2709_v56  ;;  %2726 = vrot.lane.b32.xlu0 %v6233_v45, %s4264_s22 }
 0x382   : > { %2468 = vrot.lane.b32.xlu1 %v6137_v60, %s4262_s6  ;;  %v6250_v60 = vld [vmem:[#allocation2 + $0xf1] sm:$0xff] }
 0x383   : > { %v2581_v16 = vpop.permute.xlu1 %2580  ;;  %v2905_v57 = vpop.permute.xlu0 %2904 }
 0x384   : > { %v3192_v15 = vld [vmem:[#allocation3 + $0x50] sm:$0xff]  ;;  %2669 = vst.msk [vmem:[#allocation3 + $0x70] sm:$0xff] %vm955_vm6, %v2581_v16  ;;  %v3203_v16 = vld [vmem:[#allocation3 + $0xa8] sm:$0xff] }
 0x385   : > { %2994 = vst.msk [vmem:[#allocation3 + $0x60] sm:$0xff] %vm1283_vm8, %v2905_v57  ;;  %3450 = vmatmul.mubr.f32.gmra.mxu1 %v3192_v15  ;;  %2922 = vrot.lane.b32.xlu0 %v5807_v18, %s4265_s28 }
 0x386   : > { %3943 = vmatprep.mubr.msk.f32.mxu1 %vm189_vm0, %v3195_v10  ;;  %2598 = vrot.lane.b32.xlu1 %v6202_v31, %s4263_s20 }
 0x387   : > { %v2257_v48 = vpop.permute.xlu1 %2256  ;;  %v3035_v17 = vpop.permute.xlu0 %3034 }
 0x388   : > { %2344 = vst.msk [vmem:[#allocation3 + $0x80] sm:$0xff] %vm627_vm4, %v2257_v48 }
 0x389   : > { %3124 = vst.msk [vmem:[#allocation3 + $0x60] sm:$0xff] %vm1414_vm9, %v3035_v17  ;;  %3052 = vrot.lane.b32.xlu0 %v5849_v49, %s4266_s29 }
 0x38a   : > { %2728 = vrot.lane.b32.xlu1 %v6250_v60, %s4264_s22 }
 0x38b   : > { %v2453_v52 = vpop.permute.xlu1 %2452  ;;  %v2711_v38 = vpop.permute.xlu0 %2710 }
 0x38c   : > { %2540 = vst.msk [vmem:[#allocation3 + $0x80] sm:$0xff] %vm824_vm5, %v2453_v52 }
 0x38d   : > { %2799 = vst.msk [vmem:[#allocation3 + $0x70] sm:$0xff] %vm1086_vm7, %v2711_v38  ;;  %2144 = vrot.lane.b32.xlu0 %v5869_v14, %s4260_s23  ;;  %v3205_v38 = vld [vmem:[#allocation3 + $0xb8] sm:$0xff] }
 0x38e   : > { %2924 = vrot.lane.b32.xlu1 %v5840_v27, %s4265_s28 }
 0x38f   : > { %v2583_v18 = vpop.permute.xlu1 %2582  ;;  %v2907_v26 = vpop.permute.xlu0 %2906 }
 0x390   : > { %v3194_v62 = vld [vmem:[#allocation3 + $0x60] sm:$0xff]  ;;  %2670 = vst.msk [vmem:[#allocation3 + $0x80] sm:$0xff] %vm955_vm6, %v2583_v18 }
 0x391   : > { %2995 = vst.msk [vmem:[#allocation3 + $0x70] sm:$0xff] %vm1283_vm8, %v2907_v26  ;;  %3455 = vmatmul.mubr.f32.gmra.mxu1 %v3194_v62  ;;  %2274 = vrot.lane.b32.xlu0 %v5920_v53, %s4261_s4 }
 0x392   : > { %3944 = vmatprep.mubr.msk.f32.mxu1 %vm189_vm0, %v3197_v0  ;;  %3054 = vrot.lane.b32.xlu1 %v5871_v55, %s4266_s29 }
 0x393   : > { %v2259_v14 = vpop.permute.xlu1 %2258  ;;  %v3037_v2 = vpop.permute.xlu0 %3036 }
 0x394   : > { %2345 = vst.msk [vmem:[#allocation3 + $0x90] sm:$0xff] %vm627_vm4, %v2259_v14 }
 0x395   : > { %3125 = vst.msk [vmem:[#allocation3 + $0x70] sm:$0xff] %vm1414_vm9, %v3037_v2  ;;  %2470 = vrot.lane.b32.xlu0 %v6181_v1, %s4262_s6  ;;  %v6281_v1 = vld [vmem:[#allocation2 + $0xf9] sm:$0xff] }
 0x396   : > { %2146 = vrot.lane.b32.xlu1 %v5916_v9, %s4260_s23  ;;  %v3199_v9 = vld [vmem:[#allocation3 + $0x88] sm:$0xff] }
 0x397   : > { %v2455_v27 = vpop.permute.xlu1 %2454  ;;  %v2713_v43 = vpop.permute.xlu0 %2712 }
 0x398   : > { %2541 = vst.msk [vmem:[#allocation3 + $0x90] sm:$0xff] %vm824_vm5, %v2455_v27 }
 0x399   : > { %2800 = vst.msk [vmem:[#allocation3 + $0x80] sm:$0xff] %vm1086_vm7, %v2713_v43  ;;  %2600 = vrot.lane.b32.xlu0 %v6233_v45, %s4263_s20 }
 0x39a   : > { %2276 = vrot.lane.b32.xlu1 %v5955_v11, %s4261_s4 }
 0x39b   : > { %v2585_v13 = vpop.permute.xlu1 %2584  ;;  %v2909_v33 = vpop.permute.xlu0 %2908 }
 0x39c   : > { %v3196_v47 = vld [vmem:[#allocation3 + $0x70] sm:$0xff]  ;;  %2671 = vst.msk [vmem:[#allocation3 + $0x90] sm:$0xff] %vm955_vm6, %v2585_v13 }
 0x39d   : > { %2996 = vst.msk [vmem:[#allocation3 + $0x80] sm:$0xff] %vm1283_vm8, %v2909_v33  ;;  %3460 = vmatmul.mubr.f32.gmra.mxu1 %v3196_v47  ;;  %2730 = vrot.lane.b32.xlu0 %v6281_v1, %s4264_s22  ;;  %v6377_v47 = vld [vmem:[#allocation2 + $0x129] sm:$0xff] }
 0x39e   : > { %3945 = vmatprep.mubr.msk.f32.mxu1 %vm189_vm0, %v3199_v9  ;;  %2472 = vrot.lane.b32.xlu1 %v6202_v31, %s4262_s6  ;;  %v6298_v31 = vld [vmem:[#allocation2 + $0x109] sm:$0xff] }
 0x39f   : > { %v2261_v35 = vpop.permute.xlu1 %2260  ;;  %v3039_v32 = vpop.permute.xlu0 %3038 }
 0x3a0   : > { %2346 = vst.msk [vmem:[#allocation3 + $0xa0] sm:$0xff] %vm627_vm4, %v2261_v35 }
 0x3a1   : > { %3126 = vst.msk [vmem:[#allocation3 + $0x80] sm:$0xff] %vm1414_vm9, %v3039_v32  ;;  %2926 = vrot.lane.b32.xlu0 %v5849_v49, %s4265_s28 }
 0x3a2   : > { %2602 = vrot.lane.b32.xlu1 %v6250_v60, %s4263_s20 }
 0x3a3   : > { %v2457_v5 = vpop.permute.xlu1 %2456  ;;  %v2715_v22 = vpop.permute.xlu0 %2714 }
 0x3a4   : > { %2542 = vst.msk [vmem:[#allocation3 + $0xa0] sm:$0xff] %vm824_vm5, %v2457_v5  ;;  %v6395_v5 = vld [vmem:[#allocation2 + $0x139] sm:$0xff] }
 0x3a5   : > { %2801 = vst.msk [vmem:[#allocation3 + $0x90] sm:$0xff] %vm1086_vm7, %v2715_v22  ;;  %3056 = vrot.lane.b32.xlu0 %v5895_v37, %s4266_s29 }
 0x3a6   : > { %2732 = vrot.lane.b32.xlu1 %v6298_v31, %s4264_s22 }
 0x3a7   : > { %v2587_v34 = vpop.permute.xlu1 %2586  ;;  %v2911_v42 = vpop.permute.xlu0 %2910 }
 0x3a8   : > { %v3198_v49 = vld [vmem:[#allocation3 + $0x80] sm:$0xff]  ;;  %2672 = vst.msk [vmem:[#allocation3 + $0xa0] sm:$0xff] %vm955_vm6, %v2587_v34 }
 0x3a9   : > { %2997 = vst.msk [vmem:[#allocation3 + $0x90] sm:$0xff] %vm1283_vm8, %v2911_v42  ;;  %3465 = vmatmul.mubr.f32.gmra.mxu1 %v3198_v49  ;;  %2148 = vrot.lane.b32.xlu0 %v5920_v53, %s4260_s23 }
 0x3aa   : > { %3946 = vmatprep.mubr.msk.f32.mxu1 %vm189_vm0, %v3201_v29  ;;  %2928 = vrot.lane.b32.xlu1 %v5871_v55, %s4265_s28 }
 0x3ab   : > { %v3041_v61 = vpop.permute.xlu0 %3040  ;;  %v2263_v3 = vpop.permute.xlu1 %2262 }
 0x3ac   : > { %3127 = vst.msk [vmem:[#allocation3 + $0x90] sm:$0xff] %vm1414_vm9, %v3041_v61 }
 0x3ad   : > { %2347 = vst.msk [vmem:[#allocation3 + $0xb0] sm:$0xff] %vm627_vm4, %v2263_v3  ;;  %2278 = vrot.lane.b32.xlu0 %v5957_v59, %s4261_s4 }
 0x3ae   : > { %3058 = vrot.lane.b32.xlu1 %v5922_v41, %s4266_s29 }
 0x3af   : > { %v2717_v20 = vpop.permute.xlu0 %2716  ;;  %v2459_v7 = vpop.permute.xlu1 %2458 }
 0x3b0   : > { %2802 = vst.msk [vmem:[#allocation3 + $0xa0] sm:$0xff] %vm1086_vm7, %v2717_v20 }
 0x3b1   : > { %2543 = vst.msk [vmem:[#allocation3 + $0xb0] sm:$0xff] %vm824_vm5, %v2459_v7  ;;  %2474 = vrot.lane.b32.xlu0 %v6233_v45, %s4262_s6 }
 0x3b2   : > { %2150 = vrot.lane.b32.xlu1 %v5955_v11, %s4260_s23  ;;  %v6330_v11 = vld [vmem:[#allocation2 + $0x111] sm:$0xff] }
 0x3b3   : > { %v2913_v55 = vpop.permute.xlu0 %2912  ;;  %v2589_v53 = vpop.permute.xlu1 %2588  ;;  %v3200_v56 = vld [vmem:[#allocation3 + $0x90] sm:$0xff] }
 0x3b4   : > { %2998 = vst.msk [vmem:[#allocation3 + $0xa0] sm:$0xff] %vm1283_vm8, %v2913_v55  ;;  %3470 = vmatmul.mubr.f32.gmra.mxu1 %v3200_v56  ;;  %v6425_v55 = vld [vmem:[#allocation2 + $0x141] sm:$0xff] }
 0x3b5   : > { %2673 = vst.msk [vmem:[#allocation3 + $0xb0] sm:$0xff] %vm955_vm6, %v2589_v53  ;;  %3947 = vmatprep.mubr.msk.f32.mxu1 %vm189_vm0, %v3203_v16  ;;  %2604 = vrot.lane.b32.xlu0 %v6281_v1, %s4263_s20 }
 0x3b6   : > { %2280 = vrot.lane.b32.xlu1 %v5993_v8, %s4261_s4 }
 0x3b7   : > { %v3043_v45 = vpop.permute.xlu0 %3042  ;;  %v2265_v57 = vpop.permute.xlu1 %2264 }
 0x3b8   : > { %3128 = vst.msk [vmem:[#allocation3 + $0xa0] sm:$0xff] %vm1414_vm9, %v3043_v45 }
 0x3b9   : > { %2348 = vst.msk [vmem:[#allocation3 + $0xc0] sm:$0xff] %vm627_vm4, %v2265_v57  ;;  %2734 = vrot.lane.b32.xlu0 %v6330_v11, %s4264_s22  ;;  %v6443_v57 = vld [vmem:[#allocation2 + $0x151] sm:$0xff] }
 0x3ba   : > { %2476 = vrot.lane.b32.xlu1 %v6250_v60, %s4262_s6  ;;  %v6347_v60 = vld [vmem:[#allocation2 + $0x121] sm:$0xff] }
 0x3bb   : > { %v2719_v15 = vpop.permute.xlu0 %2718 }
 0x3bc   : > { %2803 = vst.msk [vmem:[#allocation3 + $0xb0] sm:$0xff] %vm1086_vm7, %v2719_v15  ;;  %v2461_v10 = vpop.permute.xlu1 %2460 }
 0x3bd   : > { %2544 = vst.msk [vmem:[#allocation3 + $0xc0] sm:$0xff] %vm824_vm5, %v2461_v10  ;;  %2930 = vrot.lane.b32.xlu0 %v5895_v37, %s4265_s28 }
 0x3be   : > { %2606 = vrot.lane.b32.xlu1 %v6298_v31, %s4263_s20 }
 0x3bf   : > { %v2915_v48 = vpop.permute.xlu0 %2914  ;;  %v3202_v17 = vld [vmem:[#allocation3 + $0xa0] sm:$0xff] }
 0x3c0   : > { %2999 = vst.msk [vmem:[#allocation3 + $0xb0] sm:$0xff] %vm1283_vm8, %v2915_v48  ;;  %v2591_v52 = vpop.permute.xlu1 %2590  ;;  %3475 = vmatmul.mubr.f32.gmra.mxu1 %v3202_v17 }
 0x3c1   : > { %2674 = vst.msk [vmem:[#allocation3 + $0xc0] sm:$0xff] %vm955_vm6, %v2591_v52  ;;  %3948 = vmatprep.mubr.msk.f32.mxu1 %vm189_vm0, %v3205_v38  ;;  %3060 = vrot.lane.b32.xlu0 %v5939_v21, %s4266_s29 }
 0x3c2   : > { %2736 = vrot.lane.b32.xlu1 %v6347_v60, %s4264_s22 }
 0x3c3   : > { %v3045_v37 = vpop.permute.xlu0 %3044 }
 0x3c4   : > { %3129 = vst.msk [vmem:[#allocation3 + $0xb0] sm:$0xff] %vm1414_vm9, %v3045_v37  ;;  %v2721_v18 = vpop.permute.xlu1 %2720 }
 0x3c5   : > { %2804 = vst.msk [vmem:[#allocation3 + $0xc0] sm:$0xff] %vm1086_vm7, %v2721_v18  ;;  %2152 = vrot.lane.b32.xlu0 %v5957_v59, %s4260_s23  ;;  %v3207_v59 = vld [vmem:[#allocation3 + $0xc8] sm:$0xff] }
 0x3c6   : > { %2932 = vrot.lane.b32.xlu1 %v5922_v41, %s4265_s28 }
 0x3c7   : > { %v2137_v26 = vpop.permute.xlu0 %2136 }
 0x3c8   : > { %2219 = vst.msk [vmem:[#allocation3 + $0xd0] sm:$0xff] %vm496_vm3, %v2137_v26  ;;  %v2917_v62 = vpop.permute.xlu1 %2916 }
 0x3c9   : > { %3000 = vst.msk [vmem:[#allocation3 + $0xc0] sm:$0xff] %vm1283_vm8, %v2917_v62  ;;  %2282 = vrot.lane.b32.xlu0 %v5995_v6, %s4261_s4 }
 0x3ca   : > { %3062 = vrot.lane.b32.xlu1 %v5964_v58, %s4266_s29 }
 0x3cb   : > { %v2267_v0 = vpop.permute.xlu0 %2266  ;;  %v3204_v14 = vld [vmem:[#allocation3 + $0xb0] sm:$0xff] }
 0x3cc   : > { %v3047_v2 = vpop.permute.xlu1 %3046  ;;  %2349 = vst.msk [vmem:[#allocation3 + $0xd0] sm:$0xff] %vm627_vm4, %v2267_v0  ;;  %3480 = vmatmul.mubr.f32.gmra.mxu1 %v3204_v14  ;;  %v6473_v14 = vld [vmem:[#allocation2 + $0x159] sm:$0xff] }
 0x3cd   : > { %3130 = vst.msk [vmem:[#allocation3 + $0xc0] sm:$0xff] %vm1414_vm9, %v3047_v2  ;;  %3949 = vmatprep.mubr.msk.f32.mxu1 %vm189_vm0, %v3207_v59  ;;  %2478 = vrot.lane.b32.xlu0 %v6281_v1, %s4262_s6  ;;  %v3217_v2 = vld [vmem:[#allocation3 + $0x118] sm:$0xff] }
 0x3ce   : > { %2154 = vrot.lane.b32.xlu1 %v5993_v8, %s4260_s23  ;;  %v3209_v8 = vld [vmem:[#allocation3 + $0xd8] sm:$0xff] }
 0x3cf   : > { %v2463_v41 = vpop.permute.xlu0 %2462 }
 0x3d0   : > { %v2139_v27 = vpop.permute.xlu1 %2138  ;;  %2545 = vst.msk [vmem:[#allocation3 + $0xd0] sm:$0xff] %vm824_vm5, %v2463_v41 }
 0x3d1   : > { %2220 = vst.msk [vmem:[#allocation3 + $0xe0] sm:$0xff] %vm496_vm3, %v2139_v27  ;;  %2608 = vrot.lane.b32.xlu0 %v6330_v11, %s4263_s20 }
 0x3d2   : > { %2284 = vrot.lane.b32.xlu1 %v6032_v40, %s4261_s4 }
 0x3d3   : > { %v2593_v43 = vpop.permute.xlu0 %2592 }
 0x3d4   : > { %2675 = vst.msk [vmem:[#allocation3 + $0xd0] sm:$0xff] %vm955_vm6, %v2593_v43  ;;  %v2269_v13 = vpop.permute.xlu1 %2268  ;;  %v3206_v33 = vld [vmem:[#allocation3 + $0xc0] sm:$0xff] }
 0x3d5   : > { %2350 = vst.msk [vmem:[#allocation3 + $0xe0] sm:$0xff] %vm627_vm4, %v2269_v13  ;;  %3485 = vmatmul.mubr.f32.gmra.mxu1 %v3206_v33  ;;  %2738 = vrot.lane.b32.xlu0 %v6377_v47, %s4264_s22 }
 0x3d6   : > { %3950 = vmatprep.mubr.msk.f32.mxu1 %vm189_vm0, %v3209_v8  ;;  %2480 = vrot.lane.b32.xlu1 %v6298_v31, %s4262_s6 }
 0x3d7   : > { %v2723_v9 = vpop.permute.xlu0 %2722 }
 0x3d8   : > { %2805 = vst.msk [vmem:[#allocation3 + $0xd0] sm:$0xff] %vm1086_vm7, %v2723_v9  ;;  %v2465_v1 = vpop.permute.xlu1 %2464 }
 0x3d9   : > { %2546 = vst.msk [vmem:[#allocation3 + $0xe0] sm:$0xff] %vm824_vm5, %v2465_v1  ;;  %2934 = vrot.lane.b32.xlu0 %v5939_v21, %s4265_s28 }
 0x3da   : > { %2610 = vrot.lane.b32.xlu1 %v6347_v60, %s4263_s20 }
 0x3db   : > { %v2919_v35 = vpop.permute.xlu0 %2918 }
 0x3dc   : > { %3001 = vst.msk [vmem:[#allocation3 + $0xd0] sm:$0xff] %vm1283_vm8, %v2919_v35  ;;  %v2595_v32 = vpop.permute.xlu1 %2594 }
 0x3dd   : > { %2676 = vst.msk [vmem:[#allocation3 + $0xe0] sm:$0xff] %vm955_vm6, %v2595_v32  ;;  %3064 = vrot.lane.b32.xlu0 %v5977_v54, %s4266_s29 }
 0x3de   : > { %2740 = vrot.lane.b32.xlu1 %v6395_v5, %s4264_s22 }
 0x3df   : > { %v3049_v22 = vpop.permute.xlu0 %3048 }
 0x3e0   : > { %3131 = vst.msk [vmem:[#allocation3 + $0xd0] sm:$0xff] %vm1414_vm9, %v3049_v22  ;;  %v2725_v21 = vpop.permute.xlu1 %2724 }
 0x3e1   : > { %2806 = vst.msk [vmem:[#allocation3 + $0xe0] sm:$0xff] %vm1086_vm7, %v2725_v21  ;;  %2156 = vrot.lane.b32.xlu0 %v5995_v6, %s4260_s23  ;;  %v3211_v6 = vld [vmem:[#allocation3 + $0xe8] sm:$0xff] }
 0x3e2   : > { %2936 = vrot.lane.b32.xlu1 %v5964_v58, %s4265_s28 }
 0x3e3   : > { %v2141_v31 = vpop.permute.xlu0 %2140 }
 0x3e4   : > { %2221 = vst.msk [vmem:[#allocation3 + $0xf0] sm:$0xff] %vm496_vm3, %v2141_v31  ;;  %v2921_v34 = vpop.permute.xlu1 %2920 }
 0x3e5   : > { %3002 = vst.msk [vmem:[#allocation3 + $0xe0] sm:$0xff] %vm1283_vm8, %v2921_v34  ;;  %2286 = vrot.lane.b32.xlu0 %v6034_v50, %s4261_s4  ;;  %v3219_v34 = vld [vmem:[#allocation3 + $0x128] sm:$0xff] }
 0x3e6   : > { %3066 = vrot.lane.b32.xlu1 %v6002_v36, %s4266_s29 }
 0x3e7   : > { %v2271_v42 = vpop.permute.xlu0 %2270  ;;  %v3208_v49 = vld [vmem:[#allocation3 + $0xd0] sm:$0xff] }
 0x3e8   : > { %v3051_v29 = vpop.permute.xlu1 %3050  ;;  %2351 = vst.msk [vmem:[#allocation3 + $0xf0] sm:$0xff] %vm627_vm4, %v2271_v42  ;;  %3490 = vmatmul.mubr.f32.gmra.mxu1 %v3208_v49 }
 0x3e9   : > { %3132 = vst.msk [vmem:[#allocation3 + $0xe0] sm:$0xff] %vm1414_vm9, %v3051_v29  ;;  %3951 = vmatprep.mubr.msk.f32.mxu1 %vm189_vm0, %v3211_v6  ;;  %2482 = vrot.lane.b32.xlu0 %v6330_v11, %s4262_s6 }
 0x3ea   : > { %2158 = vrot.lane.b32.xlu1 %v6032_v40, %s4260_s23  ;;  %v3213_v40 = vld [vmem:[#allocation3 + $0xf8] sm:$0xff] }
 0x3eb   : > { %v2467_v58 = vpop.permute.xlu0 %2466 }
 0x3ec   : > { %v2143_v61 = vpop.permute.xlu1 %2142  ;;  %2547 = vst.msk [vmem:[#allocation3 + $0xf0] sm:$0xff] %vm824_vm5, %v2467_v58 }
 0x3ed   : > { %2222 = vst.msk [vmem:[#allocation3 + $0x100] sm:$0xff] %vm496_vm3, %v2143_v61  ;;  %2612 = vrot.lane.b32.xlu0 %v6377_v47, %s4263_s20  ;;  %v6518_v61 = vld [vmem:[#allocation2 + $0x180] sm:$0xff] }
 0x3ee   : > { %2288 = vrot.lane.b32.xlu1 %v6078_v46, %s4261_s4 }
 0x3ef   : > { %v2597_v3 = vpop.permute.xlu0 %2596 }
 0x3f0   : > { %2677 = vst.msk [vmem:[#allocation3 + $0xf0] sm:$0xff] %vm955_vm6, %v2597_v3  ;;  %v2273_v20 = vpop.permute.xlu1 %2272  ;;  %v3210_v7 = vld [vmem:[#allocation3 + $0xe0] sm:$0xff] }
 0x3f1   : > { %2352 = vst.msk [vmem:[#allocation3 + $0x100] sm:$0xff] %vm627_vm4, %v2273_v20  ;;  %3495 = vmatmul.mubr.f32.gmra.mxu1 %v3210_v7  ;;  %2742 = vrot.lane.b32.xlu0 %v6425_v55, %s4264_s22 }
 0x3f2   : > { %3952 = vmatprep.mubr.msk.f32.mxu1 %vm189_vm0, %v3213_v40  ;;  %2484 = vrot.lane.b32.xlu1 %v6347_v60, %s4262_s6  ;;  %v6523_v40 = vld [vmem:[#allocation2 + $0x171] sm:$0xff] }
 0x3f3   : > { %v2727_v53 = vpop.permute.xlu0 %2726 }
 0x3f4   : > { %2807 = vst.msk [vmem:[#allocation3 + $0xf0] sm:$0xff] %vm1086_vm7, %v2727_v53  ;;  %v2469_v56 = vpop.permute.xlu1 %2468  ;;  %v3221_v53 = vld [vmem:[#allocation3 + $0x138] sm:$0xff] }
 0x3f5   : > { %2548 = vst.msk [vmem:[#allocation3 + $0x100] sm:$0xff] %vm824_vm5, %v2469_v56  ;;  %2938 = vrot.lane.b32.xlu0 %v5977_v54, %s4265_s28 }
 0x3f6   : > { %2614 = vrot.lane.b32.xlu1 %v6395_v5, %s4263_s20 }
 0x3f7   : > { %v2923_v16 = vpop.permute.xlu0 %2922 }
 0x3f8   : > { %3003 = vst.msk [vmem:[#allocation3 + $0xf0] sm:$0xff] %vm1283_vm8, %v2923_v16  ;;  %v2599_v45 = vpop.permute.xlu1 %2598 }
 0x3f9   : > { %2678 = vst.msk [vmem:[#allocation3 + $0x100] sm:$0xff] %vm955_vm6, %v2599_v45  ;;  %3068 = vrot.lane.b32.xlu0 %v6017_v24, %s4266_s29 }
 0x3fa   : > { %2744 = vrot.lane.b32.xlu1 %v6443_v57, %s4264_s22 }
 0x3fb   : > { %v3053_v11 = vpop.permute.xlu0 %3052 }
 0x3fc   : > { %3133 = vst.msk [vmem:[#allocation3 + $0xf0] sm:$0xff] %vm1414_vm9, %v3053_v11  ;;  %v2729_v54 = vpop.permute.xlu1 %2728 }
 0x3fd   : > { %2808 = vst.msk [vmem:[#allocation3 + $0x100] sm:$0xff] %vm1086_vm7, %v2729_v54  ;;  %2160 = vrot.lane.b32.xlu0 %v6034_v50, %s4260_s23  ;;  %v3215_v50 = vld [vmem:[#allocation3 + $0x108] sm:$0xff] }
 0x3fe   : > { %2940 = vrot.lane.b32.xlu1 %v6002_v36, %s4265_s28 }
 0x3ff   : > { %v2145_v15 = vpop.permute.xlu0 %2144 }
 0x400   : > { %2223 = vst.msk [vmem:[#allocation3 + $0x110] sm:$0xff] %vm496_vm3, %v2145_v15  ;;  %v2925_v10 = vpop.permute.xlu1 %2924 }
 0x401   : > { %3004 = vst.msk [vmem:[#allocation3 + $0x100] sm:$0xff] %vm1283_vm8, %v2925_v10  ;;  %2290 = vrot.lane.b32.xlu0 %v6080_v39, %s4261_s4 }
 0x402   : > { %3070 = vrot.lane.b32.xlu1 %v6043_v25, %s4266_s29 }
 0x403   : > { %v2275_v48 = vpop.permute.xlu0 %2274  ;;  %v3212_v17 = vld [vmem:[#allocation3 + $0xf0] sm:$0xff] }
 0x404   : > { %v3055_v52 = vpop.permute.xlu1 %3054  ;;  %2353 = vst.msk [vmem:[#allocation3 + $0x110] sm:$0xff] %vm627_vm4, %v2275_v48  ;;  %3500 = vmatmul.mubr.f32.gmra.mxu1 %v3212_v17  ;;  %v6547_v17 = vld [vmem:[#allocation2 + $0x181] sm:$0xff] }
 0x405   : > { %3134 = vst.msk [vmem:[#allocation3 + $0x100] sm:$0xff] %vm1414_vm9, %v3055_v52  ;;  %3953 = vmatprep.mubr.msk.f32.mxu1 %vm189_vm0, %v3215_v50  ;;  %2486 = vrot.lane.b32.xlu0 %v6377_v47, %s4262_s6  ;;  %v6491_v47 = vld [vmem:[#allocation2 + $0x169] sm:$0xff] }
 0x406   : > { %2162 = vrot.lane.b32.xlu1 %v6078_v46, %s4260_s23 }
 0x407   : > { %v2471_v36 = vpop.permute.xlu0 %2470 }
 0x408   : > { %v2147_v38 = vpop.permute.xlu1 %2146  ;;  %2549 = vst.msk [vmem:[#allocation3 + $0x110] sm:$0xff] %vm824_vm5, %v2471_v36 }
 0x409   : > { %v3426_v60 = vpop.f32.mrf.mxu1  ;;  %2224 = vst.msk [vmem:[#allocation3 + $0x120] sm:$0xff] %vm496_vm3, %v2147_v38  ;;  %2616 = vrot.lane.b32.xlu0 %v6425_v55, %s4263_s20 }
 0x40a   : > { %v3585_v37 = vsub.f32 0.0, %v3426_v60  ;;  %2292 = vrot.lane.b32.xlu1 %v6123_v12, %s4261_s4 }
 0x40b   : > { %v3428_v18 = vpop.f32.mrf.mxu1  ;;  %v2601_v62 = vpop.permute.xlu0 %2600 }
 0x40c   : > { %v3617_v26 = vmul.f32 1.442695, %v3585_v37  ;;  %2679 = vst.msk [vmem:[#allocation3 + $0x110] sm:$0xff] %vm955_vm6, %v2601_v62  ;;  %v2277_v46 = vpop.permute.xlu1 %2276  ;;  %v3214_v0 = vld [vmem:[#allocation3 + $0x100] sm:$0xff] }
 0x40d   : > { %2354 = vst.msk [vmem:[#allocation3 + $0x120] sm:$0xff] %vm627_vm4, %v2277_v46  ;;  %3505 = vmatmul.mubr.f32.gmra.mxu1 %v3214_v0  ;;  %2746 = vrot.lane.b32.xlu0 %v6473_v14, %s4264_s22 }
 0x40e   : > { %4034 = vpow2.f32 %v3617_v26  ;;  %3954 = vmatprep.mubr.msk.f32.mxu1 %vm189_vm0, %v3217_v2  ;;  %2488 = vrot.lane.b32.xlu1 %v6395_v5, %s4262_s6  ;;  %v6560_v26 = vld [vmem:[#allocation2 + $0x188] sm:$0xff] }
 0x40f   : > { %v2731_v59 = vpop.permute.xlu0 %2730 }
 0x410   : > { %2809 = vst.msk [vmem:[#allocation3 + $0x110] sm:$0xff] %vm1086_vm7, %v2731_v59  ;;  %v2473_v41 = vpop.permute.xlu1 %2472  ;;  %v3223_v59 = vld [vmem:[#allocation3 + $0x148] sm:$0xff] }
 0x411   : > { %2550 = vst.msk [vmem:[#allocation3 + $0x120] sm:$0xff] %vm824_vm5, %v2473_v41  ;;  %2942 = vrot.lane.b32.xlu0 %v6017_v24, %s4265_s28 }
 0x412   : > { %2618 = vrot.lane.b32.xlu1 %v6443_v57, %s4263_s20 }
 0x413   : > { %v2927_v27 = vpop.permute.xlu0 %2926 }
 0x414   : > { %3005 = vst.msk [vmem:[#allocation3 + $0x110] sm:$0xff] %vm1283_vm8, %v2927_v27  ;;  %v2603_v43 = vpop.permute.xlu1 %2602 }
 0x415   : > { %v3431_v13 = vpop.f32.mrf.mxu1  ;;  %2680 = vst.msk [vmem:[#allocation3 + $0x120] sm:$0xff] %vm955_vm6, %v2603_v43  ;;  %3072 = vrot.lane.b32.xlu0 %v6059_v30, %s4266_s29 }
 0x416   : > { %v3586_v33 = vsub.f32 0.0, %v3431_v13  ;;  %2748 = vrot.lane.b32.xlu1 %v6491_v47, %s4264_s22  ;;  %v2044_v13 = vld [vmem:[#allocation2 + $0x198] sm:$0xff] }
 0x417   : > { %v3433_v24 = vpop.f32.mrf.mxu1  ;;  %v3057_v9 = vpop.permute.xlu0 %3056 }
 0x418   : > { %v3619_v8 = vmul.f32 1.442695, %v3586_v33  ;;  %3135 = vst.msk [vmem:[#allocation3 + $0x110] sm:$0xff] %vm1414_vm9, %v3057_v9  ;;  %v2733_v1 = vpop.permute.xlu1 %2732 }
 0x419   : > { %2810 = vst.msk [vmem:[#allocation3 + $0x120] sm:$0xff] %vm1086_vm7, %v2733_v1  ;;  %2164 = vrot.lane.b32.xlu0 %v6080_v39, %s4260_s23 }
 0x41a   : > { %4036 = vpow2.f32 %v3619_v8  ;;  %2944 = vrot.lane.b32.xlu1 %v6043_v25, %s4265_s28 }
 0x41b   : > { %v4035_v35 = vpop.eup %4034  ;;  %v2149_v5 = vpop.permute.xlu0 %2148 }
 0x41c   : > { %v3681_v32 = vadd.f32 1.0, %v4035_v35  ;;  %2225 = vst.msk [vmem:[#allocation3 + $0x130] sm:$0xff] %vm496_vm3, %v2149_v5  ;;  %v2929_v22 = vpop.permute.xlu1 %2928  ;;  %v6582_v35 = vld [vmem:[#allocation2 + $0x189] sm:$0xff] }
 0x41d   : > { %3006 = vst.msk [vmem:[#allocation3 + $0x120] sm:$0xff] %vm1283_vm8, %v2929_v22  ;;  %2294 = vrot.lane.b32.xlu0 %v6125_v4, %s4261_s4  ;;  %v3225_v5 = vld [vmem:[#allocation3 + $0x158] sm:$0xff] }
 0x41e   : > { %4038 = vrcp.f32 %v3681_v32  ;;  %3074 = vrot.lane.b32.xlu1 %v6088_v28, %s4266_s29 }
 0x41f   : > { %v2279_v21 = vpop.permute.xlu0 %2278  ;;  %v3216_v39 = vld [vmem:[#allocation3 + $0x110] sm:$0xff] }
 0x420   : > { %v3059_v31 = vpop.permute.xlu1 %3058  ;;  %2355 = vst.msk [vmem:[#allocation3 + $0x130] sm:$0xff] %vm627_vm4, %v2279_v21  ;;  %3510 = vmatmul.mubr.f32.gmra.mxu1 %v3216_v39 }
 0x421   : > { %v3436_v25 = vpop.f32.mrf.mxu1  ;;  %3136 = vst.msk [vmem:[#allocation3 + $0x120] sm:$0xff] %vm1414_vm9, %v3059_v31  ;;  %3955 = vmatprep.mubr.msk.f32.mxu1 %vm189_vm0, %v3219_v34  ;;  %2490 = vrot.lane.b32.xlu0 %v6425_v55, %s4262_s6 }
 0x422   : > { %v3587_v42 = vsub.f32 0.0, %v3436_v25  ;;  %2166 = vrot.lane.b32.xlu1 %v6123_v12, %s4260_s23 }
 0x423   : > { %v3438_v49 = vpop.f32.mrf.mxu1  ;;  %v2475_v6 = vpop.permute.xlu0 %2474 }
 0x424   : > { %v3621_v29 = vmul.f32 1.442695, %v3587_v42  ;;  %v2151_v58 = vpop.permute.xlu1 %2150  ;;  %2551 = vst.msk [vmem:[#allocation3 + $0x130] sm:$0xff] %vm824_vm5, %v2475_v6 }
 0x425   : > { %2226 = vst.msk [vmem:[#allocation3 + $0x140] sm:$0xff] %vm496_vm3, %v2151_v58  ;;  %2620 = vrot.lane.b32.xlu0 %v6473_v14, %s4263_s20 }
 0x426   : > { %4040 = vpow2.f32 %v3621_v29  ;;  %2296 = vrot.lane.b32.xlu1 %v6518_v61, %s4261_s4 }
 0x427   : > { %v4037_v3 = vpop.eup %4036  ;;  %v2605_v20 = vpop.permute.xlu0 %2604 }
 0x428   : > { %v3682_v12 = vadd.f32 1.0, %v4037_v3  ;;  %2681 = vst.msk [vmem:[#allocation3 + $0x130] sm:$0xff] %vm955_vm6, %v2605_v20  ;;  %v2281_v7 = vpop.permute.xlu1 %2280  ;;  %v3218_v55 = vld [vmem:[#allocation3 + $0x120] sm:$0xff] }
 0x429   : > { %2356 = vst.msk [vmem:[#allocation3 + $0x140] sm:$0xff] %vm627_vm4, %v2281_v7  ;;  %3515 = vmatmul.mubr.f32.gmra.mxu1 %v3218_v55  ;;  %2750 = vrot.lane.b32.xlu0 %v6523_v40, %s4264_s22 }
 0x42a   : > { %4042 = vrcp.f32 %v3682_v12  ;;  %3956 = vmatprep.mubr.msk.f32.mxu1 %vm189_vm0, %v3221_v53  ;;  %2492 = vrot.lane.b32.xlu1 %v6443_v57, %s4262_s6  ;;  %v2045_v12 = vld [vmem:[#allocation2 + $0x1a0] sm:$0xff] }
 0x42b   : > { %v4039_v56 = vpop.eup %4038  ;;  %v2735_v16 = vpop.permute.xlu0 %2734 }
 0x42c   : > { %3777 = vst.msk [vmem:[%s6533_s8] sm:$0xff] %vm189_vm0, %v4039_v56  ;;  %v2477_v45 = vpop.permute.xlu1 %2476 }
 0x42d   : > { %2811 = vst.msk [vmem:[#allocation3 + $0x130] sm:$0xff] %vm1086_vm7, %v2735_v16  ;;  %v3441_v11 = vpop.f32.mrf.mxu1  ;;  %2946 = vrot.lane.b32.xlu0 %v6059_v30, %s4265_s28 }
 0x42e   : > { %2552 = vst.msk [vmem:[#allocation3 + $0x140] sm:$0xff] %vm824_vm5, %v2477_v45  ;;  %v3588_v54 = vsub.f32 0.0, %v3441_v11  ;;  %2622 = vrot.lane.b32.xlu1 %v6491_v47, %s4263_s20  ;;  %v2403_v45 = vld [vmem:[#allocation2 + $0x1a1] sm:$0xff] }
 0x42f   : > { %v3443_v57 = vpop.f32.mrf.mxu1  ;;  %v2931_v10 = vpop.permute.xlu0 %2930 }
 0x430   : > { %v3623_v15 = vmul.f32 1.442695, %v3588_v54  ;;  %3007 = vst.msk [vmem:[#allocation3 + $0x130] sm:$0xff] %vm1283_vm8, %v2931_v10  ;;  %v2607_v48 = vpop.permute.xlu1 %2606  ;;  %v3227_v54 = vld [vmem:[#allocation3 + $0x168] sm:$0xff] }
 0x431   : > { %2682 = vst.msk [vmem:[#allocation3 + $0x140] sm:$0xff] %vm955_vm6, %v2607_v48  ;;  %3076 = vrot.lane.b32.xlu0 %v6103_v51, %s4266_s29 }
 0x432   : > { %4044 = vpow2.f32 %v3623_v15  ;;  %2752 = vrot.lane.b32.xlu1 %v6547_v17, %s4264_s22 }
 0x433   : > { %v4041_v52 = vpop.eup %4040  ;;  %v3061_v50 = vpop.permute.xlu0 %3060 }
 0x434   : > { %v3683_v30 = vadd.f32 1.0, %v4041_v52  ;;  %3137 = vst.msk [vmem:[#allocation3 + $0x130] sm:$0xff] %vm1414_vm9, %v3061_v50  ;;  %v2737_v36 = vpop.permute.xlu1 %2736 }
 0x435   : > { %2812 = vst.msk [vmem:[#allocation3 + $0x140] sm:$0xff] %vm1086_vm7, %v2737_v36  ;;  %2168 = vrot.lane.b32.xlu0 %v6125_v4, %s4260_s23  ;;  %v3229_v36 = vld [vmem:[#allocation3 + $0x178] sm:$0xff] }
 0x436   : > { %4046 = vrcp.f32 %v3683_v30  ;;  %2948 = vrot.lane.b32.xlu1 %v6088_v28, %s4265_s28 }
 0x437   : > { %v4043_v38 = vpop.eup %4042  ;;  %v2153_v60 = vpop.permute.xlu0 %2152 }
 0x438   : > { %3778 = vst.msk [vmem:[%s6533_s8 + $0x8] sm:$0xff] %vm189_vm0, %v4043_v38  ;;  %v2933_v37 = vpop.permute.xlu1 %2932 }
 0x439   : > { %2227 = vst.msk [vmem:[#allocation3 + $0x150] sm:$0xff] %vm496_vm3, %v2153_v60  ;;  %v3446_v18 = vpop.f32.mrf.mxu1  ;;  %2298 = vrot.lane.b32.xlu0 %v6560_v26, %s4261_s4 }
 0x43a   : > { %3008 = vst.msk [vmem:[#allocation3 + $0x140] sm:$0xff] %vm1283_vm8, %v2933_v37  ;;  %v3589_v62 = vsub.f32 0.0, %v3446_v18  ;;  %3078 = vrot.lane.b32.xlu1 %v6133_v23, %s4266_s29 }
 0x43b   : > { %v3448_v4 = vpop.f32.mrf.mxu1  ;;  %v2283_v46 = vpop.permute.xlu0 %2282  ;;  %v3220_v0 = vld [vmem:[#allocation3 + $0x130] sm:$0xff] }
 0x43c   : > { %v3625_v28 = vmul.f32 1.442695, %v3589_v62  ;;  %v3063_v2 = vpop.permute.xlu1 %3062  ;;  %2357 = vst.msk [vmem:[#allocation3 + $0x150] sm:$0xff] %vm627_vm4, %v2283_v46  ;;  %3520 = vmatmul.mubr.f32.gmra.mxu1 %v3220_v0 }
 0x43d   : > { %3138 = vst.msk [vmem:[#allocation3 + $0x140] sm:$0xff] %vm1414_vm9, %v3063_v2  ;;  %3957 = vmatprep.mubr.msk.f32.mxu1 %vm189_vm0, %v3223_v59  ;;  %2494 = vrot.lane.b32.xlu0 %v6473_v14, %s4262_s6 }
 0x43e   : > { %4048 = vpow2.f32 %v3625_v28  ;;  %2170 = vrot.lane.b32.xlu1 %v6518_v61, %s4260_s23 }
 0x43f   : > { %v4045_v41 = vpop.eup %4044  ;;  %v2479_v43 = vpop.permute.xlu0 %2478 }
 0x440   : > { %v3684_v27 = vadd.f32 1.0, %v4045_v41  ;;  %v2155_v33 = vpop.permute.xlu1 %2154  ;;  %2553 = vst.msk [vmem:[#allocation3 + $0x150] sm:$0xff] %vm824_vm5, %v2479_v43 }
 0x441   : > { %2228 = vst.msk [vmem:[#allocation3 + $0x160] sm:$0xff] %vm496_vm3, %v2155_v33  ;;  %2624 = vrot.lane.b32.xlu0 %v6523_v40, %s4263_s20 }
 0x442   : > { %4050 = vrcp.f32 %v3684_v27  ;;  %2300 = vrot.lane.b32.xlu1 %v2044_v13, %s4261_s4 }
 0x443   : > { %v4047_v24 = vpop.eup %4046  ;;  %v2609_v14 = vpop.permute.xlu0 %2608 }
 0x444   : > { %3779 = vst.msk [vmem:[%s6533_s8 + $0x10] sm:$0xff] %vm189_vm0, %v4047_v24  ;;  %v2285_v8 = vpop.permute.xlu1 %2284  ;;  %v3222_v1 = vld [vmem:[#allocation3 + $0x140] sm:$0xff] }
 0x445   : > { %2683 = vst.msk [vmem:[#allocation3 + $0x150] sm:$0xff] %vm955_vm6, %v2609_v14  ;;  %v3451_v9 = vpop.f32.mrf.mxu1  ;;  %3525 = vmatmul.mubr.f32.gmra.mxu1 %v3222_v1  ;;  %2754 = vrot.lane.b32.xlu0 %v6582_v35, %s4264_s22 }
 0x446   : > { %2358 = vst.msk [vmem:[#allocation3 + $0x160] sm:$0xff] %vm627_vm4, %v2285_v8  ;;  %v3590_v32 = vsub.f32 0.0, %v3451_v9  ;;  %3958 = vmatprep.mubr.msk.f32.mxu1 %vm189_vm0, %v3225_v5  ;;  %2496 = vrot.lane.b32.xlu1 %v6491_v47, %s4262_s6  ;;  %v2402_v47 = vld [vmem:[#allocation2 + $0x199] sm:$0xff] }
 0x447   : > { %v3453_v22 = vpop.f32.mrf.mxu1  ;;  %v2739_v39 = vpop.permute.xlu0 %2738  ;;  %v3231_v9 = vld [vmem:[#allocation3 + $0x188] sm:$0xff] }
 0x448   : > { %v3627_v21 = vmul.f32 1.442695, %v3590_v32  ;;  %2813 = vst.msk [vmem:[#allocation3 + $0x150] sm:$0xff] %vm1086_vm7, %v2739_v39  ;;  %v2481_v31 = vpop.permute.xlu1 %2480 }
 0x449   : > { %2554 = vst.msk [vmem:[#allocation3 + $0x160] sm:$0xff] %vm824_vm5, %v2481_v31  ;;  %2950 = vrot.lane.b32.xlu0 %v6103_v51, %s4265_s28 }
 0x44a   : > { %4052 = vpow2.f32 %v3627_v21  ;;  %2626 = vrot.lane.b32.xlu1 %v6547_v17, %s4263_s20 }
 0x44b   : > { %v4049_v25 = vpop.eup %4048  ;;  %v2935_v42 = vpop.permute.xlu0 %2934 }
 0x44c   : > { %v3685_v34 = vadd.f32 1.0, %v4049_v25  ;;  %3009 = vst.msk [vmem:[#allocation3 + $0x150] sm:$0xff] %vm1283_vm8, %v2935_v42  ;;  %v2611_v49 = vpop.permute.xlu1 %2610  ;;  %v3233_v42 = vld [vmem:[#allocation3 + $0x198] sm:$0xff] }
 0x44d   : > { %2684 = vst.msk [vmem:[#allocation3 + $0x160] sm:$0xff] %vm955_vm6, %v2611_v49  ;;  %3080 = vrot.lane.b32.xlu0 %v6151_v44, %s4266_s29 }
 0x44e   : > { %4054 = vrcp.f32 %v3685_v34  ;;  %2756 = vrot.lane.b32.xlu1 %v2402_v47, %s4264_s22 }
 0x44f   : > { %v4051_v29 = vpop.eup %4050  ;;  %v3065_v51 = vpop.permute.xlu0 %3064 }
 0x450   : > { %3780 = vst.msk [vmem:[%s6533_s8 + $0x18] sm:$0xff] %vm189_vm0, %v4051_v29  ;;  %v2741_v6 = vpop.permute.xlu1 %2740 }
 0x451   : > { %3139 = vst.msk [vmem:[#allocation3 + $0x150] sm:$0xff] %vm1414_vm9, %v3065_v51  ;;  %v3456_v58 = vpop.f32.mrf.mxu1  ;;  %2172 = vrot.lane.b32.xlu0 %v6560_v26, %s4260_s23  ;;  %s3823_s23 = sshll.u32 %s6533_s8, 4  ;;  %s6757_s23 = int_to_ptr.vmem [resolvable:$true] %s3823_s23 }
 0x452   : > { %2814 = vst.msk [vmem:[#allocation3 + $0x160] sm:$0xff] %vm1086_vm7, %v2741_v6  ;;  %v3591_v61 = vsub.f32 0.0, %v3456_v58  ;;  %2952 = vrot.lane.b32.xlu1 %v6133_v23, %s4265_s28 }
 0x453   : > { %v3458_v3 = vpop.f32.mrf.mxu1  ;;  %v2157_v7 = vpop.permute.xlu0 %2156 }
 0x454   : > { %v3629_v20 = vmul.f32 1.442695, %v3591_v61  ;;  %2229 = vst.msk [vmem:[#allocation3 + $0x170] sm:$0xff] %vm496_vm3, %v2157_v7  ;;  %v2937_v55 = vpop.permute.xlu1 %2936 }
 0x455   : > { %3010 = vst.msk [vmem:[#allocation3 + $0x160] sm:$0xff] %vm1283_vm8, %v2937_v55  ;;  %2302 = vrot.lane.b32.xlu0 %v2045_v12, %s4261_s4 }
 0x456   : > { %4056 = vpow2.f32 %v3629_v20  ;;  %3082 = vrot.lane.b32.xlu1 %v6170_v19, %s4266_s29 }
 0x457   : > { %v4053_v53 = vpop.eup %4052  ;;  %v2287_v16 = vpop.permute.xlu0 %2286 }
 0x458   : > { %v3686_v56 = vadd.f32 1.0, %v4053_v53  ;;  %v3224_v23 = vld [vmem:[#allocation3 + $0x150] sm:$0xff]  ;;  %v3067_v11 = vpop.permute.xlu1 %3066  ;;  %2359 = vst.msk [vmem:[#allocation3 + $0x170] sm:$0xff] %vm627_vm4, %v2287_v16 }
 0x459   : > { %3530 = vmatmul.mubr.f32.gmra.mxu1 %v3224_v23  ;;  %3140 = vst.msk [vmem:[#allocation3 + $0x160] sm:$0xff] %vm1414_vm9, %v3067_v11  ;;  %2498 = vrot.lane.b32.xlu0 %v6523_v40, %s4262_s6 }
 0x45a   : > { %4058 = vrcp.f32 %v3686_v56  ;;  %3959 = vmatprep.mubr.msk.f32.mxu1 %vm189_vm0, %v3227_v54  ;;  %2758 = vrot.lane.b32.xlu1 %v2403_v45, %s4264_s22  ;;  %s3810_s22 = scalar_lea.sflag [#allocation6], %s4387_s5 }
 0x45b   : > { %v4055_v57 = vpop.eup %4054  ;;  %v2483_v19 = vpop.permute.xlu0 %2482 }
 0x45c   : > { %3781 = vst.msk [vmem:[%s6533_s8 + $0x20] sm:$0xff] %vm189_vm0, %v4055_v57  ;;  %v2159_v15 = vpop.permute.xlu1 %2158 }
 0x45d   : > { %2555 = vst.msk [vmem:[#allocation3 + $0x170] sm:$0xff] %vm824_vm5, %v2483_v19  ;;  %v3461_v10 = vpop.f32.mrf.mxu1  ;;  %2628 = vrot.lane.b32.xlu0 %v6582_v35, %s4263_s20  ;;  %s6755_s20 = scalar_lea.hbm %s6805_s3, %s3975_s9 }
 0x45e   : > { %2230 = vst.msk [vmem:[#allocation3 + $0x180] sm:$0xff] %vm496_vm3, %v2159_v15  ;;  %v3592_v48 = vsub.f32 0.0, %v3461_v10  ;;  %3084 = vrot.lane.b32.xlu1 %v6187_v63, %s4266_s29  ;;  %s4194_s29 = sshll.u32 %s4267_s16, 4  ;;  %s4195_s29 = int_to_ptr.vmem [resolvable:$false] %s4194_s29 }
 0x45f   : > { %v3463_v40 = vpop.f32.mrf.mxu1  ;;  %v2613_v52 = vpop.permute.xlu0 %2612  ;;  %s4196_s17 = scalar_lea.vmem %s4195_s29, 8192  ;;  %p4197_p5 = scmp.lt.s32.totalorder %s6757_s23, %s4195_s29 }
 0x460   : > { %v3631_v17 = vmul.f32 1.442695, %v3592_v48  ;;  %2685 = vst.msk [vmem:[#allocation3 + $0x170] sm:$0xff] %vm955_vm6, %v2613_v52  ;;  %v2289_v30 = vpop.permute.xlu1 %2288  ;;  %v3226_v50 = vld [vmem:[#allocation3 + $0x160] sm:$0xff]  ;;  %v3235_v48 = vld [vmem:[#allocation3 + $0x1a8] sm:$0xff] }
 0x461   : > { %2360 = vst.msk [vmem:[#allocation3 + $0x180] sm:$0xff] %vm627_vm4, %v2289_v30  ;;  %3535 = vmatmul.mubr.f32.gmra.mxu1 %v3226_v50  ;;  %2954 = vrot.lane.b32.xlu0 %v6151_v44, %s4265_s28  ;;  %s4190_s28 = scalar_lea.vmem %s6757_s23, 4096 }
 0x462   : > { %4060 = vpow2.f32 %v3631_v17  ;;  %3960 = vmatprep.mubr.msk.f32.mxu1 %vm189_vm0, %v3229_v36  ;;  %p4191_p11 = scmp.ne.s32.totalorder %s6757_s23, %s4190_s28  ;;  %p4198_p7 = scmp.lt.s32.totalorder %s4196_s17, %s4190_s28 }
 0x463   : > { %v4057_v38 = vpop.eup %4056  ;;  %v2743_v60 = vpop.permute.xlu0 %2742 }
 0x464   : > { %v3687_v63 = vadd.f32 1.0, %v4057_v38  ;;  %2815 = vst.msk [vmem:[#allocation3 + $0x170] sm:$0xff] %vm1086_vm7, %v2743_v60  ;;  %v2485_v37 = vpop.permute.xlu1 %2484  ;;  %p4192_p13 = pnand %p4191_p11, %p6814_p12  ;;  %p4199_p8 = por %p4198_p7, %p4197_p5 }
 0x465   : > { %2556 = vst.msk [vmem:[#allocation3 + $0x180] sm:$0xff] %vm824_vm5, %v2485_v37 }
 0x466   : > { %4062 = vrcp.f32 %v3687_v63  ;;  %p4193_p4 = pneg %p4192_p13 }
 0x467   : > { %v4059_v18 = vpop.eup %4058  ;;  %v2939_v26 = vpop.permute.xlu0 %2938 }
 0x468   : > { %3782 = vst.msk [vmem:[%s6533_s8 + $0x28] sm:$0xff] %vm189_vm0, %v4059_v18  ;;  %v2615_v62 = vpop.permute.xlu1 %2614  ;;  %p4200_p10 = pnand %p4199_p8, %p4193_p4 }
 0x469   : > { %3011 = vst.msk [vmem:[#allocation3 + $0x170] sm:$0xff] %vm1283_vm8, %v2939_v26  ;;  %v3466_v4 = vpop.f32.mrf.mxu1 }
 0x46a   : > { %2686 = vst.msk [vmem:[#allocation3 + $0x180] sm:$0xff] %vm955_vm6, %v2615_v62  ;;  %v3593_v44 = vsub.f32 0.0, %v3466_v4  ;;  %v3237_v62 = vld [vmem:[#allocation3 + $0x1b8] sm:$0xff] }
 0x46b   : > { %v3468_v28 = vpop.f32.mrf.mxu1  ;;  %v3069_v0 = vpop.permute.xlu0 %3068 }
 0x46c   : > { %v3633_v46 = vmul.f32 1.442695, %v3593_v44  ;;  %3141 = vst.msk [vmem:[#allocation3 + $0x170] sm:$0xff] %vm1414_vm9, %v3069_v0  ;;  %v2745_v2 = vpop.permute.xlu1 %2744 }
 0x46d   : > { %2816 = vst.msk [vmem:[#allocation3 + $0x180] sm:$0xff] %vm1086_vm7, %v2745_v2 }
 0x46e   : > { %4064 = vpow2.f32 %v3633_v46 }
 0x46f   : > { %v4061_v59 = vpop.eup %4060  ;;  %v2161_v27 = vpop.permute.xlu0 %2160 }
 0x470   : > { %v3688_v41 = vadd.f32 1.0, %v4061_v59  ;;  %2231 = vst.msk [vmem:[#allocation3 + $0x190] sm:$0xff] %vm496_vm3, %v2161_v27  ;;  %v2941_v43 = vpop.permute.xlu1 %2940 }
 0x471   : > { %3012 = vst.msk [vmem:[#allocation3 + $0x180] sm:$0xff] %vm1283_vm8, %v2941_v43 }
 0x472   : > { %4066 = vrcp.f32 %v3688_v41 }
 0x473   : > { %v4063_v13 = vpop.eup %4062  ;;  %v2291_v33 = vpop.permute.xlu0 %2290  ;;  %v3228_v24 = vld [vmem:[#allocation3 + $0x170] sm:$0xff] }
 0x474   : > { %3783 = vst.msk [vmem:[%s6533_s8 + $0x30] sm:$0xff] %vm189_vm0, %v4063_v13  ;;  %v3071_v14 = vpop.permute.xlu1 %3070  ;;  %v3471_v8 = vpop.f32.mrf.mxu1  ;;  %3540 = vmatmul.mubr.f32.gmra.mxu1 %v3228_v24 }
 0x475   : > { %2361 = vst.msk [vmem:[#allocation3 + $0x190] sm:$0xff] %vm627_vm4, %v2291_v33  ;;  %v3594_v1 = vsub.f32 0.0, %v3471_v8  ;;  %3961 = vmatprep.mubr.msk.f32.mxu1 %vm189_vm0, %v3231_v9 }
 0x476   : > { %3142 = vst.msk [vmem:[#allocation3 + $0x180] sm:$0xff] %vm1414_vm9, %v3071_v14  ;;  %v3473_v35 = vpop.f32.mrf.mxu1 }
 0x477   : > { %v3635_v32 = vmul.f32 1.442695, %v3594_v1  ;;  %v2487_v5 = vpop.permute.xlu0 %2486 }
 0x478   : > { %v2163_v22 = vpop.permute.xlu1 %2162  ;;  %2557 = vst.msk [vmem:[#allocation3 + $0x190] sm:$0xff] %vm824_vm5, %v2487_v5 }
 0x479   : > { %4068 = vpow2.f32 %v3635_v32  ;;  %2232 = vst.msk [vmem:[#allocation3 + $0x1a0] sm:$0xff] %vm496_vm3, %v2163_v22  ;;  %v3239_v22 = vld [vmem:[#allocation3 + $0x1c8] sm:$0xff] }
 0x47b   : > { %v4065_v21 = vpop.eup %4064  ;;  %v2617_v31 = vpop.permute.xlu0 %2616 }
 0x47c   : > { %v3689_v39 = vadd.f32 1.0, %v4065_v21  ;;  %2687 = vst.msk [vmem:[#allocation3 + $0x190] sm:$0xff] %vm955_vm6, %v2617_v31  ;;  %v2293_v25 = vpop.permute.xlu1 %2292 }
 0x47d   : > { %v3230_v34 = vld [vmem:[#allocation3 + $0x180] sm:$0xff]  ;;  %2362 = vst.msk [vmem:[#allocation3 + $0x1a0] sm:$0xff] %vm627_vm4, %v2293_v25 }
 0x47e   : > { %4070 = vrcp.f32 %v3689_v39  ;;  %3545 = vmatmul.mubr.f32.gmra.mxu1 %v3230_v34 }
 0x47f   : > { %v4067_v47 = vpop.eup %4066  ;;  %3962 = vmatprep.mubr.msk.f32.mxu1 %vm189_vm0, %v3233_v42  ;;  %v2747_v49 = vpop.permute.xlu0 %2746 }
 0x480   : > { %3784 = vst.msk [vmem:[%s6533_s8 + $0x38] sm:$0xff] %vm189_vm0, %v4067_v47  ;;  %v2489_v29 = vpop.permute.xlu1 %2488  ;;  %v3476_v51 = vpop.f32.mrf.mxu1 }
 0x481   : > { %2817 = vst.msk [vmem:[#allocation3 + $0x190] sm:$0xff] %vm1086_vm7, %v2747_v49  ;;  %v3595_v6 = vsub.f32 0.0, %v3476_v51 }
 0x482   : > { %2558 = vst.msk [vmem:[#allocation3 + $0x1a0] sm:$0xff] %vm824_vm5, %v2489_v29  ;;  %v3478_v58 = vpop.f32.mrf.mxu1 }
 0x483   : > { %v3637_v61 = vmul.f32 1.442695, %v3595_v6  ;;  %v2943_v3 = vpop.permute.xlu0 %2942  ;;  %v3241_v6 = vld [vmem:[#allocation3 + $0x1d8] sm:$0xff] }
 0x484   : > { %3013 = vst.msk [vmem:[#allocation3 + $0x190] sm:$0xff] %vm1283_vm8, %v2943_v3  ;;  %v2619_v12 = vpop.permute.xlu1 %2618 }
 0x485   : > { %4072 = vpow2.f32 %v3637_v61  ;;  %2688 = vst.msk [vmem:[#allocation3 + $0x1a0] sm:$0xff] %vm955_vm6, %v2619_v12 }
 0x486   : > { %v4069_v20 = vpop.eup %4068 }
 0x487   : > { %v3690_v7 = vadd.f32 1.0, %v4069_v20  ;;  %v3073_v55 = vpop.permute.xlu0 %3072 }
 0x488   : > { %3143 = vst.msk [vmem:[#allocation3 + $0x190] sm:$0xff] %vm1414_vm9, %v3073_v55  ;;  %v2749_v53 = vpop.permute.xlu1 %2748 }
 0x489   : > { %4074 = vrcp.f32 %v3690_v7  ;;  %2818 = vst.msk [vmem:[#allocation3 + $0x1a0] sm:$0xff] %vm1086_vm7, %v2749_v53 }
 0x48b   : > { %v4071_v56 = vpop.eup %4070  ;;  %v2165_v16 = vpop.permute.xlu0 %2164 }
 0x48c   : > { %3785 = vst.msk [vmem:[%s6533_s8 + $0x40] sm:$0xff] %vm189_vm0, %v4071_v56  ;;  %v2945_v23 = vpop.permute.xlu1 %2944  ;;  %v3481_v45 = vpop.f32.mrf.mxu1 }
 0x48d   : > { %2233 = vst.msk [vmem:[#allocation3 + $0x1b0] sm:$0xff] %vm496_vm3, %v2165_v16  ;;  %v3596_v11 = vsub.f32 0.0, %v3481_v45 }
 0x48e   : > { %3014 = vst.msk [vmem:[#allocation3 + $0x1a0] sm:$0xff] %vm1283_vm8, %v2945_v23  ;;  %v3483_v54 = vpop.f32.mrf.mxu1 }
 0x48f   : > { %v3639_v57 = vmul.f32 1.442695, %v3596_v11  ;;  %v2295_v19 = vpop.permute.xlu0 %2294  ;;  %v3232_v15 = vld [vmem:[#allocation3 + $0x190] sm:$0xff] }
 0x490   : > { %v3075_v10 = vpop.permute.xlu1 %3074  ;;  %2363 = vst.msk [vmem:[#allocation3 + $0x1b0] sm:$0xff] %vm627_vm4, %v2295_v19  ;;  %3550 = vmatmul.mubr.f32.gmra.mxu1 %v3232_v15  ;;  %v3243_v15 = vld [vmem:[#allocation3 + $0x1e8] sm:$0xff] }
 0x491   : > { %4076 = vpow2.f32 %v3639_v57  ;;  %3144 = vst.msk [vmem:[#allocation3 + $0x1a0] sm:$0xff] %vm1414_vm9, %v3075_v10  ;;  %3963 = vmatprep.mubr.msk.f32.mxu1 %vm189_vm0, %v3235_v48 }
 0x492   : > { %v4073_v40 = vpop.eup %4072 }
 0x493   : > { %v3691_v17 = vadd.f32 1.0, %v4073_v40  ;;  %v2491_v52 = vpop.permute.xlu0 %2490 }
 0x494   : > { %v2167_v30 = vpop.permute.xlu1 %2166  ;;  %2559 = vst.msk [vmem:[#allocation3 + $0x1b0] sm:$0xff] %vm824_vm5, %v2491_v52 }
 0x495   : > { %4078 = vrcp.f32 %v3691_v17  ;;  %2234 = vst.msk [vmem:[#allocation3 + $0x1c0] sm:$0xff] %vm496_vm3, %v2167_v30  ;;  %v3486_v50 = vpop.f32.mrf.mxu1 }
 0x496   : > { %v4075_v36 = vpop.eup %4074  ;;  %v3597_v38 = vsub.f32 0.0, %v3486_v50 }
 0x497   : > { %3786 = vst.msk [vmem:[%s6533_s8 + $0x48] sm:$0xff] %vm189_vm0, %v4075_v36  ;;  %v3488_v63 = vpop.f32.mrf.mxu1  ;;  %v2621_v60 = vpop.permute.xlu0 %2620 }
 0x498   : > { %v3641_v37 = vmul.f32 1.442695, %v3597_v38  ;;  %2689 = vst.msk [vmem:[#allocation3 + $0x1b0] sm:$0xff] %vm955_vm6, %v2621_v60  ;;  %v2297_v18 = vpop.permute.xlu1 %2296  ;;  %v3234_v26 = vld [vmem:[#allocation3 + $0x1a0] sm:$0xff] }
 0x499   : > { %2364 = vst.msk [vmem:[#allocation3 + $0x1c0] sm:$0xff] %vm627_vm4, %v2297_v18  ;;  %3555 = vmatmul.mubr.f32.gmra.mxu1 %v3234_v26 }
 0x49a   : > { %4080 = vpow2.f32 %v3641_v37  ;;  %3964 = vmatprep.mubr.msk.f32.mxu1 %vm189_vm0, %v3237_v62  ;;  %v3245_v37 = vld [vmem:[#allocation3 + $0x1f8] sm:$0xff] }
 0x49b   : > { %v2751_v4 = vpop.permute.xlu0 %2750 }
 0x49c   : > { %2819 = vst.msk [vmem:[#allocation3 + $0x1b0] sm:$0xff] %vm1086_vm7, %v2751_v4  ;;  %v2493_v44 = vpop.permute.xlu1 %2492 }
 0x49d   : > { %2560 = vst.msk [vmem:[#allocation3 + $0x1c0] sm:$0xff] %vm824_vm5, %v2493_v44 }
 0x49e   : > { %v4077_v28 = vpop.eup %4076 }
 0x49f   : > { %v3692_v46 = vadd.f32 1.0, %v4077_v28  ;;  %v2947_v0 = vpop.permute.xlu0 %2946 }
 0x4a0   : > { %3015 = vst.msk [vmem:[#allocation3 + $0x1b0] sm:$0xff] %vm1283_vm8, %v2947_v0  ;;  %v2623_v2 = vpop.permute.xlu1 %2622 }
 0x4a1   : > { %4082 = vrcp.f32 %v3692_v46  ;;  %2690 = vst.msk [vmem:[#allocation3 + $0x1c0] sm:$0xff] %vm955_vm6, %v2623_v2 }
 0x4a2   : > { %v4079_v59 = vpop.eup %4078 }
 0x4a3   : > { %3787 = vst.msk [vmem:[%s6533_s8 + $0x50] sm:$0xff] %vm189_vm0, %v4079_v59  ;;  %v3077_v41 = vpop.permute.xlu0 %3076 }
 0x4a4   : > { %3145 = vst.msk [vmem:[#allocation3 + $0x1b0] sm:$0xff] %vm1414_vm9, %v3077_v41  ;;  %v2753_v27 = vpop.permute.xlu1 %2752 }
 0x4a5   : > { %2820 = vst.msk [vmem:[#allocation3 + $0x1c0] sm:$0xff] %vm1086_vm7, %v2753_v27 }
 0x4a7   : > { %v4081_v43 = vpop.eup %4080  ;;  %v2169_v13 = vpop.permute.xlu0 %2168 }
 0x4a8   : > { %v3693_v33 = vadd.f32 1.0, %v4081_v43  ;;  %2235 = vst.msk [vmem:[#allocation3 + $0x1d0] sm:$0xff] %vm496_vm3, %v2169_v13  ;;  %v2949_v24 = vpop.permute.xlu1 %2948  ;;  %v3491_v14 = vpop.f32.mrf.mxu1 }
 0x4a9   : > { %3016 = vst.msk [vmem:[#allocation3 + $0x1c0] sm:$0xff] %vm1283_vm8, %v2949_v24  ;;  %v3598_v8 = vsub.f32 0.0, %v3491_v14 }
 0x4aa   : > { %4084 = vrcp.f32 %v3693_v33  ;;  %v3493_v9 = vpop.f32.mrf.mxu1 }
 0x4ab   : > { %v3643_v1 = vmul.f32 1.442695, %v3598_v8  ;;  %v2299_v35 = vpop.permute.xlu0 %2298  ;;  %v3236_v32 = vld [vmem:[#allocation3 + $0x1b0] sm:$0xff] }
 0x4ac   : > { %v3079_v5 = vpop.permute.xlu1 %3078  ;;  %2365 = vst.msk [vmem:[#allocation3 + $0x1d0] sm:$0xff] %vm627_vm4, %v2299_v35  ;;  %3560 = vmatmul.mubr.f32.gmra.mxu1 %v3236_v32 }
 0x4ad   : > { %4086 = vpow2.f32 %v3643_v1  ;;  %3146 = vst.msk [vmem:[#allocation3 + $0x1c0] sm:$0xff] %vm1414_vm9, %v3079_v5  ;;  %3965 = vmatprep.mubr.msk.f32.mxu1 %vm189_vm0, %v3239_v22 }
 0x4ae   : > { %v4083_v21 = vpop.eup %4082 }
 0x4af   : > { %3788 = vst.msk [vmem:[%s6533_s8 + $0x58] sm:$0xff] %vm189_vm0, %v4083_v21  ;;  %v2495_v39 = vpop.permute.xlu0 %2494 }
 0x4b0   : > { %v2171_v31 = vpop.permute.xlu1 %2170  ;;  %2561 = vst.msk [vmem:[#allocation3 + $0x1d0] sm:$0xff] %vm824_vm5, %v2495_v39 }
 0x4b1   : > { %2236 = vst.msk [vmem:[#allocation3 + $0x1e0] sm:$0xff] %vm496_vm3, %v2171_v31  ;;  %v3496_v25 = vpop.f32.mrf.mxu1 }
 0x4b2   : > { %v3599_v34 = vsub.f32 0.0, %v3496_v25 }
 0x4b3   : > { %v3498_v42 = vpop.f32.mrf.mxu1  ;;  %v2625_v47 = vpop.permute.xlu0 %2624 }
 0x4b4   : > { %v3645_v49 = vmul.f32 1.442695, %v3599_v34  ;;  %v2301_v29 = vpop.permute.xlu1 %2300  ;;  %2691 = vst.msk [vmem:[#allocation3 + $0x1d0] sm:$0xff] %vm955_vm6, %v2625_v47  ;;  %v3238_v51 = vld [vmem:[#allocation3 + $0x1c0] sm:$0xff] }
 0x4b5   : > { %2366 = vst.msk [vmem:[#allocation3 + $0x1e0] sm:$0xff] %vm627_vm4, %v2301_v29  ;;  %3565 = vmatmul.mubr.f32.gmra.mxu1 %v3238_v51 }
 0x4b6   : > { %4088 = vpow2.f32 %v3645_v49  ;;  %3966 = vmatprep.mubr.msk.f32.mxu1 %vm189_vm0, %v3241_v6 }
 0x4b7   : > { %v4085_v58 = vpop.eup %4084  ;;  %v2755_v61 = vpop.permute.xlu0 %2754 }
 0x4b8   : > { %3789 = vst.msk [vmem:[%s6533_s8 + $0x60] sm:$0xff] %vm189_vm0, %v4085_v58  ;;  %v2497_v3 = vpop.permute.xlu1 %2496 }
 0x4b9   : > { %2821 = vst.msk [vmem:[#allocation3 + $0x1d0] sm:$0xff] %vm1086_vm7, %v2755_v61 }
 0x4ba   : > { %2562 = vst.msk [vmem:[#allocation3 + $0x1e0] sm:$0xff] %vm824_vm5, %v2497_v3  ;;  %v4087_v12 = vpop.eup %4086 }
 0x4bb   : > { %v3694_v20 = vadd.f32 1.0, %v4087_v12  ;;  %v2951_v7 = vpop.permute.xlu0 %2950 }
 0x4bc   : > { %v2627_v55 = vpop.permute.xlu1 %2626  ;;  %3017 = vst.msk [vmem:[#allocation3 + $0x1d0] sm:$0xff] %vm1283_vm8, %v2951_v7 }
 0x4bd   : > { %4090 = vrcp.f32 %v3694_v20  ;;  %2692 = vst.msk [vmem:[#allocation3 + $0x1e0] sm:$0xff] %vm955_vm6, %v2627_v55 }
 0x4bf   : > { %v3081_v53 = vpop.permute.xlu0 %3080 }
 0x4c0   : > { %v2757_v56 = vpop.permute.xlu1 %2756  ;;  %3147 = vst.msk [vmem:[#allocation3 + $0x1d0] sm:$0xff] %vm1414_vm9, %v3081_v53 }
 0x4c1   : > { %2822 = vst.msk [vmem:[#allocation3 + $0x1e0] sm:$0xff] %vm1086_vm7, %v2757_v56 }
 0x4c3   : > { %v4089_v16 = vpop.eup %4088  ;;  %v2173_v23 = vpop.permute.xlu0 %2172 }
 0x4c4   : > { %v3695_v45 = vadd.f32 1.0, %v4089_v16  ;;  %v2953_v11 = vpop.permute.xlu1 %2952  ;;  %2237 = vst.msk [vmem:[#allocation3 + $0x1f0] sm:$0xff] %vm496_vm3, %v2173_v23  ;;  %v3501_v54 = vpop.f32.mrf.mxu1 }
 0x4c5   : > { %3018 = vst.msk [vmem:[#allocation3 + $0x1e0] sm:$0xff] %vm1283_vm8, %v2953_v11  ;;  %v3600_v57 = vsub.f32 0.0, %v3501_v54 }
 0x4c6   : > { %4092 = vrcp.f32 %v3695_v45  ;;  %v3503_v19 = vpop.f32.mrf.mxu1 }
 0x4c7   : > { %v3647_v10 = vmul.f32 1.442695, %v3600_v57  ;;  %v2303_v48 = vpop.permute.xlu0 %2302  ;;  %v3240_v40 = vld [vmem:[#allocation3 + $0x1d0] sm:$0xff] }
 0x4c8   : > { %v3083_v17 = vpop.permute.xlu1 %3082  ;;  %2367 = vst.msk [vmem:[#allocation3 + $0x1f0] sm:$0xff] %vm627_vm4, %v2303_v48  ;;  %3570 = vmatmul.mubr.f32.gmra.mxu1 %v3240_v40 }
 0x4c9   : > { %4094 = vpow2.f32 %v3647_v10  ;;  %3148 = vst.msk [vmem:[#allocation3 + $0x1e0] sm:$0xff] %vm1414_vm9, %v3083_v17  ;;  %3967 = vmatprep.mubr.msk.f32.mxu1 %vm189_vm0, %v3243_v15 }
 0x4ca   : > { %v4091_v52 = vpop.eup %4090 }
 0x4cb   : > { %3790 = vst.msk [vmem:[%s6533_s8 + $0x68] sm:$0xff] %vm189_vm0, %v4091_v52  ;;  %v2499_v30 = vpop.permute.xlu0 %2498 }
 0x4cc   : > { %2563 = vst.msk [vmem:[#allocation3 + $0x1f0] sm:$0xff] %vm824_vm5, %v2499_v30  ;;  %v2759_v36 = vpop.permute.xlu1 %2758 }
 0x4cd   : > { %v3506_v50 = vpop.f32.mrf.mxu1 }
 0x4ce   : > { %v3601_v38 = vsub.f32 0.0, %v3506_v50 }
 0x4cf   : > { %v3508_v63 = vpop.f32.mrf.mxu1  ;;  %v2629_v60 = vpop.permute.xlu0 %2628 }
 0x4d0   : > { %v3649_v18 = vmul.f32 1.442695, %v3601_v38  ;;  %2693 = vst.msk [vmem:[#allocation3 + $0x1f0] sm:$0xff] %vm955_vm6, %v2629_v60  ;;  %v3242_v26 = vld [vmem:[#allocation3 + $0x1e0] sm:$0xff]  ;;  %v3085_v44 = vpop.permute.xlu1 %3084 }
 0x4d1   : > { %2823 = vst.msk [vmem:[#allocation3 + $0x1f0] sm:$0xff] %vm1086_vm7, %v2759_v36  ;;  %3575 = vmatmul.mubr.f32.gmra.mxu1 %v3242_v26 }
 0x4d2   : > { %4096 = vpow2.f32 %v3649_v18  ;;  %3968 = vmatprep.mubr.msk.f32.mxu1 %vm189_vm0, %v3245_v37 }
 0x4d3   : > { %v4093_v62 = vpop.eup %4092  ;;  %v2955_v4 = vpop.permute.xlu0 %2954 }
 0x4d4   : > { %3791 = vst.msk [vmem:[%s6533_s8 + $0x70] sm:$0xff] %vm189_vm0, %v4093_v62 }
 0x4d5   : > { %3019 = vst.msk [vmem:[#allocation3 + $0x1f0] sm:$0xff] %vm1283_vm8, %v2955_v4 }
 0x4d6   : > { %3149 = vst.msk [vmem:[#allocation3 + $0x1f0] sm:$0xff] %vm1414_vm9, %v3085_v44  ;;  %v4095_v28 = vpop.eup %4094 }
 0x4d7   : > { %v3696_v46 = vadd.f32 1.0, %v4095_v28 }
 0x4d9   : > { %4098 = vrcp.f32 %v3696_v46 }
 0x4dd   : > { %v3244_v0 = vld [vmem:[#allocation3 + $0x1f0] sm:$0xff] }
 0x4de   : > { %3580 = vmatmul.mubr.f32.gmra.mxu1 %v3244_v0 }
 0x4df   : > { %v4097_v2 = vpop.eup %4096 }
 0x4e0   : > { %v3697_v59 = vadd.f32 1.0, %v4097_v2  ;;  %v3511_v41 = vpop.f32.mrf.mxu1 }
 0x4e1   : > { %v3602_v27 = vsub.f32 0.0, %v3511_v41 }
 0x4e2   : > { %4100 = vrcp.f32 %v3697_v59  ;;  %v3513_v43 = vpop.f32.mrf.mxu1 }
 0x4e3   : > { %v3651_v13 = vmul.f32 1.442695, %v3602_v27 }
 0x4e5   : > { %4102 = vpow2.f32 %v3651_v13 }
 0x4e6   : > { %v4099_v33 = vpop.eup %4098 }
 0x4e7   : > { %3792 = vst.msk [vmem:[%s6533_s8 + $0x78] sm:$0xff] %vm189_vm0, %v4099_v33 }
 0x4e9   : > { %v3516_v24 = vpop.f32.mrf.mxu1 }
 0x4ea   : > { %v3603_v14 = vsub.f32 0.0, %v3516_v24 }
 0x4eb   : > { %v3518_v8 = vpop.f32.mrf.mxu1 }
 0x4ec   : > { %v3653_v9 = vmul.f32 1.442695, %v3603_v14 }
 0x4ee   : > { %4104 = vpow2.f32 %v3653_v9 }
 0x4ef   : > { %v4101_v1 = vpop.eup %4100 }
 0x4f0   : > { %3793 = vst.msk [vmem:[%s6533_s8 + $0x80] sm:$0xff] %vm189_vm0, %v4101_v1 }
 0x4f2   : > { %v4103_v35 = vpop.eup %4102 }
 0x4f3   : > { %v3698_v32 = vadd.f32 1.0, %v4103_v35 }
 0x4f5   : > { %4106 = vrcp.f32 %v3698_v32 }
 0x4fb   : > { %v4105_v5 = vpop.eup %4104 }
 0x4fc   : > { %v3699_v22 = vadd.f32 1.0, %v4105_v5  ;;  %v3521_v21 = vpop.f32.mrf.mxu1 }
 0x4fd   : > { %v3604_v39 = vsub.f32 0.0, %v3521_v21 }
 0x4fe   : > { %4108 = vrcp.f32 %v3699_v22  ;;  %v3523_v31 = vpop.f32.mrf.mxu1 }
 0x4ff   : > { %v3655_v25 = vmul.f32 1.442695, %v3604_v39 }
 0x501   : > { %4110 = vpow2.f32 %v3655_v25 }
 0x502   : > { %v4107_v34 = vpop.eup %4106 }
 0x503   : > { %3794 = vst.msk [vmem:[%s6533_s8 + $0x88] sm:$0xff] %vm189_vm0, %v4107_v34 }
 0x505   : > { %v3526_v42 = vpop.f32.mrf.mxu1 }
 0x506   : > { %v3605_v47 = vsub.f32 0.0, %v3526_v42 }
 0x507   : > { %v3528_v49 = vpop.f32.mrf.mxu1 }
 0x508   : > { %v3657_v29 = vmul.f32 1.442695, %v3605_v47 }
 0x50a   : > { %4112 = vpow2.f32 %v3657_v29 }
 0x50b   : > { %v4109_v51 = vpop.eup %4108 }
 0x50c   : > { %3795 = vst.msk [vmem:[%s6533_s8 + $0x90] sm:$0xff] %vm189_vm0, %v4109_v51 }
 0x50e   : > { %v4111_v6 = vpop.eup %4110 }
 0x50f   : > { %v3700_v58 = vadd.f32 1.0, %v4111_v6 }
 0x511   : > { %4114 = vrcp.f32 %v3700_v58 }
 0x517   : > { %v4113_v61 = vpop.eup %4112 }
 0x518   : > { %v3701_v3 = vadd.f32 1.0, %v4113_v61 }
 0x519   : > { %v3531_v12 = vpop.f32.mrf.mxu1 }
 0x51a   : > { %v3606_v20 = vsub.f32 0.0, %v3531_v12  ;;  %4116 = vrcp.f32 %v3701_v3 }
 0x51b   : > { %v3533_v7 = vpop.f32.mrf.mxu1 }
 0x51c   : > { %v3659_v55 = vmul.f32 1.442695, %v3606_v20 }
 0x51e   : > { %4118 = vpow2.f32 %v3659_v55  ;;  %v4115_v53 = vpop.eup %4114 }
 0x51f   : > { %3796 = vst.msk [vmem:[%s6533_s8 + $0x98] sm:$0xff] %vm189_vm0, %v4115_v53 }
 0x521   : > { %v3536_v56 = vpop.f32.mrf.mxu1 }
 0x522   : > { %v3607_v16 = vsub.f32 0.0, %v3536_v56 }
 0x523   : > { %v3538_v23 = vpop.f32.mrf.mxu1 }
 0x524   : > { %v3661_v45 = vmul.f32 1.442695, %v3607_v16 }
 0x526   : > { %4120 = vpow2.f32 %v3661_v45 }
 0x527   : > { %v4117_v11 = vpop.eup %4116 }
 0x528   : > { %3797 = vst.msk [vmem:[%s6533_s8 + $0xa0] sm:$0xff] %vm189_vm0, %v4117_v11 }
 0x52b   : > { %v4119_v54 = vpop.eup %4118 }
 0x52c   : > { %v3702_v57 = vadd.f32 1.0, %v4119_v54 }
 0x52e   : > { %4122 = vrcp.f32 %v3702_v57 }
 0x533   : > { %v4121_v19 = vpop.eup %4120 }
 0x534   : > { %v3703_v15 = vadd.f32 1.0, %v4121_v19  ;;  %v3541_v10 = vpop.f32.mrf.mxu1 }
 0x535   : > { %v3608_v48 = vsub.f32 0.0, %v3541_v10 }
 0x536   : > { %4124 = vrcp.f32 %v3703_v15  ;;  %v3543_v40 = vpop.f32.mrf.mxu1 }
 0x537   : > { %v3663_v17 = vmul.f32 1.442695, %v3608_v48 }
 0x539   : > { %4126 = vpow2.f32 %v3663_v17 }
 0x53b   : > { %v4123_v52 = vpop.eup %4122 }
 0x53c   : > { %3798 = vst.msk [vmem:[%s6533_s8 + $0xa8] sm:$0xff] %vm189_vm0, %v4123_v52 }
 0x53e   : > { %v3546_v30 = vpop.f32.mrf.mxu1 }
 0x53f   : > { %v3609_v50 = vsub.f32 0.0, %v3546_v30 }
 0x540   : > { %v3548_v36 = vpop.f32.mrf.mxu1 }
 0x541   : > { %v3665_v38 = vmul.f32 1.442695, %v3609_v50 }
 0x543   : > { %4128 = vpow2.f32 %v3665_v38  ;;  %v4125_v63 = vpop.eup %4124 }
 0x544   : > { %3799 = vst.msk [vmem:[%s6533_s8 + $0xb0] sm:$0xff] %vm189_vm0, %v4125_v63 }
 0x546   : > { %v4127_v60 = vpop.eup %4126 }
 0x547   : > { %v3704_v37 = vadd.f32 1.0, %v4127_v60 }
 0x549   : > { %4130 = vrcp.f32 %v3704_v37 }
 0x550   : > { %v4129_v18 = vpop.eup %4128  ;;  %v3551_v62 = vpop.f32.mrf.mxu1 }
 0x551   : > { %v3705_v26 = vadd.f32 1.0, %v4129_v18  ;;  %v3610_v4 = vsub.f32 0.0, %v3551_v62 }
 0x552   : > { %v3553_v44 = vpop.f32.mrf.mxu1 }
 0x553   : > { %4132 = vrcp.f32 %v3705_v26  ;;  %v3667_v28 = vmul.f32 1.442695, %v3610_v4 }
 0x555   : > { %4134 = vpow2.f32 %v3667_v28 }
 0x556   : > { %v4131_v46 = vpop.eup %4130 }
 0x557   : > { %3800 = vst.msk [vmem:[%s6533_s8 + $0xb8] sm:$0xff] %vm189_vm0, %v4131_v46 }
 0x559   : > { %v3556_v0 = vpop.f32.mrf.mxu1 }
 0x55a   : > { %v3611_v2 = vsub.f32 0.0, %v3556_v0 }
 0x55b   : > { %v3558_v59 = vpop.f32.mrf.mxu1 }
 0x55c   : > { %v3669_v41 = vmul.f32 1.442695, %v3611_v2 }
 0x55e   : > { %4136 = vpow2.f32 %v3669_v41 }
 0x560   : > { %v4133_v27 = vpop.eup %4132 }
 0x561   : > { %3801 = vst.msk [vmem:[%s6533_s8 + $0xc0] sm:$0xff] %vm189_vm0, %v4133_v27 }
 0x562   : > { %v4135_v43 = vpop.eup %4134 }
 0x563   : > { %v3706_v13 = vadd.f32 1.0, %v4135_v43 }
 0x565   : > { %4138 = vrcp.f32 %v3706_v13 }
 0x56b   : > { %v4137_v33 = vpop.eup %4136 }
 0x56c   : > { %v3707_v24 = vadd.f32 1.0, %v4137_v33  ;;  %v3561_v14 = vpop.f32.mrf.mxu1 }
 0x56d   : > { %v3612_v8 = vsub.f32 0.0, %v3561_v14 }
 0x56e   : > { %4140 = vrcp.f32 %v3707_v24  ;;  %v3563_v9 = vpop.f32.mrf.mxu1 }
 0x56f   : > { %v3671_v1 = vmul.f32 1.442695, %v3612_v8 }
 0x571   : > { %4142 = vpow2.f32 %v3671_v1 }
 0x572   : > { %v4139_v35 = vpop.eup %4138 }
 0x573   : > { %3802 = vst.msk [vmem:[%s6533_s8 + $0xc8] sm:$0xff] %vm189_vm0, %v4139_v35 }
 0x575   : > { %v3566_v32 = vpop.f32.mrf.mxu1 }
 0x576   : > { %v3613_v5 = vsub.f32 0.0, %v3566_v32 }
 0x577   : > { %v3568_v22 = vpop.f32.mrf.mxu1 }
 0x578   : > { %v3673_v21 = vmul.f32 1.442695, %v3613_v5 }
 0x57a   : > { %4144 = vpow2.f32 %v3673_v21 }
 0x57b   : > { %v4141_v39 = vpop.eup %4140 }
 0x57c   : > { %3803 = vst.msk [vmem:[%s6533_s8 + $0xd0] sm:$0xff] %vm189_vm0, %v4141_v39 }
 0x57e   : > { %v4143_v31 = vpop.eup %4142 }
 0x57f   : > { %v3708_v25 = vadd.f32 1.0, %v4143_v31 }
 0x581   : > { %4146 = vrcp.f32 %v3708_v25 }
 0x587   : > { %v4145_v34 = vpop.eup %4144 }
 0x588   : > { %v3709_v42 = vadd.f32 1.0, %v4145_v34  ;;  %v3571_v47 = vpop.f32.mrf.mxu1 }
 0x589   : > { %v3614_v49 = vsub.f32 0.0, %v3571_v47 }
 0x58a   : > { %4148 = vrcp.f32 %v3709_v42  ;;  %v3573_v29 = vpop.f32.mrf.mxu1 }
 0x58b   : > { %v3675_v51 = vmul.f32 1.442695, %v3614_v49 }
 0x58d   : > { %4150 = vpow2.f32 %v3675_v51 }
 0x58e   : > { %v4147_v6 = vpop.eup %4146 }
 0x58f   : > { %3804 = vst.msk [vmem:[%s6533_s8 + $0xd8] sm:$0xff] %vm189_vm0, %v4147_v6 }
 0x591   : > { %v3576_v58 = vpop.f32.mrf.mxu1 }
 0x592   : > { %v3615_v61 = vsub.f32 0.0, %v3576_v58 }
 0x593   : > { %v3578_v3 = vpop.f32.mrf.mxu1 }
 0x594   : > { %v3677_v12 = vmul.f32 1.442695, %v3615_v61 }
 0x596   : > { %4152 = vpow2.f32 %v3677_v12 }
 0x597   : > { %v4149_v20 = vpop.eup %4148 }
 0x598   : > { %3805 = vst.msk [vmem:[%s6533_s8 + $0xe0] sm:$0xff] %vm189_vm0, %v4149_v20 }
 0x59a   : > { %v4151_v7 = vpop.eup %4150 }
 0x59b   : > { %v3710_v55 = vadd.f32 1.0, %v4151_v7 }
 0x59d   : > { %4154 = vrcp.f32 %v3710_v55 }
 0x59e   : > { %v3581_v53 = vpop.f32.mrf.mxu1 }
 0x59f   : > { %v3616_v56 = vsub.f32 0.0, %v3581_v53 }
 0x5a0   : > { %v3583_v16 = vpop.f32.mrf.mxu1 }
 0x5a1   : > { %v3679_v23 = vmul.f32 1.442695, %v3616_v56 }
 0x5a3   : > { %4156 = vpow2.f32 %v3679_v23  ;;  %v4153_v45 = vpop.eup %4152 }
 0x5a4   : > { %v3711_v11 = vadd.f32 1.0, %v4153_v45 }
 0x5a6   : > { %4158 = vrcp.f32 %v3711_v11 }
 0x5aa   : > { %v4155_v54 = vpop.eup %4154 }
 0x5ab   : > { %3806 = vst.msk [vmem:[%s6533_s8 + $0xe8] sm:$0xff] %vm189_vm0, %v4155_v54 }
 0x5b0   : > { %v4157_v57 = vpop.eup %4156 }
 0x5b1   : > { %v3712_v19 = vadd.f32 1.0, %v4157_v57 }
 0x5b3   : > { %4160 = vrcp.f32 %v3712_v19  ;;  %v4159_v15 = vpop.eup %4158 }
 0x5b4   : > { %3807 = vst.msk [vmem:[%s6533_s8 + $0xf0] sm:$0xff] %vm189_vm0, %v4159_v15 }
 0x5c0   : > { %v4161_v10 = vpop.eup %4160 }
 0x5c1   : > { %3808 = vst.msk [vmem:[%s6533_s8 + $0xf8] sm:$0xff] %vm189_vm0, %v4161_v10 }
 0x5c2   : > { %4203 = shalt.err (!%p4200_p10)
}
 0x5c3   : > { %s4204_s19 = scalar_lea.hbm %s6755_s20, 4096  ;;  %s4208_s30 = scalar_lea.hbm %s6805_s3, 8192 }
 0x5c4   : > { %p4205_p0 = scmp.ne.s32.totalorder %s6755_s20, %s4204_s19  ;;  %p4209_p1 = scmp.lt.s32.totalorder %s6755_s20, %s6805_s3 }
 0x5c5   : > { %p4210_p3 = scmp.lt.s32.totalorder %s4208_s30, %s4204_s19 }
 0x5c6   : > { %p4206_p2 = pnand %p4205_p0, %p6814_p12 }
 0x5c7   : > { %p4211_p6 = por %p4210_p3, %p4209_p1 }
 0x5c8   : > { %p4207_p9 = pneg %p4206_p2 }
 0x5ca   : > { %p4212_p11 = pnand %p4211_p6, %p4207_p9 }
 0x5cc   : > { %4215 = shalt.err (!%p4212_p11)
}
 0x5cd   : > { %s4268_s7 = smov 128   ;;  %s4269_s8 = smov 8  }
 0x5ce   : > { %3978 = dma.vmem_to_hbm [thread:$0]  (%p6814_p12), %s6757_s23, 4096, %s6755_s20, %s3810_s22, %s4268_s7, %s4268_s7, %s4269_s8  }
 0x5cf PF: > { %s3838_s9 = sand.u32 1, %s4242_s12   ;;  %p6815_p13 = scmp.ne.s32.totalorder %s6811_s25, 0 }
 0x5d0   : > { %p6816_p4 = scmp.ge.s32.totalorder %s4254_s15, 2  ;;  %s3839_s4 = scalar_lea.sflag [#allocation6], %s3838_s9 }
 0x5d2   : > { %p3985_p5 = pnand %p6816_p4, %p6815_p13 }
 0x5d4   : > { %p3986_p7 = pneg %p3985_p5 }
 0x5d6   : > { %4237 = dma.done.wait (%p3986_p7), %s3839_s4, 4096  }
 0x5d7   : > { %4239 = vsyncadd (%p3986_p7), %s3839_s4, 4294963200  ;;  %p16_p8 = scmp.ge.s32.totalorder %s4315_s18, 4   ;;  %s6817_s12 = smov %s4246_s13 }
 0x5d8   : > { %s6818_s13 = smov %s4250_s14  ;;  %s6819_s14 = smov %s4327_s21 }
 0x5d9   : > { %s6820_s15 = smov %s4315_s18  ;;  %18 = sbr.rel (!%p16_p8) target bundleno = 5 (0x5), region = 79 }
 0x5de   :  { %3844 = vsyncpa [#allocation5], 1 }
 0x5df   :  { %3846 = vsyncpa [#allocation5 + $0x1], 1 }
 0x5e0   :  { %3847 = vsyncpa [#allocation6], 1 }
 0x5e1   :  { %3849 = vsyncpa [#allocation6 + $0x1], 1 }

</bundles_post_ra>
